<compile_context>
chip_gen: v5e
topology: v5e:2x2
jax: 0.10.0
libtpu: 0.0.40
codegen_flags: <defaults>
</compile_context>

<pallas_src>
import jax
import jax.numpy as jnp
from jax import lax
from jax.experimental import pallas as pl
from jax.experimental.pallas import tpu as pltpu


# ------------------------------- helpers ----------------------------------- #

def _pick_time_block(T, cap=128):
    """Largest divisor of T that is <= cap (so no time padding is needed)."""
    tb = min(T, cap)
    while T % tb:
        tb -= 1
    return tb


def _vmem_limit(n_bytes):
    """Scoped-VMEM hint: >= the 32 MiB default, raised (2x margin) when blocks need it."""
    return int(min(max(32 << 20, 2 * int(n_bytes)), 96 << 20))


# --------------------------- fused BiLSTM kernels --------------------------- #

def _make_bilstm_kernel(Tb, H, pooled):
    """Build the fused bidirectional LSTM kernel body.

    Inputs per grid step g (time chunk of Tb steps):
      gf_ref : (Tb, B, 4H) f32   precomputed x@W_ih_f + b_f, forward time order
      gb_ref : (Tb, B, 4H) f32   precomputed x@W_ih_b + b_b, block (nT-1-g) of time
      whf/whb: (H, 4H) bf16      hidden->gate weights, resident (constant index_map)
    pooled=False outputs: of/ob (Tb, B, H) bf16 per-direction hidden sequences.
    pooled=True  outputs: (B, C) f32 logits (running max-pool + FC fused, emitted once).
    Gate order matches PyTorch nn.LSTM: [i, f, g, o].
    """

    def _cell(pre, h, c, w_hh):
        # pre: (B, 4H) f32 (x-projection + bias);  h, c: (B, H) f32;  w_hh: (H, 4H) bf16
        g = pre + jnp.dot(h.astype(w_hh.dtype), w_hh,
                          preferred_element_type=jnp.float32)
        i_g = jax.nn.sigmoid(g[:, 0:H])
        f_g = jax.nn.sigmoid(g[:, H:2 * H])
        g_g = jnp.tanh(g[:, 2 * H:3 * H])
        o_g = jax.nn.sigmoid(g[:, 3 * H:4 * H])
        c_new = f_g * c + i_g * g_g
        h_new = o_g * jnp.tanh(c_new)
        return h_new, c_new

    unroll = bool(Tb <= 32)

    if not pooled:
        def kernel(gf_ref, gb_ref, whf_ref, whb_ref, of_ref, ob_ref,
                   hf_sc, cf_sc, hb_sc, cb_sc):
            @pl.when(pl.program_id(0) == 0)
            def _():
                hf_sc[...] = jnp.zeros_like(hf_sc)
                cf_sc[...] = jnp.zeros_like(cf_sc)
                hb_sc[...] = jnp.zeros_like(hb_sc)
                cb_sc[...] = jnp.zeros_like(cb_sc)

            whf = whf_ref[...]
            whb = whb_ref[...]

            def step(j, carry):
                h_f, c_f, h_b, c_b = carry
                h_f, c_f = _cell(gf_ref[j], h_f, c_f, whf)
                h_b, c_b = _cell(gb_ref[Tb - 1 - j], h_b, c_b, whb)
                of_ref[j] = h_f.astype(of_ref.dtype)
                ob_ref[Tb - 1 - j] = h_b.astype(ob_ref.dtype)
                return h_f, c_f, h_b, c_b

            carry = (hf_sc[...], cf_sc[...], hb_sc[...], cb_sc[...])
            h_f, c_f, h_b, c_b = lax.fori_loop(0, Tb, step, carry,
                                               unroll=unroll)
            hf_sc[...] = h_f
            cf_sc[...] = c_f
            hb_sc[...] = h_b
            cb_sc[...] = c_b

        return kernel

    def kernel(gf_ref, gb_ref, whf_ref, whb_ref, wfc_ref, bfc_ref, out_ref,
               hf_sc, cf_sc, hb_sc, cb_sc, mxf_sc, mxb_sc):
        @pl.when(pl.program_id(0) == 0)
        def _():
            hf_sc[...] = jnp.zeros_like(hf_sc)
            cf_sc[...] = jnp.zeros_like(cf_sc)
            hb_sc[...] = jnp.zeros_like(hb_sc)
            cb_sc[...] = jnp.zeros_like(cb_sc)
            mxf_sc[...] = jnp.full_like(mxf_sc, -jnp.inf)
            mxb_sc[...] = jnp.full_like(mxb_sc, -jnp.inf)

        whf = whf_ref[...]
        whb = whb_ref[...]

        def step(j, carry):
            h_f, c_f, h_b, c_b, m_f, m_b = carry
            h_f, c_f = _cell(gf_ref[j], h_f, c_f, whf)
            h_b, c_b = _cell(gb_ref[Tb - 1 - j], h_b, c_b, whb)
            return (h_f, c_f, h_b, c_b,
                    jnp.maximum(m_f, h_f), jnp.maximum(m_b, h_b))

        carry = (hf_sc[...], cf_sc[...], hb_sc[...], cb_sc[...],
                 mxf_sc[...], mxb_sc[...])
        h_f, c_f, h_b, c_b, m_f, m_b = lax.fori_loop(0, Tb, step, carry,
                                                     unroll=unroll)
        hf_sc[...] = h_f
        cf_sc[...] = c_f
        hb_sc[...] = h_b
        cb_sc[...] = c_b
        mxf_sc[...] = m_f
        mxb_sc[...] = m_b

        @pl.when(pl.program_id(0) == pl.num_programs(0) - 1)
        def _():
            # Fused max-pool + FC: logits = [max_f, max_b] @ W_fc + b_fc (split weight
            # so no concat/relayout is needed).  Tiny f32 matmul, done once.
            logits = (jnp.dot(m_f, wfc_ref[0:H, :],
                              preferred_element_type=jnp.float32)
                      + jnp.dot(m_b, wfc_ref[H:2 * H, :],
                                preferred_element_type=jnp.float32)
                      + bfc_ref[...])
            out_ref[...] = logits.astype(out_ref.dtype)

    return kernel


def bilstm_seq(gates_all, w_hh_f, w_hh_b, *, time_block=128):
    """Fused bidirectional LSTM layer emitting per-direction hidden sequences.

    gates_all: (T, B, 8H) f32, cols [0,4H) = fwd gates, [4H,8H) = bwd gates.
    Returns (out_f, out_b): (T, B, H) bf16 each.
    """
    T, B, G2 = gates_all.shape
    H = w_hh_f.shape[0]
    assert G2 == 8 * H
    assert (4 * H) % 128 == 0, "hidden_dim must be a multiple of 32 (4H % 128 == 0)"
    Tb = _pick_time_block(T, time_block)
    nT = T // Tb

    need = (2 * 2 * Tb * B * 4 * H * 4      # two gate streams, double-buffered, f32
            + 2 * 2 * Tb * B * H * 2        # two bf16 output streams, double-buffered
            + 2 * 2 * H * 4 * H * 2         # two bf16 W_hh
            + 4 * B * H * 4)                # h/c carries

    return pl.pallas_call(
        _make_bilstm_kernel(Tb, H, pooled=False),
        out_shape=(jax.ShapeDtypeStruct((T, B, H), jnp.bfloat16),
                   jax.ShapeDtypeStruct((T, B, H), jnp.bfloat16)),
        grid=(nT,),
        in_specs=[
            pl.BlockSpec((Tb, B, 4 * H), lambda g: (g, 0, 0)),           # fwd gates
            pl.BlockSpec((Tb, B, 4 * H), lambda g: (nT - 1 - g, 0, 1)),  # bwd gates (reversed via index_map)
            pl.BlockSpec((H, 4 * H), lambda g: (0, 0)),
            pl.BlockSpec((H, 4 * H), lambda g: (0, 0)),
        ],
        out_specs=(
            pl.BlockSpec((Tb, B, H), lambda g: (g, 0, 0)),
            pl.BlockSpec((Tb, B, H), lambda g: (nT - 1 - g, 0, 0)),
        ),
        scratch_shapes=[pltpu.VMEM((B, H), jnp.float32)] * 4,
        compiler_params=pltpu.CompilerParams(
            dimension_semantics=("arbitrary",),        # time recurrence is sequential
            vmem_limit_bytes=_vmem_limit(need)),
    )(gates_all, gates_all, w_hh_f, w_hh_b)


def bilstm_pool_fc(gates_all, w_hh_f, w_hh_b, w_fc, b_fc, *, time_block=128):
    """Last bidirectional layer with the time max-pool + FC fused in.  Returns (B, C)."""
    T, B, G2 = gates_all.shape
    H = w_hh_f.shape[0]
    C = w_fc.shape[1]
    assert G2 == 8 * H
    assert (4 * H) % 128 == 0, "hidden_dim must be a multiple of 32 (4H % 128 == 0)"
    Tb = _pick_time_block(T, time_block)
    nT = T // Tb

    need = (2 * 2 * Tb * B * 4 * H * 4
            + 2 * 2 * H * 4 * H * 2
            + 2 * (2 * H * C * 4 + C * 4)
            + B * C * 4
            + 6 * B * H * 4)

    return pl.pallas_call(
        _make_bilstm_kernel(Tb, H, pooled=True),
        out_shape=jax.ShapeDtypeStruct((B, C), jnp.float32),
        grid=(nT,),
        in_specs=[
            pl.BlockSpec((Tb, B, 4 * H), lambda g: (g, 0, 0)),
            pl.BlockSpec((Tb, B, 4 * H), lambda g: (nT - 1 - g, 0, 1)),
            pl.BlockSpec((H, 4 * H), lambda g: (0, 0)),
            pl.BlockSpec((H, 4 * H), lambda g: (0, 0)),
            pl.BlockSpec((2 * H, C), lambda g: (0, 0)),
            pl.BlockSpec((1, C), lambda g: (0, 0)),
        ],
        out_specs=pl.BlockSpec((B, C), lambda g: (0, 0)),   # resident, written at last step
        scratch_shapes=[pltpu.VMEM((B, H), jnp.float32)] * 6,
        compiler_params=pltpu.CompilerParams(
            dimension_semantics=("arbitrary",),
            vmem_limit_bytes=_vmem_limit(need)),
    )(gates_all, gates_all, w_hh_f, w_hh_b, w_fc, b_fc.reshape(1, C))


# ------------------------------ model wrapper ------------------------------ #

def init_params(key, vocab_size, embedding_dim, hidden_dim, num_layers,
                num_classes):
    """Deterministic synthetic parameters mirroring the nn.Module shapes.

    Per-layer storage (directions fused along the gate axis):
      w_ih : (Din, 8H) bf16  = [W_ih_f^T | W_ih_b^T]
      b    : (8H,)     f32   = [b_ih_f + b_hh_f | b_ih_b + b_hh_b]
      w_hh_f / w_hh_b : (H, 4H) bf16
    """
    H = hidden_dim
    k = 1.0 / jnp.sqrt(jnp.float32(H))
    keys = iter(jax.random.split(key, 1 + num_layers * 8 + 2))

    emb = jax.random.normal(next(keys), (vocab_size, embedding_dim), jnp.float32)
    emb = emb.at[0].set(0.0)                       # padding_idx=0

    layers = []
    d_in = embedding_dim
    for _ in range(num_layers):
        w_ih_parts, b_parts, whh = [], [], {}
        for tag in ("f", "b"):                     # forward / backward directions
            w_ih = jax.random.uniform(next(keys), (4 * H, d_in), jnp.float32, -k, k)
            w_hh = jax.random.uniform(next(keys), (4 * H, H), jnp.float32, -k, k)
            b_ih = jax.random.uniform(next(keys), (4 * H,), jnp.float32, -k, k)
            b_hh = jax.random.uniform(next(keys), (4 * H,), jnp.float32, -k, k)
            w_ih_parts.append(w_ih.T)              # (d_in, 4H)
            b_parts.append(b_ih + b_hh)
            whh["w_hh_" + tag] = w_hh.T.astype(jnp.bfloat16)   # (H, 4H)
        layers.append({
            "w_ih": jnp.concatenate(w_ih_parts, axis=1).astype(jnp.bfloat16),
            "b": jnp.concatenate(b_parts),
            **whh,
        })
        d_in = 2 * H

    kf = 1.0 / jnp.sqrt(jnp.float32(2 * H))
    fc_w = jax.random.uniform(next(keys), (num_classes, 2 * H), jnp.float32, -kf, kf)
    fc_b = jax.random.uniform(next(keys), (num_classes,), jnp.float32, -kf, kf)

    return {"embedding": emb, "lstm": layers, "fc_w": fc_w.T, "fc_b": fc_b}


def protein_lstm_forward(params, x_tokens):
    """x_tokens: (B, T) int32 -> logits (B, num_classes).  Eval mode (dropout off)."""
    emb = jnp.take(params["embedding"], x_tokens, axis=0)      # (B, T, E)  glue
    x = jnp.transpose(emb, (1, 0, 2))                          # time-major (T, B, E)

    n_layers = len(params["lstm"])
    out_f = out_b = None
    for li, lp in enumerate(params["lstm"]):
        H = lp["w_hh_f"].shape[0]
        # Hoisted input projection (no time dependence): one big bf16 matmul for all
        # timesteps and both directions -> (T, B, 8H) f32 gate pre-activations.
        if li == 0:
            gates = jnp.einsum("tbe,eg->tbg", x.astype(jnp.bfloat16), lp["w_ih"],
                               preferred_element_type=jnp.float32) + lp["b"]
        else:
            # Split the weight instead of materialising concat([out_f, out_b]).
            gates = (jnp.einsum("tbh,hg->tbg", out_f.astype(jnp.bfloat16),
                                lp["w_ih"][:H], preferred_element_type=jnp.float32)
                     + jnp.einsum("tbh,hg->tbg", out_b.astype(jnp.bfloat16),
                                  lp["w_ih"][H:], preferred_element_type=jnp.float32)
                     + lp["b"])
        # TODO(synk): nn.LSTM inter-layer dropout is train-only; eval => identity.
        if li == n_layers - 1:
            # TODO(synk): self.dropout before fc is identity in eval mode.
            return bilstm_pool_fc(gates, lp["w_hh_f"], lp["w_hh_b"],
                                  params["fc_w"], params["fc_b"])
        out_f, out_b = bilstm_seq(gates, lp["w_hh_f"], lp["w_hh_b"])


# ----------------------------- pure-JAX reference --------------------------- #
# Mirrors the same bf16 cast points so the comparison is meaningful and tight.

def _ref_lstm_direction(x_tbd, w_ih_bf16, w_hh_bf16, b, reverse):
    H = w_hh_bf16.shape[0]
    B = x_tbd.shape[1]
    xs = x_tbd[::-1] if reverse else x_tbd

    def step(carry, x_t):
        h, c = carry
        gates = (jnp.dot(x_t.astype(jnp.bfloat16), w_ih_bf16,
                         preferred_element_type=jnp.float32)
                 + jnp.dot(h.astype(jnp.bfloat16), w_hh_bf16,
                           preferred_element_type=jnp.float32)
                 + b)
        i = jax.nn.sigmoid(gates[:, 0:H])
        f = jax.nn.sigmoid(gates[:, H:2 * H])
        g = jnp.tanh(gates[:, 2 * H:3 * H])
        o = jax.nn.sigmoid(gates[:, 3 * H:4 * H])
        c = f * c + i * g
        h = o * jnp.tanh(c)
        return (h, c), h

    init = (jnp.zeros((B, H), jnp.float32), jnp.zeros((B, H), jnp.float32))
    _, ys = lax.scan(step, init, xs)
    return ys[::-1] if reverse else ys


def ref_forward(params, x_tokens):
    emb = jnp.take(params["embedding"], x_tokens, axis=0)
    h = jnp.transpose(emb, (1, 0, 2)).astype(jnp.float32)
    for lp in params["lstm"]:
        H = lp["w_hh_f"].shape[0]
        w_ih, b = lp["w_ih"], lp["b"]
        fwd = _ref_lstm_direction(h, w_ih[:, :4 * H], lp["w_hh_f"], b[:4 * H], False)
        bwd = _ref_lstm_direction(h, w_ih[:, 4 * H:], lp["w_hh_b"], b[4 * H:], True)
        h = jnp.concatenate([fwd, bwd], axis=-1)
    pooled = jnp.max(h, axis=0)
    return pooled @ params["fc_w"] + params["fc_b"]


# ----------------------------------- main ----------------------------------- #

if __name__ == "__main__":
    vocab_size = 21        # 20 amino acids + padding index 0
    embedding_dim = 16
    hidden_dim = 32
    num_layers = 2
    num_classes = 10
    batch, seq_len = 2, 8

    key = jax.random.PRNGKey(0)
    pkey, xkey = jax.random.split(key)
    params = init_params(pkey, vocab_size, embedding_dim, hidden_dim,
                         num_layers, num_classes)
    x_tokens = jax.random.randint(xkey, (batch, seq_len), 0, vocab_size,
                                  dtype=jnp.int32)

    fwd = jax.jit(protein_lstm_forward)
    logits = jax.block_until_ready(fwd(params, x_tokens))
    ref = jax.block_until_ready(ref_forward(params, x_tokens))

    assert logits.shape == (batch, num_classes)
    # bf16 weights/activations on both paths -> loosened (but still tight) tolerance.
    max_err = float(jnp.max(jnp.abs(logits - ref)))
    assert jnp.allclose(logits, ref, atol=5e-3, rtol=5e-3), (
        f"Pallas output does not match reference (max abs err {max_err:.3e})")

    print("KERNEL_OK")
</pallas_src>

<mosaic_0001>
module attributes {stable_mosaic.version = 11 : i64} {
  func.func @kernel(%arg0: i32, %arg1: memref<8x2x128xf32, #tpu.memory_space<vmem>>, %arg2: memref<8x2x128xf32, #tpu.memory_space<vmem>>, %arg3: memref<32x128xbf16, #tpu.memory_space<vmem>>, %arg4: memref<32x128xbf16, #tpu.memory_space<vmem>>, %arg5: memref<64x10xf32, #tpu.memory_space<vmem>>, %arg6: memref<1x10xf32, #tpu.memory_space<vmem>>, %arg7: memref<2x10xf32, #tpu.memory_space<vmem>>, %arg8: memref<2x32xf32, #tpu.memory_space<vmem>>, %arg9: memref<2x32xf32, #tpu.memory_space<vmem>>, %arg10: memref<2x32xf32, #tpu.memory_space<vmem>>, %arg11: memref<2x32xf32, #tpu.memory_space<vmem>>, %arg12: memref<2x32xf32, #tpu.memory_space<vmem>>, %arg13: memref<2x32xf32, #tpu.memory_space<vmem>>) attributes {dimension_semantics = [#tpu.dimension_semantics<arbitrary>], iteration_bounds = array<i64: 1>, scalar_prefetch = 0 : i64, scratch_operands = 6 : i64, tpu.core_type = #tpu.core_type<tc>, window_params = [{transform_indices = @transform_0, window_bounds = array<i64: 8, 2, 128>}, {transform_indices = @transform_1, window_bounds = array<i64: 8, 2, 128>}, {pipeline_mode = #tpu.pipeline_mode<synchronous>, transform_indices = @transform_2, window_bounds = array<i64: 32, 128>}, {pipeline_mode = #tpu.pipeline_mode<synchronous>, transform_indices = @transform_3, window_bounds = array<i64: 32, 128>}, {pipeline_mode = #tpu.pipeline_mode<synchronous>, transform_indices = @transform_4, window_bounds = array<i64: 64, 10>}, {pipeline_mode = #tpu.pipeline_mode<synchronous>, transform_indices = @transform_5, window_bounds = array<i64: 1, 10>}, {pipeline_mode = #tpu.pipeline_mode<synchronous>, transform_indices = @transform_6, window_bounds = array<i64: 2, 10>}]} {
    %c0_i32 = arith.constant 0 : i32
    %0 = arith.cmpi eq, %arg0, %c0_i32 : i32
    %1 = arith.extui %0 : i1 to i32
    %c0_i32_0 = arith.constant 0 : i32
    %2 = arith.cmpi ne, %1, %c0_i32_0 : i32
    scf.if %2 {
      %cst_134 = arith.constant 0.000000e+00 : f32
      %540 = vector.broadcast %cst_134 : f32 to vector<2x32xf32>
      %c0_135 = arith.constant 0 : index
      %c0_136 = arith.constant 0 : index
      %541 = vector.load %arg8[%c0_135, %c0_136] : memref<2x32xf32, #tpu.memory_space<vmem>>, vector<2x32xf32>
      tpu.vector_store %arg8[%c0_135, %c0_136], %540 {strides = array<i32>} : memref<2x32xf32, #tpu.memory_space<vmem>>, vector<2x32xf32>,
      %cst_137 = arith.constant 0.000000e+00 : f32
      %542 = vector.broadcast %cst_137 : f32 to vector<2x32xf32>
      %c0_138 = arith.constant 0 : index
      %c0_139 = arith.constant 0 : index
      %543 = vector.load %arg9[%c0_138, %c0_139] : memref<2x32xf32, #tpu.memory_space<vmem>>, vector<2x32xf32>
      tpu.vector_store %arg9[%c0_138, %c0_139], %542 {strides = array<i32>} : memref<2x32xf32, #tpu.memory_space<vmem>>, vector<2x32xf32>,
      %cst_140 = arith.constant 0.000000e+00 : f32
      %544 = vector.broadcast %cst_140 : f32 to vector<2x32xf32>
      %c0_141 = arith.constant 0 : index
      %c0_142 = arith.constant 0 : index
      %545 = vector.load %arg10[%c0_141, %c0_142] : memref<2x32xf32, #tpu.memory_space<vmem>>, vector<2x32xf32>
      tpu.vector_store %arg10[%c0_141, %c0_142], %544 {strides = array<i32>} : memref<2x32xf32, #tpu.memory_space<vmem>>, vector<2x32xf32>,
      %cst_143 = arith.constant 0.000000e+00 : f32
      %546 = vector.broadcast %cst_143 : f32 to vector<2x32xf32>
      %c0_144 = arith.constant 0 : index
      %c0_145 = arith.constant 0 : index
      %547 = vector.load %arg11[%c0_144, %c0_145] : memref<2x32xf32, #tpu.memory_space<vmem>>, vector<2x32xf32>
      tpu.vector_store %arg11[%c0_144, %c0_145], %546 {strides = array<i32>} : memref<2x32xf32, #tpu.memory_space<vmem>>, vector<2x32xf32>,
      %cst_146 = arith.constant 0xFF800000 : f32
      %548 = vector.broadcast %cst_146 : f32 to vector<2x32xf32>
      %c0_147 = arith.constant 0 : index
      %c0_148 = arith.constant 0 : index
      %549 = vector.load %arg12[%c0_147, %c0_148] : memref<2x32xf32, #tpu.memory_space<vmem>>, vector<2x32xf32>
      tpu.vector_store %arg12[%c0_147, %c0_148], %548 {strides = array<i32>} : memref<2x32xf32, #tpu.memory_space<vmem>>, vector<2x32xf32>,
      %cst_149 = arith.constant 0xFF800000 : f32
      %550 = vector.broadcast %cst_149 : f32 to vector<2x32xf32>
      %c0_150 = arith.constant 0 : index
      %c0_151 = arith.constant 0 : index
      %551 = vector.load %arg13[%c0_150, %c0_151] : memref<2x32xf32, #tpu.memory_space<vmem>>, vector<2x32xf32>
      tpu.vector_store %arg13[%c0_150, %c0_151], %550 {strides = array<i32>} : memref<2x32xf32, #tpu.memory_space<vmem>>, vector<2x32xf32>,
    } else {
    }
    %c0 = arith.constant 0 : index
    %c0_1 = arith.constant 0 : index
    %3 = vector.load %arg3[%c0, %c0_1] : memref<32x128xbf16, #tpu.memory_space<vmem>>, vector<32x128xbf16>
    %c0_2 = arith.constant 0 : index
    %c0_3 = arith.constant 0 : index
    %4 = vector.load %arg4[%c0_2, %c0_3] : memref<32x128xbf16, #tpu.memory_space<vmem>>, vector<32x128xbf16>
    %c0_4 = arith.constant 0 : index
    %c0_5 = arith.constant 0 : index
    %5 = vector.load %arg8[%c0_4, %c0_5] : memref<2x32xf32, #tpu.memory_space<vmem>>, vector<2x32xf32>
    %c0_6 = arith.constant 0 : index
    %c0_7 = arith.constant 0 : index
    %6 = vector.load %arg9[%c0_6, %c0_7] : memref<2x32xf32, #tpu.memory_space<vmem>>, vector<2x32xf32>
    %c0_8 = arith.constant 0 : index
    %c0_9 = arith.constant 0 : index
    %7 = vector.load %arg10[%c0_8, %c0_9] : memref<2x32xf32, #tpu.memory_space<vmem>>, vector<2x32xf32>
    %c0_10 = arith.constant 0 : index
    %c0_11 = arith.constant 0 : index
    %8 = vector.load %arg11[%c0_10, %c0_11] : memref<2x32xf32, #tpu.memory_space<vmem>>, vector<2x32xf32>
    %c0_12 = arith.constant 0 : index
    %c0_13 = arith.constant 0 : index
    %9 = vector.load %arg12[%c0_12, %c0_13] : memref<2x32xf32, #tpu.memory_space<vmem>>, vector<2x32xf32>
    %c0_14 = arith.constant 0 : index
    %c0_15 = arith.constant 0 : index
    %10 = vector.load %arg13[%c0_14, %c0_15] : memref<2x32xf32, #tpu.memory_space<vmem>>, vector<2x32xf32>
    %c0_i32_16 = arith.constant 0 : i32
    %11 = arith.index_cast %c0_i32_16 : i32 to index
    %c0_17 = arith.constant 0 : index
    %c0_18 = arith.constant 0 : index
    %12 = vector.load %arg1[%11, %c0_17, %c0_18] : memref<8x2x128xf32, #tpu.memory_space<vmem>>, vector<1x2x128xf32>
    %13 = vector.shape_cast %12 : vector<1x2x128xf32> to vector<2x128xf32>
    %14 = arith.truncf %5 : vector<2x32xf32> to vector<2x32xbf16>
    %cst = arith.constant dense<0.000000e+00> : vector<2x128xf32>
    %15 = tpu.matmul %14, %3, %cst {dimension_numbers = #tpu.dot_dimension_numbers<[1], [0], [0], [1], [0, 0, 1, 1], [], []>} : vector<2x32xbf16>, vector<32x128xbf16>, vector<2x128xf32> -> vector<2x128xf32>
    %16 = arith.addf %13, %15 : vector<2x128xf32>
    %17 = vector.extract_strided_slice %16 {offsets = [0, 0], sizes = [2, 32], strides = [1, 1]} : vector<2x128xf32> to vector<2x32xf32>
    %18 = arith.negf %17 : vector<2x32xf32>
    %19 = math.exp %18 : vector<2x32xf32>
    %cst_19 = arith.constant 1.000000e+00 : f32
    %20 = vector.broadcast %cst_19 : f32 to vector<2x32xf32>
    %21 = arith.addf %20, %19 : vector<2x32xf32>
    %22 = arith.divf %20, %21 : vector<2x32xf32>
    %23 = vector.extract_strided_slice %16 {offsets = [0, 32], sizes = [2, 32], strides = [1, 1]} : vector<2x128xf32> to vector<2x32xf32>
    %24 = arith.negf %23 : vector<2x32xf32>
    %25 = math.exp %24 : vector<2x32xf32>
    %cst_20 = arith.constant 1.000000e+00 : f32
    %26 = vector.broadcast %cst_20 : f32 to vector<2x32xf32>
    %27 = arith.addf %26, %25 : vector<2x32xf32>
    %28 = arith.divf %26, %27 : vector<2x32xf32>
    %29 = vector.extract_strided_slice %16 {offsets = [0, 64], sizes = [2, 32], strides = [1, 1]} : vector<2x128xf32> to vector<2x32xf32>
    %30 = math.tanh %29 : vector<2x32xf32>
    %31 = vector.extract_strided_slice %16 {offsets = [0, 96], sizes = [2, 32], strides = [1, 1]} : vector<2x128xf32> to vector<2x32xf32>
    %32 = arith.negf %31 : vector<2x32xf32>
    %33 = math.exp %32 : vector<2x32xf32>
    %cst_21 = arith.constant 1.000000e+00 : f32
    %34 = vector.broadcast %cst_21 : f32 to vector<2x32xf32>
    %35 = arith.addf %34, %33 : vector<2x32xf32>
    %36 = arith.divf %34, %35 : vector<2x32xf32>
    %37 = arith.mulf %28, %6 : vector<2x32xf32>
    %38 = arith.mulf %22, %30 : vector<2x32xf32>
    %39 = arith.addf %37, %38 : vector<2x32xf32>
    %40 = math.tanh %39 : vector<2x32xf32>
    %41 = arith.mulf %36, %40 : vector<2x32xf32>
    %c7_i32 = arith.constant 7 : i32
    %42 = arith.subi %c7_i32, %c0_i32_16 : i32
    %43 = arith.index_cast %42 : i32 to index
    %c0_22 = arith.constant 0 : index
    %c0_23 = arith.constant 0 : index
    %44 = vector.load %arg2[%43, %c0_22, %c0_23] : memref<8x2x128xf32, #tpu.memory_space<vmem>>, vector<1x2x128xf32>
    %45 = vector.shape_cast %44 : vector<1x2x128xf32> to vector<2x128xf32>
    %46 = arith.truncf %7 : vector<2x32xf32> to vector<2x32xbf16>
    %cst_24 = arith.constant dense<0.000000e+00> : vector<2x128xf32>
    %47 = tpu.matmul %46, %4, %cst_24 {dimension_numbers = #tpu.dot_dimension_numbers<[1], [0], [0], [1], [0, 0, 1, 1], [], []>} : vector<2x32xbf16>, vector<32x128xbf16>, vector<2x128xf32> -> vector<2x128xf32>
    %48 = arith.addf %45, %47 : vector<2x128xf32>
    %49 = vector.extract_strided_slice %48 {offsets = [0, 0], sizes = [2, 32], strides = [1, 1]} : vector<2x128xf32> to vector<2x32xf32>
    %50 = arith.negf %49 : vector<2x32xf32>
    %51 = math.exp %50 : vector<2x32xf32>
    %cst_25 = arith.constant 1.000000e+00 : f32
    %52 = vector.broadcast %cst_25 : f32 to vector<2x32xf32>
    %53 = arith.addf %52, %51 : vector<2x32xf32>
    %54 = arith.divf %52, %53 : vector<2x32xf32>
    %55 = vector.extract_strided_slice %48 {offsets = [0, 32], sizes = [2, 32], strides = [1, 1]} : vector<2x128xf32> to vector<2x32xf32>
    %56 = arith.negf %55 : vector<2x32xf32>
    %57 = math.exp %56 : vector<2x32xf32>
    %cst_26 = arith.constant 1.000000e+00 : f32
    %58 = vector.broadcast %cst_26 : f32 to vector<2x32xf32>
    %59 = arith.addf %58, %57 : vector<2x32xf32>
    %60 = arith.divf %58, %59 : vector<2x32xf32>
    %61 = vector.extract_strided_slice %48 {offsets = [0, 64], sizes = [2, 32], strides = [1, 1]} : vector<2x128xf32> to vector<2x32xf32>
    %62 = math.tanh %61 : vector<2x32xf32>
    %63 = vector.extract_strided_slice %48 {offsets = [0, 96], sizes = [2, 32], strides = [1, 1]} : vector<2x128xf32> to vector<2x32xf32>
    %64 = arith.negf %63 : vector<2x32xf32>
    %65 = math.exp %64 : vector<2x32xf32>
    %cst_27 = arith.constant 1.000000e+00 : f32
    %66 = vector.broadcast %cst_27 : f32 to vector<2x32xf32>
    %67 = arith.addf %66, %65 : vector<2x32xf32>
    %68 = arith.divf %66, %67 : vector<2x32xf32>
    %69 = arith.mulf %60, %8 : vector<2x32xf32>
    %70 = arith.mulf %54, %62 : vector<2x32xf32>
    %71 = arith.addf %69, %70 : vector<2x32xf32>
    %72 = math.tanh %71 : vector<2x32xf32>
    %73 = arith.mulf %68, %72 : vector<2x32xf32>
    %74 = arith.maximumf %9, %41 : vector<2x32xf32>
    %75 = arith.maximumf %10, %73 : vector<2x32xf32>
    %c1_i32 = arith.constant 1 : i32
    %76 = arith.index_cast %c1_i32 : i32 to index
    %c0_28 = arith.constant 0 : index
    %c0_29 = arith.constant 0 : index
    %77 = vector.load %arg1[%76, %c0_28, %c0_29] : memref<8x2x128xf32, #tpu.memory_space<vmem>>, vector<1x2x128xf32>
    %78 = vector.shape_cast %77 : vector<1x2x128xf32> to vector<2x128xf32>
    %79 = arith.truncf %41 : vector<2x32xf32> to vector<2x32xbf16>
    %cst_30 = arith.constant dense<0.000000e+00> : vector<2x128xf32>
    %80 = tpu.matmul %79, %3, %cst_30 {dimension_numbers = #tpu.dot_dimension_numbers<[1], [0], [0], [1], [0, 0, 1, 1], [], []>} : vector<2x32xbf16>, vector<32x128xbf16>, vector<2x128xf32> -> vector<2x128xf32>
    %81 = arith.addf %78, %80 : vector<2x128xf32>
    %82 = vector.extract_strided_slice %81 {offsets = [0, 0], sizes = [2, 32], strides = [1, 1]} : vector<2x128xf32> to vector<2x32xf32>
    %83 = arith.negf %82 : vector<2x32xf32>
    %84 = math.exp %83 : vector<2x32xf32>
    %cst_31 = arith.constant 1.000000e+00 : f32
    %85 = vector.broadcast %cst_31 : f32 to vector<2x32xf32>
    %86 = arith.addf %85, %84 : vector<2x32xf32>
    %87 = arith.divf %85, %86 : vector<2x32xf32>
    %88 = vector.extract_strided_slice %81 {offsets = [0, 32], sizes = [2, 32], strides = [1, 1]} : vector<2x128xf32> to vector<2x32xf32>
    %89 = arith.negf %88 : vector<2x32xf32>
    %90 = math.exp %89 : vector<2x32xf32>
    %cst_32 = arith.constant 1.000000e+00 : f32
    %91 = vector.broadcast %cst_32 : f32 to vector<2x32xf32>
    %92 = arith.addf %91, %90 : vector<2x32xf32>
    %93 = arith.divf %91, %92 : vector<2x32xf32>
    %94 = vector.extract_strided_slice %81 {offsets = [0, 64], sizes = [2, 32], strides = [1, 1]} : vector<2x128xf32> to vector<2x32xf32>
    %95 = math.tanh %94 : vector<2x32xf32>
    %96 = vector.extract_strided_slice %81 {offsets = [0, 96], sizes = [2, 32], strides = [1, 1]} : vector<2x128xf32> to vector<2x32xf32>
    %97 = arith.negf %96 : vector<2x32xf32>
    %98 = math.exp %97 : vector<2x32xf32>
    %cst_33 = arith.constant 1.000000e+00 : f32
    %99 = vector.broadcast %cst_33 : f32 to vector<2x32xf32>
    %100 = arith.addf %99, %98 : vector<2x32xf32>
    %101 = arith.divf %99, %100 : vector<2x32xf32>
    %102 = arith.mulf %93, %39 : vector<2x32xf32>
    %103 = arith.mulf %87, %95 : vector<2x32xf32>
    %104 = arith.addf %102, %103 : vector<2x32xf32>
    %105 = math.tanh %104 : vector<2x32xf32>
    %106 = arith.mulf %101, %105 : vector<2x32xf32>
    %c7_i32_34 = arith.constant 7 : i32
    %107 = arith.subi %c7_i32_34, %c1_i32 : i32
    %108 = arith.index_cast %107 : i32 to index
    %c0_35 = arith.constant 0 : index
    %c0_36 = arith.constant 0 : index
    %109 = vector.load %arg2[%108, %c0_35, %c0_36] : memref<8x2x128xf32, #tpu.memory_space<vmem>>, vector<1x2x128xf32>
    %110 = vector.shape_cast %109 : vector<1x2x128xf32> to vector<2x128xf32>
    %111 = arith.truncf %73 : vector<2x32xf32> to vector<2x32xbf16>
    %cst_37 = arith.constant dense<0.000000e+00> : vector<2x128xf32>
    %112 = tpu.matmul %111, %4, %cst_37 {dimension_numbers = #tpu.dot_dimension_numbers<[1], [0], [0], [1], [0, 0, 1, 1], [], []>} : vector<2x32xbf16>, vector<32x128xbf16>, vector<2x128xf32> -> vector<2x128xf32>
    %113 = arith.addf %110, %112 : vector<2x128xf32>
    %114 = vector.extract_strided_slice %113 {offsets = [0, 0], sizes = [2, 32], strides = [1, 1]} : vector<2x128xf32> to vector<2x32xf32>
    %115 = arith.negf %114 : vector<2x32xf32>
    %116 = math.exp %115 : vector<2x32xf32>
    %cst_38 = arith.constant 1.000000e+00 : f32
    %117 = vector.broadcast %cst_38 : f32 to vector<2x32xf32>
    %118 = arith.addf %117, %116 : vector<2x32xf32>
    %119 = arith.divf %117, %118 : vector<2x32xf32>
    %120 = vector.extract_strided_slice %113 {offsets = [0, 32], sizes = [2, 32], strides = [1, 1]} : vector<2x128xf32> to vector<2x32xf32>
    %121 = arith.negf %120 : vector<2x32xf32>
    %122 = math.exp %121 : vector<2x32xf32>
    %cst_39 = arith.constant 1.000000e+00 : f32
    %123 = vector.broadcast %cst_39 : f32 to vector<2x32xf32>
    %124 = arith.addf %123, %122 : vector<2x32xf32>
    %125 = arith.divf %123, %124 : vector<2x32xf32>
    %126 = vector.extract_strided_slice %113 {offsets = [0, 64], sizes = [2, 32], strides = [1, 1]} : vector<2x128xf32> to vector<2x32xf32>
    %127 = math.tanh %126 : vector<2x32xf32>
    %128 = vector.extract_strided_slice %113 {offsets = [0, 96], sizes = [2, 32], strides = [1, 1]} : vector<2x128xf32> to vector<2x32xf32>
    %129 = arith.negf %128 : vector<2x32xf32>
    %130 = math.exp %129 : vector<2x32xf32>
    %cst_40 = arith.constant 1.000000e+00 : f32
    %131 = vector.broadcast %cst_40 : f32 to vector<2x32xf32>
    %132 = arith.addf %131, %130 : vector<2x32xf32>
    %133 = arith.divf %131, %132 : vector<2x32xf32>
    %134 = arith.mulf %125, %71 : vector<2x32xf32>
    %135 = arith.mulf %119, %127 : vector<2x32xf32>
    %136 = arith.addf %134, %135 : vector<2x32xf32>
    %137 = math.tanh %136 : vector<2x32xf32>
    %138 = arith.mulf %133, %137 : vector<2x32xf32>
    %139 = arith.maximumf %74, %106 : vector<2x32xf32>
    %140 = arith.maximumf %75, %138 : vector<2x32xf32>
    %c2_i32 = arith.constant 2 : i32
    %141 = arith.index_cast %c2_i32 : i32 to index
    %c0_41 = arith.constant 0 : index
    %c0_42 = arith.constant 0 : index
    %142 = vector.load %arg1[%141, %c0_41, %c0_42] : memref<8x2x128xf32, #tpu.memory_space<vmem>>, vector<1x2x128xf32>
    %143 = vector.shape_cast %142 : vector<1x2x128xf32> to vector<2x128xf32>
    %144 = arith.truncf %106 : vector<2x32xf32> to vector<2x32xbf16>
    %cst_43 = arith.constant dense<0.000000e+00> : vector<2x128xf32>
    %145 = tpu.matmul %144, %3, %cst_43 {dimension_numbers = #tpu.dot_dimension_numbers<[1], [0], [0], [1], [0, 0, 1, 1], [], []>} : vector<2x32xbf16>, vector<32x128xbf16>, vector<2x128xf32> -> vector<2x128xf32>
    %146 = arith.addf %143, %145 : vector<2x128xf32>
    %147 = vector.extract_strided_slice %146 {offsets = [0, 0], sizes = [2, 32], strides = [1, 1]} : vector<2x128xf32> to vector<2x32xf32>
    %148 = arith.negf %147 : vector<2x32xf32>
    %149 = math.exp %148 : vector<2x32xf32>
    %cst_44 = arith.constant 1.000000e+00 : f32
    %150 = vector.broadcast %cst_44 : f32 to vector<2x32xf32>
    %151 = arith.addf %150, %149 : vector<2x32xf32>
    %152 = arith.divf %150, %151 : vector<2x32xf32>
    %153 = vector.extract_strided_slice %146 {offsets = [0, 32], sizes = [2, 32], strides = [1, 1]} : vector<2x128xf32> to vector<2x32xf32>
    %154 = arith.negf %153 : vector<2x32xf32>
    %155 = math.exp %154 : vector<2x32xf32>
    %cst_45 = arith.constant 1.000000e+00 : f32
    %156 = vector.broadcast %cst_45 : f32 to vector<2x32xf32>
    %157 = arith.addf %156, %155 : vector<2x32xf32>
    %158 = arith.divf %156, %157 : vector<2x32xf32>
    %159 = vector.extract_strided_slice %146 {offsets = [0, 64], sizes = [2, 32], strides = [1, 1]} : vector<2x128xf32> to vector<2x32xf32>
    %160 = math.tanh %159 : vector<2x32xf32>
    %161 = vector.extract_strided_slice %146 {offsets = [0, 96], sizes = [2, 32], strides = [1, 1]} : vector<2x128xf32> to vector<2x32xf32>
    %162 = arith.negf %161 : vector<2x32xf32>
    %163 = math.exp %162 : vector<2x32xf32>
    %cst_46 = arith.constant 1.000000e+00 : f32
    %164 = vector.broadcast %cst_46 : f32 to vector<2x32xf32>
    %165 = arith.addf %164, %163 : vector<2x32xf32>
    %166 = arith.divf %164, %165 : vector<2x32xf32>
    %167 = arith.mulf %158, %104 : vector<2x32xf32>
    %168 = arith.mulf %152, %160 : vector<2x32xf32>
    %169 = arith.addf %167, %168 : vector<2x32xf32>
    %170 = math.tanh %169 : vector<2x32xf32>
    %171 = arith.mulf %166, %170 : vector<2x32xf32>
    %c7_i32_47 = arith.constant 7 : i32
    %172 = arith.subi %c7_i32_47, %c2_i32 : i32
    %173 = arith.index_cast %172 : i32 to index
    %c0_48 = arith.constant 0 : index
    %c0_49 = arith.constant 0 : index
    %174 = vector.load %arg2[%173, %c0_48, %c0_49] : memref<8x2x128xf32, #tpu.memory_space<vmem>>, vector<1x2x128xf32>
    %175 = vector.shape_cast %174 : vector<1x2x128xf32> to vector<2x128xf32>
    %176 = arith.truncf %138 : vector<2x32xf32> to vector<2x32xbf16>
    %cst_50 = arith.constant dense<0.000000e+00> : vector<2x128xf32>
    %177 = tpu.matmul %176, %4, %cst_50 {dimension_numbers = #tpu.dot_dimension_numbers<[1], [0], [0], [1], [0, 0, 1, 1], [], []>} : vector<2x32xbf16>, vector<32x128xbf16>, vector<2x128xf32> -> vector<2x128xf32>
    %178 = arith.addf %175, %177 : vector<2x128xf32>
    %179 = vector.extract_strided_slice %178 {offsets = [0, 0], sizes = [2, 32], strides = [1, 1]} : vector<2x128xf32> to vector<2x32xf32>
    %180 = arith.negf %179 : vector<2x32xf32>
    %181 = math.exp %180 : vector<2x32xf32>
    %cst_51 = arith.constant 1.000000e+00 : f32
    %182 = vector.broadcast %cst_51 : f32 to vector<2x32xf32>
    %183 = arith.addf %182, %181 : vector<2x32xf32>
    %184 = arith.divf %182, %183 : vector<2x32xf32>
    %185 = vector.extract_strided_slice %178 {offsets = [0, 32], sizes = [2, 32], strides = [1, 1]} : vector<2x128xf32> to vector<2x32xf32>
    %186 = arith.negf %185 : vector<2x32xf32>
    %187 = math.exp %186 : vector<2x32xf32>
    %cst_52 = arith.constant 1.000000e+00 : f32
    %188 = vector.broadcast %cst_52 : f32 to vector<2x32xf32>
    %189 = arith.addf %188, %187 : vector<2x32xf32>
    %190 = arith.divf %188, %189 : vector<2x32xf32>
    %191 = vector.extract_strided_slice %178 {offsets = [0, 64], sizes = [2, 32], strides = [1, 1]} : vector<2x128xf32> to vector<2x32xf32>
    %192 = math.tanh %191 : vector<2x32xf32>
    %193 = vector.extract_strided_slice %178 {offsets = [0, 96], sizes = [2, 32], strides = [1, 1]} : vector<2x128xf32> to vector<2x32xf32>
    %194 = arith.negf %193 : vector<2x32xf32>
    %195 = math.exp %194 : vector<2x32xf32>
    %cst_53 = arith.constant 1.000000e+00 : f32
    %196 = vector.broadcast %cst_53 : f32 to vector<2x32xf32>
    %197 = arith.addf %196, %195 : vector<2x32xf32>
    %198 = arith.divf %196, %197 : vector<2x32xf32>
    %199 = arith.mulf %190, %136 : vector<2x32xf32>
    %200 = arith.mulf %184, %192 : vector<2x32xf32>
    %201 = arith.addf %199, %200 : vector<2x32xf32>
    %202 = math.tanh %201 : vector<2x32xf32>
    %203 = arith.mulf %198, %202 : vector<2x32xf32>
    %204 = arith.maximumf %139, %171 : vector<2x32xf32>
    %205 = arith.maximumf %140, %203 : vector<2x32xf32>
    %c3_i32 = arith.constant 3 : i32
    %206 = arith.index_cast %c3_i32 : i32 to index
    %c0_54 = arith.constant 0 : index
    %c0_55 = arith.constant 0 : index
    %207 = vector.load %arg1[%206, %c0_54, %c0_55] : memref<8x2x128xf32, #tpu.memory_space<vmem>>, vector<1x2x128xf32>
    %208 = vector.shape_cast %207 : vector<1x2x128xf32> to vector<2x128xf32>
    %209 = arith.truncf %171 : vector<2x32xf32> to vector<2x32xbf16>
    %cst_56 = arith.constant dense<0.000000e+00> : vector<2x128xf32>
    %210 = tpu.matmul %209, %3, %cst_56 {dimension_numbers = #tpu.dot_dimension_numbers<[1], [0], [0], [1], [0, 0, 1, 1], [], []>} : vector<2x32xbf16>, vector<32x128xbf16>, vector<2x128xf32> -> vector<2x128xf32>
    %211 = arith.addf %208, %210 : vector<2x128xf32>
    %212 = vector.extract_strided_slice %211 {offsets = [0, 0], sizes = [2, 32], strides = [1, 1]} : vector<2x128xf32> to vector<2x32xf32>
    %213 = arith.negf %212 : vector<2x32xf32>
    %214 = math.exp %213 : vector<2x32xf32>
    %cst_57 = arith.constant 1.000000e+00 : f32
    %215 = vector.broadcast %cst_57 : f32 to vector<2x32xf32>
    %216 = arith.addf %215, %214 : vector<2x32xf32>
    %217 = arith.divf %215, %216 : vector<2x32xf32>
    %218 = vector.extract_strided_slice %211 {offsets = [0, 32], sizes = [2, 32], strides = [1, 1]} : vector<2x128xf32> to vector<2x32xf32>
    %219 = arith.negf %218 : vector<2x32xf32>
    %220 = math.exp %219 : vector<2x32xf32>
    %cst_58 = arith.constant 1.000000e+00 : f32
    %221 = vector.broadcast %cst_58 : f32 to vector<2x32xf32>
    %222 = arith.addf %221, %220 : vector<2x32xf32>
    %223 = arith.divf %221, %222 : vector<2x32xf32>
    %224 = vector.extract_strided_slice %211 {offsets = [0, 64], sizes = [2, 32], strides = [1, 1]} : vector<2x128xf32> to vector<2x32xf32>
    %225 = math.tanh %224 : vector<2x32xf32>
    %226 = vector.extract_strided_slice %211 {offsets = [0, 96], sizes = [2, 32], strides = [1, 1]} : vector<2x128xf32> to vector<2x32xf32>
    %227 = arith.negf %226 : vector<2x32xf32>
    %228 = math.exp %227 : vector<2x32xf32>
    %cst_59 = arith.constant 1.000000e+00 : f32
    %229 = vector.broadcast %cst_59 : f32 to vector<2x32xf32>
    %230 = arith.addf %229, %228 : vector<2x32xf32>
    %231 = arith.divf %229, %230 : vector<2x32xf32>
    %232 = arith.mulf %223, %169 : vector<2x32xf32>
    %233 = arith.mulf %217, %225 : vector<2x32xf32>
    %234 = arith.addf %232, %233 : vector<2x32xf32>
    %235 = math.tanh %234 : vector<2x32xf32>
    %236 = arith.mulf %231, %235 : vector<2x32xf32>
    %c7_i32_60 = arith.constant 7 : i32
    %237 = arith.subi %c7_i32_60, %c3_i32 : i32
    %238 = arith.index_cast %237 : i32 to index
    %c0_61 = arith.constant 0 : index
    %c0_62 = arith.constant 0 : index
    %239 = vector.load %arg2[%238, %c0_61, %c0_62] : memref<8x2x128xf32, #tpu.memory_space<vmem>>, vector<1x2x128xf32>
    %240 = vector.shape_cast %239 : vector<1x2x128xf32> to vector<2x128xf32>
    %241 = arith.truncf %203 : vector<2x32xf32> to vector<2x32xbf16>
    %cst_63 = arith.constant dense<0.000000e+00> : vector<2x128xf32>
    %242 = tpu.matmul %241, %4, %cst_63 {dimension_numbers = #tpu.dot_dimension_numbers<[1], [0], [0], [1], [0, 0, 1, 1], [], []>} : vector<2x32xbf16>, vector<32x128xbf16>, vector<2x128xf32> -> vector<2x128xf32>
    %243 = arith.addf %240, %242 : vector<2x128xf32>
    %244 = vector.extract_strided_slice %243 {offsets = [0, 0], sizes = [2, 32], strides = [1, 1]} : vector<2x128xf32> to vector<2x32xf32>
    %245 = arith.negf %244 : vector<2x32xf32>
    %246 = math.exp %245 : vector<2x32xf32>
    %cst_64 = arith.constant 1.000000e+00 : f32
    %247 = vector.broadcast %cst_64 : f32 to vector<2x32xf32>
    %248 = arith.addf %247, %246 : vector<2x32xf32>
    %249 = arith.divf %247, %248 : vector<2x32xf32>
    %250 = vector.extract_strided_slice %243 {offsets = [0, 32], sizes = [2, 32], strides = [1, 1]} : vector<2x128xf32> to vector<2x32xf32>
    %251 = arith.negf %250 : vector<2x32xf32>
    %252 = math.exp %251 : vector<2x32xf32>
    %cst_65 = arith.constant 1.000000e+00 : f32
    %253 = vector.broadcast %cst_65 : f32 to vector<2x32xf32>
    %254 = arith.addf %253, %252 : vector<2x32xf32>
    %255 = arith.divf %253, %254 : vector<2x32xf32>
    %256 = vector.extract_strided_slice %243 {offsets = [0, 64], sizes = [2, 32], strides = [1, 1]} : vector<2x128xf32> to vector<2x32xf32>
    %257 = math.tanh %256 : vector<2x32xf32>
    %258 = vector.extract_strided_slice %243 {offsets = [0, 96], sizes = [2, 32], strides = [1, 1]} : vector<2x128xf32> to vector<2x32xf32>
    %259 = arith.negf %258 : vector<2x32xf32>
    %260 = math.exp %259 : vector<2x32xf32>
    %cst_66 = arith.constant 1.000000e+00 : f32
    %261 = vector.broadcast %cst_66 : f32 to vector<2x32xf32>
    %262 = arith.addf %261, %260 : vector<2x32xf32>
    %263 = arith.divf %261, %262 : vector<2x32xf32>
    %264 = arith.mulf %255, %201 : vector<2x32xf32>
    %265 = arith.mulf %249, %257 : vector<2x32xf32>
    %266 = arith.addf %264, %265 : vector<2x32xf32>
    %267 = math.tanh %266 : vector<2x32xf32>
    %268 = arith.mulf %263, %267 : vector<2x32xf32>
    %269 = arith.maximumf %204, %236 : vector<2x32xf32>
    %270 = arith.maximumf %205, %268 : vector<2x32xf32>
    %c4_i32 = arith.constant 4 : i32
    %271 = arith.index_cast %c4_i32 : i32 to index
    %c0_67 = arith.constant 0 : index
    %c0_68 = arith.constant 0 : index
    %272 = vector.load %arg1[%271, %c0_67, %c0_68] : memref<8x2x128xf32, #tpu.memory_space<vmem>>, vector<1x2x128xf32>
    %273 = vector.shape_cast %272 : vector<1x2x128xf32> to vector<2x128xf32>
    %274 = arith.truncf %236 : vector<2x32xf32> to vector<2x32xbf16>
    %cst_69 = arith.constant dense<0.000000e+00> : vector<2x128xf32>
    %275 = tpu.matmul %274, %3, %cst_69 {dimension_numbers = #tpu.dot_dimension_numbers<[1], [0], [0], [1], [0, 0, 1, 1], [], []>} : vector<2x32xbf16>, vector<32x128xbf16>, vector<2x128xf32> -> vector<2x128xf32>
    %276 = arith.addf %273, %275 : vector<2x128xf32>
    %277 = vector.extract_strided_slice %276 {offsets = [0, 0], sizes = [2, 32], strides = [1, 1]} : vector<2x128xf32> to vector<2x32xf32>
    %278 = arith.negf %277 : vector<2x32xf32>
    %279 = math.exp %278 : vector<2x32xf32>
    %cst_70 = arith.constant 1.000000e+00 : f32
    %280 = vector.broadcast %cst_70 : f32 to vector<2x32xf32>
    %281 = arith.addf %280, %279 : vector<2x32xf32>
    %282 = arith.divf %280, %281 : vector<2x32xf32>
    %283 = vector.extract_strided_slice %276 {offsets = [0, 32], sizes = [2, 32], strides = [1, 1]} : vector<2x128xf32> to vector<2x32xf32>
    %284 = arith.negf %283 : vector<2x32xf32>
    %285 = math.exp %284 : vector<2x32xf32>
    %cst_71 = arith.constant 1.000000e+00 : f32
    %286 = vector.broadcast %cst_71 : f32 to vector<2x32xf32>
    %287 = arith.addf %286, %285 : vector<2x32xf32>
    %288 = arith.divf %286, %287 : vector<2x32xf32>
    %289 = vector.extract_strided_slice %276 {offsets = [0, 64], sizes = [2, 32], strides = [1, 1]} : vector<2x128xf32> to vector<2x32xf32>
    %290 = math.tanh %289 : vector<2x32xf32>
    %291 = vector.extract_strided_slice %276 {offsets = [0, 96], sizes = [2, 32], strides = [1, 1]} : vector<2x128xf32> to vector<2x32xf32>
    %292 = arith.negf %291 : vector<2x32xf32>
    %293 = math.exp %292 : vector<2x32xf32>
    %cst_72 = arith.constant 1.000000e+00 : f32
    %294 = vector.broadcast %cst_72 : f32 to vector<2x32xf32>
    %295 = arith.addf %294, %293 : vector<2x32xf32>
    %296 = arith.divf %294, %295 : vector<2x32xf32>
    %297 = arith.mulf %288, %234 : vector<2x32xf32>
    %298 = arith.mulf %282, %290 : vector<2x32xf32>
    %299 = arith.addf %297, %298 : vector<2x32xf32>
    %300 = math.tanh %299 : vector<2x32xf32>
    %301 = arith.mulf %296, %300 : vector<2x32xf32>
    %c7_i32_73 = arith.constant 7 : i32
    %302 = arith.subi %c7_i32_73, %c4_i32 : i32
    %303 = arith.index_cast %302 : i32 to index
    %c0_74 = arith.constant 0 : index
    %c0_75 = arith.constant 0 : index
    %304 = vector.load %arg2[%303, %c0_74, %c0_75] : memref<8x2x128xf32, #tpu.memory_space<vmem>>, vector<1x2x128xf32>
    %305 = vector.shape_cast %304 : vector<1x2x128xf32> to vector<2x128xf32>
    %306 = arith.truncf %268 : vector<2x32xf32> to vector<2x32xbf16>
    %cst_76 = arith.constant dense<0.000000e+00> : vector<2x128xf32>
    %307 = tpu.matmul %306, %4, %cst_76 {dimension_numbers = #tpu.dot_dimension_numbers<[1], [0], [0], [1], [0, 0, 1, 1], [], []>} : vector<2x32xbf16>, vector<32x128xbf16>, vector<2x128xf32> -> vector<2x128xf32>
    %308 = arith.addf %305, %307 : vector<2x128xf32>
    %309 = vector.extract_strided_slice %308 {offsets = [0, 0], sizes = [2, 32], strides = [1, 1]} : vector<2x128xf32> to vector<2x32xf32>
    %310 = arith.negf %309 : vector<2x32xf32>
    %311 = math.exp %310 : vector<2x32xf32>
    %cst_77 = arith.constant 1.000000e+00 : f32
    %312 = vector.broadcast %cst_77 : f32 to vector<2x32xf32>
    %313 = arith.addf %312, %311 : vector<2x32xf32>
    %314 = arith.divf %312, %313 : vector<2x32xf32>
    %315 = vector.extract_strided_slice %308 {offsets = [0, 32], sizes = [2, 32], strides = [1, 1]} : vector<2x128xf32> to vector<2x32xf32>
    %316 = arith.negf %315 : vector<2x32xf32>
    %317 = math.exp %316 : vector<2x32xf32>
    %cst_78 = arith.constant 1.000000e+00 : f32
    %318 = vector.broadcast %cst_78 : f32 to vector<2x32xf32>
    %319 = arith.addf %318, %317 : vector<2x32xf32>
    %320 = arith.divf %318, %319 : vector<2x32xf32>
    %321 = vector.extract_strided_slice %308 {offsets = [0, 64], sizes = [2, 32], strides = [1, 1]} : vector<2x128xf32> to vector<2x32xf32>
    %322 = math.tanh %321 : vector<2x32xf32>
    %323 = vector.extract_strided_slice %308 {offsets = [0, 96], sizes = [2, 32], strides = [1, 1]} : vector<2x128xf32> to vector<2x32xf32>
    %324 = arith.negf %323 : vector<2x32xf32>
    %325 = math.exp %324 : vector<2x32xf32>
    %cst_79 = arith.constant 1.000000e+00 : f32
    %326 = vector.broadcast %cst_79 : f32 to vector<2x32xf32>
    %327 = arith.addf %326, %325 : vector<2x32xf32>
    %328 = arith.divf %326, %327 : vector<2x32xf32>
    %329 = arith.mulf %320, %266 : vector<2x32xf32>
    %330 = arith.mulf %314, %322 : vector<2x32xf32>
    %331 = arith.addf %329, %330 : vector<2x32xf32>
    %332 = math.tanh %331 : vector<2x32xf32>
    %333 = arith.mulf %328, %332 : vector<2x32xf32>
    %334 = arith.maximumf %269, %301 : vector<2x32xf32>
    %335 = arith.maximumf %270, %333 : vector<2x32xf32>
    %c5_i32 = arith.constant 5 : i32
    %336 = arith.index_cast %c5_i32 : i32 to index
    %c0_80 = arith.constant 0 : index
    %c0_81 = arith.constant 0 : index
    %337 = vector.load %arg1[%336, %c0_80, %c0_81] : memref<8x2x128xf32, #tpu.memory_space<vmem>>, vector<1x2x128xf32>
    %338 = vector.shape_cast %337 : vector<1x2x128xf32> to vector<2x128xf32>
    %339 = arith.truncf %301 : vector<2x32xf32> to vector<2x32xbf16>
    %cst_82 = arith.constant dense<0.000000e+00> : vector<2x128xf32>
    %340 = tpu.matmul %339, %3, %cst_82 {dimension_numbers = #tpu.dot_dimension_numbers<[1], [0], [0], [1], [0, 0, 1, 1], [], []>} : vector<2x32xbf16>, vector<32x128xbf16>, vector<2x128xf32> -> vector<2x128xf32>
    %341 = arith.addf %338, %340 : vector<2x128xf32>
    %342 = vector.extract_strided_slice %341 {offsets = [0, 0], sizes = [2, 32], strides = [1, 1]} : vector<2x128xf32> to vector<2x32xf32>
    %343 = arith.negf %342 : vector<2x32xf32>
    %344 = math.exp %343 : vector<2x32xf32>
    %cst_83 = arith.constant 1.000000e+00 : f32
    %345 = vector.broadcast %cst_83 : f32 to vector<2x32xf32>
    %346 = arith.addf %345, %344 : vector<2x32xf32>
    %347 = arith.divf %345, %346 : vector<2x32xf32>
    %348 = vector.extract_strided_slice %341 {offsets = [0, 32], sizes = [2, 32], strides = [1, 1]} : vector<2x128xf32> to vector<2x32xf32>
    %349 = arith.negf %348 : vector<2x32xf32>
    %350 = math.exp %349 : vector<2x32xf32>
    %cst_84 = arith.constant 1.000000e+00 : f32
    %351 = vector.broadcast %cst_84 : f32 to vector<2x32xf32>
    %352 = arith.addf %351, %350 : vector<2x32xf32>
    %353 = arith.divf %351, %352 : vector<2x32xf32>
    %354 = vector.extract_strided_slice %341 {offsets = [0, 64], sizes = [2, 32], strides = [1, 1]} : vector<2x128xf32> to vector<2x32xf32>
    %355 = math.tanh %354 : vector<2x32xf32>
    %356 = vector.extract_strided_slice %341 {offsets = [0, 96], sizes = [2, 32], strides = [1, 1]} : vector<2x128xf32> to vector<2x32xf32>
    %357 = arith.negf %356 : vector<2x32xf32>
    %358 = math.exp %357 : vector<2x32xf32>
    %cst_85 = arith.constant 1.000000e+00 : f32
    %359 = vector.broadcast %cst_85 : f32 to vector<2x32xf32>
    %360 = arith.addf %359, %358 : vector<2x32xf32>
    %361 = arith.divf %359, %360 : vector<2x32xf32>
    %362 = arith.mulf %353, %299 : vector<2x32xf32>
    %363 = arith.mulf %347, %355 : vector<2x32xf32>
    %364 = arith.addf %362, %363 : vector<2x32xf32>
    %365 = math.tanh %364 : vector<2x32xf32>
    %366 = arith.mulf %361, %365 : vector<2x32xf32>
    %c7_i32_86 = arith.constant 7 : i32
    %367 = arith.subi %c7_i32_86, %c5_i32 : i32
    %368 = arith.index_cast %367 : i32 to index
    %c0_87 = arith.constant 0 : index
    %c0_88 = arith.constant 0 : index
    %369 = vector.load %arg2[%368, %c0_87, %c0_88] : memref<8x2x128xf32, #tpu.memory_space<vmem>>, vector<1x2x128xf32>
    %370 = vector.shape_cast %369 : vector<1x2x128xf32> to vector<2x128xf32>
    %371 = arith.truncf %333 : vector<2x32xf32> to vector<2x32xbf16>
    %cst_89 = arith.constant dense<0.000000e+00> : vector<2x128xf32>
    %372 = tpu.matmul %371, %4, %cst_89 {dimension_numbers = #tpu.dot_dimension_numbers<[1], [0], [0], [1], [0, 0, 1, 1], [], []>} : vector<2x32xbf16>, vector<32x128xbf16>, vector<2x128xf32> -> vector<2x128xf32>
    %373 = arith.addf %370, %372 : vector<2x128xf32>
    %374 = vector.extract_strided_slice %373 {offsets = [0, 0], sizes = [2, 32], strides = [1, 1]} : vector<2x128xf32> to vector<2x32xf32>
    %375 = arith.negf %374 : vector<2x32xf32>
    %376 = math.exp %375 : vector<2x32xf32>
    %cst_90 = arith.constant 1.000000e+00 : f32
    %377 = vector.broadcast %cst_90 : f32 to vector<2x32xf32>
    %378 = arith.addf %377, %376 : vector<2x32xf32>
    %379 = arith.divf %377, %378 : vector<2x32xf32>
    %380 = vector.extract_strided_slice %373 {offsets = [0, 32], sizes = [2, 32], strides = [1, 1]} : vector<2x128xf32> to vector<2x32xf32>
    %381 = arith.negf %380 : vector<2x32xf32>
    %382 = math.exp %381 : vector<2x32xf32>
    %cst_91 = arith.constant 1.000000e+00 : f32
    %383 = vector.broadcast %cst_91 : f32 to vector<2x32xf32>
    %384 = arith.addf %383, %382 : vector<2x32xf32>
    %385 = arith.divf %383, %384 : vector<2x32xf32>
    %386 = vector.extract_strided_slice %373 {offsets = [0, 64], sizes = [2, 32], strides = [1, 1]} : vector<2x128xf32> to vector<2x32xf32>
    %387 = math.tanh %386 : vector<2x32xf32>
    %388 = vector.extract_strided_slice %373 {offsets = [0, 96], sizes = [2, 32], strides = [1, 1]} : vector<2x128xf32> to vector<2x32xf32>
    %389 = arith.negf %388 : vector<2x32xf32>
    %390 = math.exp %389 : vector<2x32xf32>
    %cst_92 = arith.constant 1.000000e+00 : f32
    %391 = vector.broadcast %cst_92 : f32 to vector<2x32xf32>
    %392 = arith.addf %391, %390 : vector<2x32xf32>
    %393 = arith.divf %391, %392 : vector<2x32xf32>
    %394 = arith.mulf %385, %331 : vector<2x32xf32>
    %395 = arith.mulf %379, %387 : vector<2x32xf32>
    %396 = arith.addf %394, %395 : vector<2x32xf32>
    %397 = math.tanh %396 : vector<2x32xf32>
    %398 = arith.mulf %393, %397 : vector<2x32xf32>
    %399 = arith.maximumf %334, %366 : vector<2x32xf32>
    %400 = arith.maximumf %335, %398 : vector<2x32xf32>
    %c6_i32 = arith.constant 6 : i32
    %401 = arith.index_cast %c6_i32 : i32 to index
    %c0_93 = arith.constant 0 : index
    %c0_94 = arith.constant 0 : index
    %402 = vector.load %arg1[%401, %c0_93, %c0_94] : memref<8x2x128xf32, #tpu.memory_space<vmem>>, vector<1x2x128xf32>
    %403 = vector.shape_cast %402 : vector<1x2x128xf32> to vector<2x128xf32>
    %404 = arith.truncf %366 : vector<2x32xf32> to vector<2x32xbf16>
    %cst_95 = arith.constant dense<0.000000e+00> : vector<2x128xf32>
    %405 = tpu.matmul %404, %3, %cst_95 {dimension_numbers = #tpu.dot_dimension_numbers<[1], [0], [0], [1], [0, 0, 1, 1], [], []>} : vector<2x32xbf16>, vector<32x128xbf16>, vector<2x128xf32> -> vector<2x128xf32>
    %406 = arith.addf %403, %405 : vector<2x128xf32>
    %407 = vector.extract_strided_slice %406 {offsets = [0, 0], sizes = [2, 32], strides = [1, 1]} : vector<2x128xf32> to vector<2x32xf32>
    %408 = arith.negf %407 : vector<2x32xf32>
    %409 = math.exp %408 : vector<2x32xf32>
    %cst_96 = arith.constant 1.000000e+00 : f32
    %410 = vector.broadcast %cst_96 : f32 to vector<2x32xf32>
    %411 = arith.addf %410, %409 : vector<2x32xf32>
    %412 = arith.divf %410, %411 : vector<2x32xf32>
    %413 = vector.extract_strided_slice %406 {offsets = [0, 32], sizes = [2, 32], strides = [1, 1]} : vector<2x128xf32> to vector<2x32xf32>
    %414 = arith.negf %413 : vector<2x32xf32>
    %415 = math.exp %414 : vector<2x32xf32>
    %cst_97 = arith.constant 1.000000e+00 : f32
    %416 = vector.broadcast %cst_97 : f32 to vector<2x32xf32>
    %417 = arith.addf %416, %415 : vector<2x32xf32>
    %418 = arith.divf %416, %417 : vector<2x32xf32>
    %419 = vector.extract_strided_slice %406 {offsets = [0, 64], sizes = [2, 32], strides = [1, 1]} : vector<2x128xf32> to vector<2x32xf32>
    %420 = math.tanh %419 : vector<2x32xf32>
    %421 = vector.extract_strided_slice %406 {offsets = [0, 96], sizes = [2, 32], strides = [1, 1]} : vector<2x128xf32> to vector<2x32xf32>
    %422 = arith.negf %421 : vector<2x32xf32>
    %423 = math.exp %422 : vector<2x32xf32>
    %cst_98 = arith.constant 1.000000e+00 : f32
    %424 = vector.broadcast %cst_98 : f32 to vector<2x32xf32>
    %425 = arith.addf %424, %423 : vector<2x32xf32>
    %426 = arith.divf %424, %425 : vector<2x32xf32>
    %427 = arith.mulf %418, %364 : vector<2x32xf32>
    %428 = arith.mulf %412, %420 : vector<2x32xf32>
    %429 = arith.addf %427, %428 : vector<2x32xf32>
    %430 = math.tanh %429 : vector<2x32xf32>
    %431 = arith.mulf %426, %430 : vector<2x32xf32>
    %c7_i32_99 = arith.constant 7 : i32
    %432 = arith.subi %c7_i32_99, %c6_i32 : i32
    %433 = arith.index_cast %432 : i32 to index
    %c0_100 = arith.constant 0 : index
    %c0_101 = arith.constant 0 : index
    %434 = vector.load %arg2[%433, %c0_100, %c0_101] : memref<8x2x128xf32, #tpu.memory_space<vmem>>, vector<1x2x128xf32>
    %435 = vector.shape_cast %434 : vector<1x2x128xf32> to vector<2x128xf32>
    %436 = arith.truncf %398 : vector<2x32xf32> to vector<2x32xbf16>
    %cst_102 = arith.constant dense<0.000000e+00> : vector<2x128xf32>
    %437 = tpu.matmul %436, %4, %cst_102 {dimension_numbers = #tpu.dot_dimension_numbers<[1], [0], [0], [1], [0, 0, 1, 1], [], []>} : vector<2x32xbf16>, vector<32x128xbf16>, vector<2x128xf32> -> vector<2x128xf32>
    %438 = arith.addf %435, %437 : vector<2x128xf32>
    %439 = vector.extract_strided_slice %438 {offsets = [0, 0], sizes = [2, 32], strides = [1, 1]} : vector<2x128xf32> to vector<2x32xf32>
    %440 = arith.negf %439 : vector<2x32xf32>
    %441 = math.exp %440 : vector<2x32xf32>
    %cst_103 = arith.constant 1.000000e+00 : f32
    %442 = vector.broadcast %cst_103 : f32 to vector<2x32xf32>
    %443 = arith.addf %442, %441 : vector<2x32xf32>
    %444 = arith.divf %442, %443 : vector<2x32xf32>
    %445 = vector.extract_strided_slice %438 {offsets = [0, 32], sizes = [2, 32], strides = [1, 1]} : vector<2x128xf32> to vector<2x32xf32>
    %446 = arith.negf %445 : vector<2x32xf32>
    %447 = math.exp %446 : vector<2x32xf32>
    %cst_104 = arith.constant 1.000000e+00 : f32
    %448 = vector.broadcast %cst_104 : f32 to vector<2x32xf32>
    %449 = arith.addf %448, %447 : vector<2x32xf32>
    %450 = arith.divf %448, %449 : vector<2x32xf32>
    %451 = vector.extract_strided_slice %438 {offsets = [0, 64], sizes = [2, 32], strides = [1, 1]} : vector<2x128xf32> to vector<2x32xf32>
    %452 = math.tanh %451 : vector<2x32xf32>
    %453 = vector.extract_strided_slice %438 {offsets = [0, 96], sizes = [2, 32], strides = [1, 1]} : vector<2x128xf32> to vector<2x32xf32>
    %454 = arith.negf %453 : vector<2x32xf32>
    %455 = math.exp %454 : vector<2x32xf32>
    %cst_105 = arith.constant 1.000000e+00 : f32
    %456 = vector.broadcast %cst_105 : f32 to vector<2x32xf32>
    %457 = arith.addf %456, %455 : vector<2x32xf32>
    %458 = arith.divf %456, %457 : vector<2x32xf32>
    %459 = arith.mulf %450, %396 : vector<2x32xf32>
    %460 = arith.mulf %444, %452 : vector<2x32xf32>
    %461 = arith.addf %459, %460 : vector<2x32xf32>
    %462 = math.tanh %461 : vector<2x32xf32>
    %463 = arith.mulf %458, %462 : vector<2x32xf32>
    %464 = arith.maximumf %399, %431 : vector<2x32xf32>
    %465 = arith.maximumf %400, %463 : vector<2x32xf32>
    %c7_i32_106 = arith.constant 7 : i32
    %466 = arith.index_cast %c7_i32_106 : i32 to index
    %c0_107 = arith.constant 0 : index
    %c0_108 = arith.constant 0 : index
    %467 = vector.load %arg1[%466, %c0_107, %c0_108] : memref<8x2x128xf32, #tpu.memory_space<vmem>>, vector<1x2x128xf32>
    %468 = vector.shape_cast %467 : vector<1x2x128xf32> to vector<2x128xf32>
    %469 = arith.truncf %431 : vector<2x32xf32> to vector<2x32xbf16>
    %cst_109 = arith.constant dense<0.000000e+00> : vector<2x128xf32>
    %470 = tpu.matmul %469, %3, %cst_109 {dimension_numbers = #tpu.dot_dimension_numbers<[1], [0], [0], [1], [0, 0, 1, 1], [], []>} : vector<2x32xbf16>, vector<32x128xbf16>, vector<2x128xf32> -> vector<2x128xf32>
    %471 = arith.addf %468, %470 : vector<2x128xf32>
    %472 = vector.extract_strided_slice %471 {offsets = [0, 0], sizes = [2, 32], strides = [1, 1]} : vector<2x128xf32> to vector<2x32xf32>
    %473 = arith.negf %472 : vector<2x32xf32>
    %474 = math.exp %473 : vector<2x32xf32>
    %cst_110 = arith.constant 1.000000e+00 : f32
    %475 = vector.broadcast %cst_110 : f32 to vector<2x32xf32>
    %476 = arith.addf %475, %474 : vector<2x32xf32>
    %477 = arith.divf %475, %476 : vector<2x32xf32>
    %478 = vector.extract_strided_slice %471 {offsets = [0, 32], sizes = [2, 32], strides = [1, 1]} : vector<2x128xf32> to vector<2x32xf32>
    %479 = arith.negf %478 : vector<2x32xf32>
    %480 = math.exp %479 : vector<2x32xf32>
    %cst_111 = arith.constant 1.000000e+00 : f32
    %481 = vector.broadcast %cst_111 : f32 to vector<2x32xf32>
    %482 = arith.addf %481, %480 : vector<2x32xf32>
    %483 = arith.divf %481, %482 : vector<2x32xf32>
    %484 = vector.extract_strided_slice %471 {offsets = [0, 64], sizes = [2, 32], strides = [1, 1]} : vector<2x128xf32> to vector<2x32xf32>
    %485 = math.tanh %484 : vector<2x32xf32>
    %486 = vector.extract_strided_slice %471 {offsets = [0, 96], sizes = [2, 32], strides = [1, 1]} : vector<2x128xf32> to vector<2x32xf32>
    %487 = arith.negf %486 : vector<2x32xf32>
    %488 = math.exp %487 : vector<2x32xf32>
    %cst_112 = arith.constant 1.000000e+00 : f32
    %489 = vector.broadcast %cst_112 : f32 to vector<2x32xf32>
    %490 = arith.addf %489, %488 : vector<2x32xf32>
    %491 = arith.divf %489, %490 : vector<2x32xf32>
    %492 = arith.mulf %483, %429 : vector<2x32xf32>
    %493 = arith.mulf %477, %485 : vector<2x32xf32>
    %494 = arith.addf %492, %493 : vector<2x32xf32>
    %495 = math.tanh %494 : vector<2x32xf32>
    %496 = arith.mulf %491, %495 : vector<2x32xf32>
    %c7_i32_113 = arith.constant 7 : i32
    %497 = arith.subi %c7_i32_113, %c7_i32_106 : i32
    %498 = arith.index_cast %497 : i32 to index
    %c0_114 = arith.constant 0 : index
    %c0_115 = arith.constant 0 : index
    %499 = vector.load %arg2[%498, %c0_114, %c0_115] : memref<8x2x128xf32, #tpu.memory_space<vmem>>, vector<1x2x128xf32>
    %500 = vector.shape_cast %499 : vector<1x2x128xf32> to vector<2x128xf32>
    %501 = arith.truncf %463 : vector<2x32xf32> to vector<2x32xbf16>
    %cst_116 = arith.constant dense<0.000000e+00> : vector<2x128xf32>
    %502 = tpu.matmul %501, %4, %cst_116 {dimension_numbers = #tpu.dot_dimension_numbers<[1], [0], [0], [1], [0, 0, 1, 1], [], []>} : vector<2x32xbf16>, vector<32x128xbf16>, vector<2x128xf32> -> vector<2x128xf32>
    %503 = arith.addf %500, %502 : vector<2x128xf32>
    %504 = vector.extract_strided_slice %503 {offsets = [0, 0], sizes = [2, 32], strides = [1, 1]} : vector<2x128xf32> to vector<2x32xf32>
    %505 = arith.negf %504 : vector<2x32xf32>
    %506 = math.exp %505 : vector<2x32xf32>
    %cst_117 = arith.constant 1.000000e+00 : f32
    %507 = vector.broadcast %cst_117 : f32 to vector<2x32xf32>
    %508 = arith.addf %507, %506 : vector<2x32xf32>
    %509 = arith.divf %507, %508 : vector<2x32xf32>
    %510 = vector.extract_strided_slice %503 {offsets = [0, 32], sizes = [2, 32], strides = [1, 1]} : vector<2x128xf32> to vector<2x32xf32>
    %511 = arith.negf %510 : vector<2x32xf32>
    %512 = math.exp %511 : vector<2x32xf32>
    %cst_118 = arith.constant 1.000000e+00 : f32
    %513 = vector.broadcast %cst_118 : f32 to vector<2x32xf32>
    %514 = arith.addf %513, %512 : vector<2x32xf32>
    %515 = arith.divf %513, %514 : vector<2x32xf32>
    %516 = vector.extract_strided_slice %503 {offsets = [0, 64], sizes = [2, 32], strides = [1, 1]} : vector<2x128xf32> to vector<2x32xf32>
    %517 = math.tanh %516 : vector<2x32xf32>
    %518 = vector.extract_strided_slice %503 {offsets = [0, 96], sizes = [2, 32], strides = [1, 1]} : vector<2x128xf32> to vector<2x32xf32>
    %519 = arith.negf %518 : vector<2x32xf32>
    %520 = math.exp %519 : vector<2x32xf32>
    %cst_119 = arith.constant 1.000000e+00 : f32
    %521 = vector.broadcast %cst_119 : f32 to vector<2x32xf32>
    %522 = arith.addf %521, %520 : vector<2x32xf32>
    %523 = arith.divf %521, %522 : vector<2x32xf32>
    %524 = arith.mulf %515, %461 : vector<2x32xf32>
    %525 = arith.mulf %509, %517 : vector<2x32xf32>
    %526 = arith.addf %524, %525 : vector<2x32xf32>
    %527 = math.tanh %526 : vector<2x32xf32>
    %528 = arith.mulf %523, %527 : vector<2x32xf32>
    %529 = arith.maximumf %464, %496 : vector<2x32xf32>
    %530 = arith.maximumf %465, %528 : vector<2x32xf32>
    %c8_i32 = arith.constant 8 : i32
    %c0_120 = arith.constant 0 : index
    %c0_121 = arith.constant 0 : index
    %531 = vector.load %arg8[%c0_120, %c0_121] : memref<2x32xf32, #tpu.memory_space<vmem>>, vector<2x32xf32>
    tpu.vector_store %arg8[%c0_120, %c0_121], %496 {strides = array<i32>} : memref<2x32xf32, #tpu.memory_space<vmem>>, vector<2x32xf32>,
    %c0_122 = arith.constant 0 : index
    %c0_123 = arith.constant 0 : index
    %532 = vector.load %arg9[%c0_122, %c0_123] : memref<2x32xf32, #tpu.memory_space<vmem>>, vector<2x32xf32>
    tpu.vector_store %arg9[%c0_122, %c0_123], %494 {strides = array<i32>} : memref<2x32xf32, #tpu.memory_space<vmem>>, vector<2x32xf32>,
    %c0_124 = arith.constant 0 : index
    %c0_125 = arith.constant 0 : index
    %533 = vector.load %arg10[%c0_124, %c0_125] : memref<2x32xf32, #tpu.memory_space<vmem>>, vector<2x32xf32>
    tpu.vector_store %arg10[%c0_124, %c0_125], %528 {strides = array<i32>} : memref<2x32xf32, #tpu.memory_space<vmem>>, vector<2x32xf32>,
    %c0_126 = arith.constant 0 : index
    %c0_127 = arith.constant 0 : index
    %534 = vector.load %arg11[%c0_126, %c0_127] : memref<2x32xf32, #tpu.memory_space<vmem>>, vector<2x32xf32>
    tpu.vector_store %arg11[%c0_126, %c0_127], %526 {strides = array<i32>} : memref<2x32xf32, #tpu.memory_space<vmem>>, vector<2x32xf32>,
    %c0_128 = arith.constant 0 : index
    %c0_129 = arith.constant 0 : index
    %535 = vector.load %arg12[%c0_128, %c0_129] : memref<2x32xf32, #tpu.memory_space<vmem>>, vector<2x32xf32>
    tpu.vector_store %arg12[%c0_128, %c0_129], %529 {strides = array<i32>} : memref<2x32xf32, #tpu.memory_space<vmem>>, vector<2x32xf32>,
    %c0_130 = arith.constant 0 : index
    %c0_131 = arith.constant 0 : index
    %536 = vector.load %arg13[%c0_130, %c0_131] : memref<2x32xf32, #tpu.memory_space<vmem>>, vector<2x32xf32>
    tpu.vector_store %arg13[%c0_130, %c0_131], %530 {strides = array<i32>} : memref<2x32xf32, #tpu.memory_space<vmem>>, vector<2x32xf32>,
    %c0_i32_132 = arith.constant 0 : i32
    %537 = arith.cmpi eq, %arg0, %c0_i32_132 : i32
    %538 = arith.extui %537 : i1 to i32
    %c0_i32_133 = arith.constant 0 : i32
    %539 = arith.cmpi ne, %538, %c0_i32_133 : i32
    scf.if %539 {
      %c0_134 = arith.constant 0 : index
      %c0_135 = arith.constant 0 : index
      %540 = vector.load %arg5[%c0_134, %c0_135] : memref<64x10xf32, #tpu.memory_space<vmem>>, vector<32x10xf32>
      %cst_136 = arith.constant dense<0.000000e+00> : vector<2x10xf32>
      %541 = tpu.matmul %529, %540, %cst_136 {dimension_numbers = #tpu.dot_dimension_numbers<[1], [0], [0], [1], [0, 0, 1, 1], [], []>} : vector<2x32xf32>, vector<32x10xf32>, vector<2x10xf32> -> vector<2x10xf32>
      %c32 = arith.constant 32 : index
      %c0_137 = arith.constant 0 : index
      %542 = vector.load %arg5[%c32, %c0_137] : memref<64x10xf32, #tpu.memory_space<vmem>>, vector<32x10xf32>
      %cst_138 = arith.constant dense<0.000000e+00> : vector<2x10xf32>
      %543 = tpu.matmul %530, %542, %cst_138 {dimension_numbers = #tpu.dot_dimension_numbers<[1], [0], [0], [1], [0, 0, 1, 1], [], []>} : vector<2x32xf32>, vector<32x10xf32>, vector<2x10xf32> -> vector<2x10xf32>
      %544 = arith.addf %541, %543 : vector<2x10xf32>
      %c0_139 = arith.constant 0 : index
      %c0_140 = arith.constant 0 : index
      %545 = vector.load %arg6[%c0_139, %c0_140] : memref<1x10xf32, #tpu.memory_space<vmem>>, vector<1x10xf32>
      %546 = vector.broadcast %545 : vector<1x10xf32> to vector<2x10xf32>
      %547 = arith.addf %544, %546 : vector<2x10xf32>
      %c0_141 = arith.constant 0 : index
      %c0_142 = arith.constant 0 : index
      %548 = vector.load %arg7[%c0_141, %c0_142] : memref<2x10xf32, #tpu.memory_space<vmem>>, vector<2x10xf32>
      tpu.vector_store %arg7[%c0_141, %c0_142], %547 {strides = array<i32>} : memref<2x10xf32, #tpu.memory_space<vmem>>, vector<2x10xf32>,
    } else {
    }
    return
  }
  func.func @transform_0(%arg0: i32) -> (i32, i32, i32) {
    %c0_i32 = arith.constant 0 : i32
    %c0_i32_0 = arith.constant 0 : i32
    %c0_i32_1 = arith.constant 0 : i32
    return %arg0, %c0_i32, %c0_i32_0 : i32, i32, i32
  }
  func.func @transform_1(%arg0: i32) -> (i32, i32, i32) {
    %c0_i32 = arith.constant 0 : i32
    %0 = arith.subi %c0_i32, %arg0 : i32
    %c0_i32_0 = arith.constant 0 : i32
    %c1_i32 = arith.constant 1 : i32
    %c0_i32_1 = arith.constant 0 : i32
    return %0, %c0_i32_0, %c1_i32 : i32, i32, i32
  }
  func.func @transform_2(%arg0: i32) -> (i32, i32) {
    %c0_i32 = arith.constant 0 : i32
    %c0_i32_0 = arith.constant 0 : i32
    %c0_i32_1 = arith.constant 0 : i32
    return %c0_i32, %c0_i32_0 : i32, i32
  }
  func.func @transform_3(%arg0: i32) -> (i32, i32) {
    %c0_i32 = arith.constant 0 : i32
    %c0_i32_0 = arith.constant 0 : i32
    %c0_i32_1 = arith.constant 0 : i32
    return %c0_i32, %c0_i32_0 : i32, i32
  }
  func.func @transform_4(%arg0: i32) -> (i32, i32) {
    %c0_i32 = arith.constant 0 : i32
    %c0_i32_0 = arith.constant 0 : i32
    %c0_i32_1 = arith.constant 0 : i32
    return %c0_i32, %c0_i32_0 : i32, i32
  }
  func.func @transform_5(%arg0: i32) -> (i32, i32) {
    %c0_i32 = arith.constant 0 : i32
    %c0_i32_0 = arith.constant 0 : i32
    %c0_i32_1 = arith.constant 0 : i32
    return %c0_i32, %c0_i32_0 : i32, i32
  }
  func.func @transform_6(%arg0: i32) -> (i32, i32) {
    %c0_i32 = arith.constant 0 : i32
    %c0_i32_0 = arith.constant 0 : i32
    %c0_i32_1 = arith.constant 0 : i32
    return %c0_i32, %c0_i32_0 : i32, i32
  }
}

module attributes {stable_mosaic.version = 11 : i64} {
  func.func @kernel(%arg0: i32, %arg1: memref<8x2x128xf32, #tpu.memory_space<vmem>>, %arg2: memref<8x2x128xf32, #tpu.memory_space<vmem>>, %arg3: memref<32x128xbf16, #tpu.memory_space<vmem>>, %arg4: memref<32x128xbf16, #tpu.memory_space<vmem>>, %arg5: memref<8x2x32xbf16, #tpu.memory_space<vmem>>, %arg6: memref<8x2x32xbf16, #tpu.memory_space<vmem>>, %arg7: memref<2x32xf32, #tpu.memory_space<vmem>>, %arg8: memref<2x32xf32, #tpu.memory_space<vmem>>, %arg9: memref<2x32xf32, #tpu.memory_space<vmem>>, %arg10: memref<2x32xf32, #tpu.memory_space<vmem>>) attributes {dimension_semantics = [#tpu.dimension_semantics<arbitrary>], iteration_bounds = array<i64: 1>, scalar_prefetch = 0 : i64, scratch_operands = 4 : i64, tpu.core_type = #tpu.core_type<tc>, window_params = [{transform_indices = @transform_0, window_bounds = array<i64: 8, 2, 128>}, {transform_indices = @transform_1, window_bounds = array<i64: 8, 2, 128>}, {pipeline_mode = #tpu.pipeline_mode<synchronous>, transform_indices = @transform_2, window_bounds = array<i64: 32, 128>}, {pipeline_mode = #tpu.pipeline_mode<synchronous>, transform_indices = @transform_3, window_bounds = array<i64: 32, 128>}, {transform_indices = @transform_4, window_bounds = array<i64: 8, 2, 32>}, {transform_indices = @transform_5, window_bounds = array<i64: 8, 2, 32>}]} {
    %c0_i32 = arith.constant 0 : i32
    %0 = arith.cmpi eq, %arg0, %c0_i32 : i32
    %1 = arith.extui %0 : i1 to i32
    %c0_i32_0 = arith.constant 0 : i32
    %2 = arith.cmpi ne, %1, %c0_i32_0 : i32
    scf.if %2 {
      %cst_164 = arith.constant 0.000000e+00 : f32
      %605 = vector.broadcast %cst_164 : f32 to vector<2x32xf32>
      %c0_165 = arith.constant 0 : index
      %c0_166 = arith.constant 0 : index
      %606 = vector.load %arg7[%c0_165, %c0_166] : memref<2x32xf32, #tpu.memory_space<vmem>>, vector<2x32xf32>
      tpu.vector_store %arg7[%c0_165, %c0_166], %605 {strides = array<i32>} : memref<2x32xf32, #tpu.memory_space<vmem>>, vector<2x32xf32>,
      %cst_167 = arith.constant 0.000000e+00 : f32
      %607 = vector.broadcast %cst_167 : f32 to vector<2x32xf32>
      %c0_168 = arith.constant 0 : index
      %c0_169 = arith.constant 0 : index
      %608 = vector.load %arg8[%c0_168, %c0_169] : memref<2x32xf32, #tpu.memory_space<vmem>>, vector<2x32xf32>
      tpu.vector_store %arg8[%c0_168, %c0_169], %607 {strides = array<i32>} : memref<2x32xf32, #tpu.memory_space<vmem>>, vector<2x32xf32>,
      %cst_170 = arith.constant 0.000000e+00 : f32
      %609 = vector.broadcast %cst_170 : f32 to vector<2x32xf32>
      %c0_171 = arith.constant 0 : index
      %c0_172 = arith.constant 0 : index
      %610 = vector.load %arg9[%c0_171, %c0_172] : memref<2x32xf32, #tpu.memory_space<vmem>>, vector<2x32xf32>
      tpu.vector_store %arg9[%c0_171, %c0_172], %609 {strides = array<i32>} : memref<2x32xf32, #tpu.memory_space<vmem>>, vector<2x32xf32>,
      %cst_173 = arith.constant 0.000000e+00 : f32
      %611 = vector.broadcast %cst_173 : f32 to vector<2x32xf32>
      %c0_174 = arith.constant 0 : index
      %c0_175 = arith.constant 0 : index
      %612 = vector.load %arg10[%c0_174, %c0_175] : memref<2x32xf32, #tpu.memory_space<vmem>>, vector<2x32xf32>
      tpu.vector_store %arg10[%c0_174, %c0_175], %611 {strides = array<i32>} : memref<2x32xf32, #tpu.memory_space<vmem>>, vector<2x32xf32>,
    } else {
    }
    %c0 = arith.constant 0 : index
    %c0_1 = arith.constant 0 : index
    %3 = vector.load %arg3[%c0, %c0_1] : memref<32x128xbf16, #tpu.memory_space<vmem>>, vector<32x128xbf16>
    %c0_2 = arith.constant 0 : index
    %c0_3 = arith.constant 0 : index
    %4 = vector.load %arg4[%c0_2, %c0_3] : memref<32x128xbf16, #tpu.memory_space<vmem>>, vector<32x128xbf16>
    %c0_4 = arith.constant 0 : index
    %c0_5 = arith.constant 0 : index
    %5 = vector.load %arg7[%c0_4, %c0_5] : memref<2x32xf32, #tpu.memory_space<vmem>>, vector<2x32xf32>
    %c0_6 = arith.constant 0 : index
    %c0_7 = arith.constant 0 : index
    %6 = vector.load %arg8[%c0_6, %c0_7] : memref<2x32xf32, #tpu.memory_space<vmem>>, vector<2x32xf32>
    %c0_8 = arith.constant 0 : index
    %c0_9 = arith.constant 0 : index
    %7 = vector.load %arg9[%c0_8, %c0_9] : memref<2x32xf32, #tpu.memory_space<vmem>>, vector<2x32xf32>
    %c0_10 = arith.constant 0 : index
    %c0_11 = arith.constant 0 : index
    %8 = vector.load %arg10[%c0_10, %c0_11] : memref<2x32xf32, #tpu.memory_space<vmem>>, vector<2x32xf32>
    %c0_i32_12 = arith.constant 0 : i32
    %9 = arith.index_cast %c0_i32_12 : i32 to index
    %c0_13 = arith.constant 0 : index
    %c0_14 = arith.constant 0 : index
    %10 = vector.load %arg1[%9, %c0_13, %c0_14] : memref<8x2x128xf32, #tpu.memory_space<vmem>>, vector<1x2x128xf32>
    %11 = vector.shape_cast %10 : vector<1x2x128xf32> to vector<2x128xf32>
    %12 = arith.truncf %5 : vector<2x32xf32> to vector<2x32xbf16>
    %cst = arith.constant dense<0.000000e+00> : vector<2x128xf32>
    %13 = tpu.matmul %12, %3, %cst {dimension_numbers = #tpu.dot_dimension_numbers<[1], [0], [0], [1], [0, 0, 1, 1], [], []>} : vector<2x32xbf16>, vector<32x128xbf16>, vector<2x128xf32> -> vector<2x128xf32>
    %14 = arith.addf %11, %13 : vector<2x128xf32>
    %15 = vector.extract_strided_slice %14 {offsets = [0, 0], sizes = [2, 32], strides = [1, 1]} : vector<2x128xf32> to vector<2x32xf32>
    %16 = arith.negf %15 : vector<2x32xf32>
    %17 = math.exp %16 : vector<2x32xf32>
    %cst_15 = arith.constant 1.000000e+00 : f32
    %18 = vector.broadcast %cst_15 : f32 to vector<2x32xf32>
    %19 = arith.addf %18, %17 : vector<2x32xf32>
    %20 = arith.divf %18, %19 : vector<2x32xf32>
    %21 = vector.extract_strided_slice %14 {offsets = [0, 32], sizes = [2, 32], strides = [1, 1]} : vector<2x128xf32> to vector<2x32xf32>
    %22 = arith.negf %21 : vector<2x32xf32>
    %23 = math.exp %22 : vector<2x32xf32>
    %cst_16 = arith.constant 1.000000e+00 : f32
    %24 = vector.broadcast %cst_16 : f32 to vector<2x32xf32>
    %25 = arith.addf %24, %23 : vector<2x32xf32>
    %26 = arith.divf %24, %25 : vector<2x32xf32>
    %27 = vector.extract_strided_slice %14 {offsets = [0, 64], sizes = [2, 32], strides = [1, 1]} : vector<2x128xf32> to vector<2x32xf32>
    %28 = math.tanh %27 : vector<2x32xf32>
    %29 = vector.extract_strided_slice %14 {offsets = [0, 96], sizes = [2, 32], strides = [1, 1]} : vector<2x128xf32> to vector<2x32xf32>
    %30 = arith.negf %29 : vector<2x32xf32>
    %31 = math.exp %30 : vector<2x32xf32>
    %cst_17 = arith.constant 1.000000e+00 : f32
    %32 = vector.broadcast %cst_17 : f32 to vector<2x32xf32>
    %33 = arith.addf %32, %31 : vector<2x32xf32>
    %34 = arith.divf %32, %33 : vector<2x32xf32>
    %35 = arith.mulf %26, %6 : vector<2x32xf32>
    %36 = arith.mulf %20, %28 : vector<2x32xf32>
    %37 = arith.addf %35, %36 : vector<2x32xf32>
    %38 = math.tanh %37 : vector<2x32xf32>
    %39 = arith.mulf %34, %38 : vector<2x32xf32>
    %c7_i32 = arith.constant 7 : i32
    %40 = arith.subi %c7_i32, %c0_i32_12 : i32
    %41 = arith.index_cast %40 : i32 to index
    %c0_18 = arith.constant 0 : index
    %c0_19 = arith.constant 0 : index
    %42 = vector.load %arg2[%41, %c0_18, %c0_19] : memref<8x2x128xf32, #tpu.memory_space<vmem>>, vector<1x2x128xf32>
    %43 = vector.shape_cast %42 : vector<1x2x128xf32> to vector<2x128xf32>
    %44 = arith.truncf %7 : vector<2x32xf32> to vector<2x32xbf16>
    %cst_20 = arith.constant dense<0.000000e+00> : vector<2x128xf32>
    %45 = tpu.matmul %44, %4, %cst_20 {dimension_numbers = #tpu.dot_dimension_numbers<[1], [0], [0], [1], [0, 0, 1, 1], [], []>} : vector<2x32xbf16>, vector<32x128xbf16>, vector<2x128xf32> -> vector<2x128xf32>
    %46 = arith.addf %43, %45 : vector<2x128xf32>
    %47 = vector.extract_strided_slice %46 {offsets = [0, 0], sizes = [2, 32], strides = [1, 1]} : vector<2x128xf32> to vector<2x32xf32>
    %48 = arith.negf %47 : vector<2x32xf32>
    %49 = math.exp %48 : vector<2x32xf32>
    %cst_21 = arith.constant 1.000000e+00 : f32
    %50 = vector.broadcast %cst_21 : f32 to vector<2x32xf32>
    %51 = arith.addf %50, %49 : vector<2x32xf32>
    %52 = arith.divf %50, %51 : vector<2x32xf32>
    %53 = vector.extract_strided_slice %46 {offsets = [0, 32], sizes = [2, 32], strides = [1, 1]} : vector<2x128xf32> to vector<2x32xf32>
    %54 = arith.negf %53 : vector<2x32xf32>
    %55 = math.exp %54 : vector<2x32xf32>
    %cst_22 = arith.constant 1.000000e+00 : f32
    %56 = vector.broadcast %cst_22 : f32 to vector<2x32xf32>
    %57 = arith.addf %56, %55 : vector<2x32xf32>
    %58 = arith.divf %56, %57 : vector<2x32xf32>
    %59 = vector.extract_strided_slice %46 {offsets = [0, 64], sizes = [2, 32], strides = [1, 1]} : vector<2x128xf32> to vector<2x32xf32>
    %60 = math.tanh %59 : vector<2x32xf32>
    %61 = vector.extract_strided_slice %46 {offsets = [0, 96], sizes = [2, 32], strides = [1, 1]} : vector<2x128xf32> to vector<2x32xf32>
    %62 = arith.negf %61 : vector<2x32xf32>
    %63 = math.exp %62 : vector<2x32xf32>
    %cst_23 = arith.constant 1.000000e+00 : f32
    %64 = vector.broadcast %cst_23 : f32 to vector<2x32xf32>
    %65 = arith.addf %64, %63 : vector<2x32xf32>
    %66 = arith.divf %64, %65 : vector<2x32xf32>
    %67 = arith.mulf %58, %8 : vector<2x32xf32>
    %68 = arith.mulf %52, %60 : vector<2x32xf32>
    %69 = arith.addf %67, %68 : vector<2x32xf32>
    %70 = math.tanh %69 : vector<2x32xf32>
    %71 = arith.mulf %66, %70 : vector<2x32xf32>
    %72 = arith.truncf %39 : vector<2x32xf32> to vector<2x32xbf16>
    %73 = arith.index_cast %c0_i32_12 : i32 to index
    %c0_24 = arith.constant 0 : index
    %c0_25 = arith.constant 0 : index
    %74 = vector.load %arg5[%73, %c0_24, %c0_25] : memref<8x2x32xbf16, #tpu.memory_space<vmem>>, vector<1x2x32xbf16>
    %75 = vector.shape_cast %74 : vector<1x2x32xbf16> to vector<2x32xbf16>
    %76 = vector.shape_cast %72 : vector<2x32xbf16> to vector<1x2x32xbf16>
    tpu.vector_store %arg5[%73, %c0_24, %c0_25], %76 {strides = array<i32>} : memref<8x2x32xbf16, #tpu.memory_space<vmem>>, vector<1x2x32xbf16>,
    %77 = arith.truncf %71 : vector<2x32xf32> to vector<2x32xbf16>
    %c7_i32_26 = arith.constant 7 : i32
    %78 = arith.subi %c7_i32_26, %c0_i32_12 : i32
    %79 = arith.index_cast %78 : i32 to index
    %c0_27 = arith.constant 0 : index
    %c0_28 = arith.constant 0 : index
    %80 = vector.load %arg6[%79, %c0_27, %c0_28] : memref<8x2x32xbf16, #tpu.memory_space<vmem>>, vector<1x2x32xbf16>
    %81 = vector.shape_cast %80 : vector<1x2x32xbf16> to vector<2x32xbf16>
    %82 = vector.shape_cast %77 : vector<2x32xbf16> to vector<1x2x32xbf16>
    tpu.vector_store %arg6[%79, %c0_27, %c0_28], %82 {strides = array<i32>} : memref<8x2x32xbf16, #tpu.memory_space<vmem>>, vector<1x2x32xbf16>,
    %c1_i32 = arith.constant 1 : i32
    %83 = arith.index_cast %c1_i32 : i32 to index
    %c0_29 = arith.constant 0 : index
    %c0_30 = arith.constant 0 : index
    %84 = vector.load %arg1[%83, %c0_29, %c0_30] : memref<8x2x128xf32, #tpu.memory_space<vmem>>, vector<1x2x128xf32>
    %85 = vector.shape_cast %84 : vector<1x2x128xf32> to vector<2x128xf32>
    %86 = arith.truncf %39 : vector<2x32xf32> to vector<2x32xbf16>
    %cst_31 = arith.constant dense<0.000000e+00> : vector<2x128xf32>
    %87 = tpu.matmul %86, %3, %cst_31 {dimension_numbers = #tpu.dot_dimension_numbers<[1], [0], [0], [1], [0, 0, 1, 1], [], []>} : vector<2x32xbf16>, vector<32x128xbf16>, vector<2x128xf32> -> vector<2x128xf32>
    %88 = arith.addf %85, %87 : vector<2x128xf32>
    %89 = vector.extract_strided_slice %88 {offsets = [0, 0], sizes = [2, 32], strides = [1, 1]} : vector<2x128xf32> to vector<2x32xf32>
    %90 = arith.negf %89 : vector<2x32xf32>
    %91 = math.exp %90 : vector<2x32xf32>
    %cst_32 = arith.constant 1.000000e+00 : f32
    %92 = vector.broadcast %cst_32 : f32 to vector<2x32xf32>
    %93 = arith.addf %92, %91 : vector<2x32xf32>
    %94 = arith.divf %92, %93 : vector<2x32xf32>
    %95 = vector.extract_strided_slice %88 {offsets = [0, 32], sizes = [2, 32], strides = [1, 1]} : vector<2x128xf32> to vector<2x32xf32>
    %96 = arith.negf %95 : vector<2x32xf32>
    %97 = math.exp %96 : vector<2x32xf32>
    %cst_33 = arith.constant 1.000000e+00 : f32
    %98 = vector.broadcast %cst_33 : f32 to vector<2x32xf32>
    %99 = arith.addf %98, %97 : vector<2x32xf32>
    %100 = arith.divf %98, %99 : vector<2x32xf32>
    %101 = vector.extract_strided_slice %88 {offsets = [0, 64], sizes = [2, 32], strides = [1, 1]} : vector<2x128xf32> to vector<2x32xf32>
    %102 = math.tanh %101 : vector<2x32xf32>
    %103 = vector.extract_strided_slice %88 {offsets = [0, 96], sizes = [2, 32], strides = [1, 1]} : vector<2x128xf32> to vector<2x32xf32>
    %104 = arith.negf %103 : vector<2x32xf32>
    %105 = math.exp %104 : vector<2x32xf32>
    %cst_34 = arith.constant 1.000000e+00 : f32
    %106 = vector.broadcast %cst_34 : f32 to vector<2x32xf32>
    %107 = arith.addf %106, %105 : vector<2x32xf32>
    %108 = arith.divf %106, %107 : vector<2x32xf32>
    %109 = arith.mulf %100, %37 : vector<2x32xf32>
    %110 = arith.mulf %94, %102 : vector<2x32xf32>
    %111 = arith.addf %109, %110 : vector<2x32xf32>
    %112 = math.tanh %111 : vector<2x32xf32>
    %113 = arith.mulf %108, %112 : vector<2x32xf32>
    %c7_i32_35 = arith.constant 7 : i32
    %114 = arith.subi %c7_i32_35, %c1_i32 : i32
    %115 = arith.index_cast %114 : i32 to index
    %c0_36 = arith.constant 0 : index
    %c0_37 = arith.constant 0 : index
    %116 = vector.load %arg2[%115, %c0_36, %c0_37] : memref<8x2x128xf32, #tpu.memory_space<vmem>>, vector<1x2x128xf32>
    %117 = vector.shape_cast %116 : vector<1x2x128xf32> to vector<2x128xf32>
    %118 = arith.truncf %71 : vector<2x32xf32> to vector<2x32xbf16>
    %cst_38 = arith.constant dense<0.000000e+00> : vector<2x128xf32>
    %119 = tpu.matmul %118, %4, %cst_38 {dimension_numbers = #tpu.dot_dimension_numbers<[1], [0], [0], [1], [0, 0, 1, 1], [], []>} : vector<2x32xbf16>, vector<32x128xbf16>, vector<2x128xf32> -> vector<2x128xf32>
    %120 = arith.addf %117, %119 : vector<2x128xf32>
    %121 = vector.extract_strided_slice %120 {offsets = [0, 0], sizes = [2, 32], strides = [1, 1]} : vector<2x128xf32> to vector<2x32xf32>
    %122 = arith.negf %121 : vector<2x32xf32>
    %123 = math.exp %122 : vector<2x32xf32>
    %cst_39 = arith.constant 1.000000e+00 : f32
    %124 = vector.broadcast %cst_39 : f32 to vector<2x32xf32>
    %125 = arith.addf %124, %123 : vector<2x32xf32>
    %126 = arith.divf %124, %125 : vector<2x32xf32>
    %127 = vector.extract_strided_slice %120 {offsets = [0, 32], sizes = [2, 32], strides = [1, 1]} : vector<2x128xf32> to vector<2x32xf32>
    %128 = arith.negf %127 : vector<2x32xf32>
    %129 = math.exp %128 : vector<2x32xf32>
    %cst_40 = arith.constant 1.000000e+00 : f32
    %130 = vector.broadcast %cst_40 : f32 to vector<2x32xf32>
    %131 = arith.addf %130, %129 : vector<2x32xf32>
    %132 = arith.divf %130, %131 : vector<2x32xf32>
    %133 = vector.extract_strided_slice %120 {offsets = [0, 64], sizes = [2, 32], strides = [1, 1]} : vector<2x128xf32> to vector<2x32xf32>
    %134 = math.tanh %133 : vector<2x32xf32>
    %135 = vector.extract_strided_slice %120 {offsets = [0, 96], sizes = [2, 32], strides = [1, 1]} : vector<2x128xf32> to vector<2x32xf32>
    %136 = arith.negf %135 : vector<2x32xf32>
    %137 = math.exp %136 : vector<2x32xf32>
    %cst_41 = arith.constant 1.000000e+00 : f32
    %138 = vector.broadcast %cst_41 : f32 to vector<2x32xf32>
    %139 = arith.addf %138, %137 : vector<2x32xf32>
    %140 = arith.divf %138, %139 : vector<2x32xf32>
    %141 = arith.mulf %132, %69 : vector<2x32xf32>
    %142 = arith.mulf %126, %134 : vector<2x32xf32>
    %143 = arith.addf %141, %142 : vector<2x32xf32>
    %144 = math.tanh %143 : vector<2x32xf32>
    %145 = arith.mulf %140, %144 : vector<2x32xf32>
    %146 = arith.truncf %113 : vector<2x32xf32> to vector<2x32xbf16>
    %147 = arith.index_cast %c1_i32 : i32 to index
    %c0_42 = arith.constant 0 : index
    %c0_43 = arith.constant 0 : index
    %148 = vector.load %arg5[%147, %c0_42, %c0_43] : memref<8x2x32xbf16, #tpu.memory_space<vmem>>, vector<1x2x32xbf16>
    %149 = vector.shape_cast %148 : vector<1x2x32xbf16> to vector<2x32xbf16>
    %150 = vector.shape_cast %146 : vector<2x32xbf16> to vector<1x2x32xbf16>
    tpu.vector_store %arg5[%147, %c0_42, %c0_43], %150 {strides = array<i32>} : memref<8x2x32xbf16, #tpu.memory_space<vmem>>, vector<1x2x32xbf16>,
    %151 = arith.truncf %145 : vector<2x32xf32> to vector<2x32xbf16>
    %c7_i32_44 = arith.constant 7 : i32
    %152 = arith.subi %c7_i32_44, %c1_i32 : i32
    %153 = arith.index_cast %152 : i32 to index
    %c0_45 = arith.constant 0 : index
    %c0_46 = arith.constant 0 : index
    %154 = vector.load %arg6[%153, %c0_45, %c0_46] : memref<8x2x32xbf16, #tpu.memory_space<vmem>>, vector<1x2x32xbf16>
    %155 = vector.shape_cast %154 : vector<1x2x32xbf16> to vector<2x32xbf16>
    %156 = vector.shape_cast %151 : vector<2x32xbf16> to vector<1x2x32xbf16>
    tpu.vector_store %arg6[%153, %c0_45, %c0_46], %156 {strides = array<i32>} : memref<8x2x32xbf16, #tpu.memory_space<vmem>>, vector<1x2x32xbf16>,
    %c2_i32 = arith.constant 2 : i32
    %157 = arith.index_cast %c2_i32 : i32 to index
    %c0_47 = arith.constant 0 : index
    %c0_48 = arith.constant 0 : index
    %158 = vector.load %arg1[%157, %c0_47, %c0_48] : memref<8x2x128xf32, #tpu.memory_space<vmem>>, vector<1x2x128xf32>
    %159 = vector.shape_cast %158 : vector<1x2x128xf32> to vector<2x128xf32>
    %160 = arith.truncf %113 : vector<2x32xf32> to vector<2x32xbf16>
    %cst_49 = arith.constant dense<0.000000e+00> : vector<2x128xf32>
    %161 = tpu.matmul %160, %3, %cst_49 {dimension_numbers = #tpu.dot_dimension_numbers<[1], [0], [0], [1], [0, 0, 1, 1], [], []>} : vector<2x32xbf16>, vector<32x128xbf16>, vector<2x128xf32> -> vector<2x128xf32>
    %162 = arith.addf %159, %161 : vector<2x128xf32>
    %163 = vector.extract_strided_slice %162 {offsets = [0, 0], sizes = [2, 32], strides = [1, 1]} : vector<2x128xf32> to vector<2x32xf32>
    %164 = arith.negf %163 : vector<2x32xf32>
    %165 = math.exp %164 : vector<2x32xf32>
    %cst_50 = arith.constant 1.000000e+00 : f32
    %166 = vector.broadcast %cst_50 : f32 to vector<2x32xf32>
    %167 = arith.addf %166, %165 : vector<2x32xf32>
    %168 = arith.divf %166, %167 : vector<2x32xf32>
    %169 = vector.extract_strided_slice %162 {offsets = [0, 32], sizes = [2, 32], strides = [1, 1]} : vector<2x128xf32> to vector<2x32xf32>
    %170 = arith.negf %169 : vector<2x32xf32>
    %171 = math.exp %170 : vector<2x32xf32>
    %cst_51 = arith.constant 1.000000e+00 : f32
    %172 = vector.broadcast %cst_51 : f32 to vector<2x32xf32>
    %173 = arith.addf %172, %171 : vector<2x32xf32>
    %174 = arith.divf %172, %173 : vector<2x32xf32>
    %175 = vector.extract_strided_slice %162 {offsets = [0, 64], sizes = [2, 32], strides = [1, 1]} : vector<2x128xf32> to vector<2x32xf32>
    %176 = math.tanh %175 : vector<2x32xf32>
    %177 = vector.extract_strided_slice %162 {offsets = [0, 96], sizes = [2, 32], strides = [1, 1]} : vector<2x128xf32> to vector<2x32xf32>
    %178 = arith.negf %177 : vector<2x32xf32>
    %179 = math.exp %178 : vector<2x32xf32>
    %cst_52 = arith.constant 1.000000e+00 : f32
    %180 = vector.broadcast %cst_52 : f32 to vector<2x32xf32>
    %181 = arith.addf %180, %179 : vector<2x32xf32>
    %182 = arith.divf %180, %181 : vector<2x32xf32>
    %183 = arith.mulf %174, %111 : vector<2x32xf32>
    %184 = arith.mulf %168, %176 : vector<2x32xf32>
    %185 = arith.addf %183, %184 : vector<2x32xf32>
    %186 = math.tanh %185 : vector<2x32xf32>
    %187 = arith.mulf %182, %186 : vector<2x32xf32>
    %c7_i32_53 = arith.constant 7 : i32
    %188 = arith.subi %c7_i32_53, %c2_i32 : i32
    %189 = arith.index_cast %188 : i32 to index
    %c0_54 = arith.constant 0 : index
    %c0_55 = arith.constant 0 : index
    %190 = vector.load %arg2[%189, %c0_54, %c0_55] : memref<8x2x128xf32, #tpu.memory_space<vmem>>, vector<1x2x128xf32>
    %191 = vector.shape_cast %190 : vector<1x2x128xf32> to vector<2x128xf32>
    %192 = arith.truncf %145 : vector<2x32xf32> to vector<2x32xbf16>
    %cst_56 = arith.constant dense<0.000000e+00> : vector<2x128xf32>
    %193 = tpu.matmul %192, %4, %cst_56 {dimension_numbers = #tpu.dot_dimension_numbers<[1], [0], [0], [1], [0, 0, 1, 1], [], []>} : vector<2x32xbf16>, vector<32x128xbf16>, vector<2x128xf32> -> vector<2x128xf32>
    %194 = arith.addf %191, %193 : vector<2x128xf32>
    %195 = vector.extract_strided_slice %194 {offsets = [0, 0], sizes = [2, 32], strides = [1, 1]} : vector<2x128xf32> to vector<2x32xf32>
    %196 = arith.negf %195 : vector<2x32xf32>
    %197 = math.exp %196 : vector<2x32xf32>
    %cst_57 = arith.constant 1.000000e+00 : f32
    %198 = vector.broadcast %cst_57 : f32 to vector<2x32xf32>
    %199 = arith.addf %198, %197 : vector<2x32xf32>
    %200 = arith.divf %198, %199 : vector<2x32xf32>
    %201 = vector.extract_strided_slice %194 {offsets = [0, 32], sizes = [2, 32], strides = [1, 1]} : vector<2x128xf32> to vector<2x32xf32>
    %202 = arith.negf %201 : vector<2x32xf32>
    %203 = math.exp %202 : vector<2x32xf32>
    %cst_58 = arith.constant 1.000000e+00 : f32
    %204 = vector.broadcast %cst_58 : f32 to vector<2x32xf32>
    %205 = arith.addf %204, %203 : vector<2x32xf32>
    %206 = arith.divf %204, %205 : vector<2x32xf32>
    %207 = vector.extract_strided_slice %194 {offsets = [0, 64], sizes = [2, 32], strides = [1, 1]} : vector<2x128xf32> to vector<2x32xf32>
    %208 = math.tanh %207 : vector<2x32xf32>
    %209 = vector.extract_strided_slice %194 {offsets = [0, 96], sizes = [2, 32], strides = [1, 1]} : vector<2x128xf32> to vector<2x32xf32>
    %210 = arith.negf %209 : vector<2x32xf32>
    %211 = math.exp %210 : vector<2x32xf32>
    %cst_59 = arith.constant 1.000000e+00 : f32
    %212 = vector.broadcast %cst_59 : f32 to vector<2x32xf32>
    %213 = arith.addf %212, %211 : vector<2x32xf32>
    %214 = arith.divf %212, %213 : vector<2x32xf32>
    %215 = arith.mulf %206, %143 : vector<2x32xf32>
    %216 = arith.mulf %200, %208 : vector<2x32xf32>
    %217 = arith.addf %215, %216 : vector<2x32xf32>
    %218 = math.tanh %217 : vector<2x32xf32>
    %219 = arith.mulf %214, %218 : vector<2x32xf32>
    %220 = arith.truncf %187 : vector<2x32xf32> to vector<2x32xbf16>
    %221 = arith.index_cast %c2_i32 : i32 to index
    %c0_60 = arith.constant 0 : index
    %c0_61 = arith.constant 0 : index
    %222 = vector.load %arg5[%221, %c0_60, %c0_61] : memref<8x2x32xbf16, #tpu.memory_space<vmem>>, vector<1x2x32xbf16>
    %223 = vector.shape_cast %222 : vector<1x2x32xbf16> to vector<2x32xbf16>
    %224 = vector.shape_cast %220 : vector<2x32xbf16> to vector<1x2x32xbf16>
    tpu.vector_store %arg5[%221, %c0_60, %c0_61], %224 {strides = array<i32>} : memref<8x2x32xbf16, #tpu.memory_space<vmem>>, vector<1x2x32xbf16>,
    %225 = arith.truncf %219 : vector<2x32xf32> to vector<2x32xbf16>
    %c7_i32_62 = arith.constant 7 : i32
    %226 = arith.subi %c7_i32_62, %c2_i32 : i32
    %227 = arith.index_cast %226 : i32 to index
    %c0_63 = arith.constant 0 : index
    %c0_64 = arith.constant 0 : index
    %228 = vector.load %arg6[%227, %c0_63, %c0_64] : memref<8x2x32xbf16, #tpu.memory_space<vmem>>, vector<1x2x32xbf16>
    %229 = vector.shape_cast %228 : vector<1x2x32xbf16> to vector<2x32xbf16>
    %230 = vector.shape_cast %225 : vector<2x32xbf16> to vector<1x2x32xbf16>
    tpu.vector_store %arg6[%227, %c0_63, %c0_64], %230 {strides = array<i32>} : memref<8x2x32xbf16, #tpu.memory_space<vmem>>, vector<1x2x32xbf16>,
    %c3_i32 = arith.constant 3 : i32
    %231 = arith.index_cast %c3_i32 : i32 to index
    %c0_65 = arith.constant 0 : index
    %c0_66 = arith.constant 0 : index
    %232 = vector.load %arg1[%231, %c0_65, %c0_66] : memref<8x2x128xf32, #tpu.memory_space<vmem>>, vector<1x2x128xf32>
    %233 = vector.shape_cast %232 : vector<1x2x128xf32> to vector<2x128xf32>
    %234 = arith.truncf %187 : vector<2x32xf32> to vector<2x32xbf16>
    %cst_67 = arith.constant dense<0.000000e+00> : vector<2x128xf32>
    %235 = tpu.matmul %234, %3, %cst_67 {dimension_numbers = #tpu.dot_dimension_numbers<[1], [0], [0], [1], [0, 0, 1, 1], [], []>} : vector<2x32xbf16>, vector<32x128xbf16>, vector<2x128xf32> -> vector<2x128xf32>
    %236 = arith.addf %233, %235 : vector<2x128xf32>
    %237 = vector.extract_strided_slice %236 {offsets = [0, 0], sizes = [2, 32], strides = [1, 1]} : vector<2x128xf32> to vector<2x32xf32>
    %238 = arith.negf %237 : vector<2x32xf32>
    %239 = math.exp %238 : vector<2x32xf32>
    %cst_68 = arith.constant 1.000000e+00 : f32
    %240 = vector.broadcast %cst_68 : f32 to vector<2x32xf32>
    %241 = arith.addf %240, %239 : vector<2x32xf32>
    %242 = arith.divf %240, %241 : vector<2x32xf32>
    %243 = vector.extract_strided_slice %236 {offsets = [0, 32], sizes = [2, 32], strides = [1, 1]} : vector<2x128xf32> to vector<2x32xf32>
    %244 = arith.negf %243 : vector<2x32xf32>
    %245 = math.exp %244 : vector<2x32xf32>
    %cst_69 = arith.constant 1.000000e+00 : f32
    %246 = vector.broadcast %cst_69 : f32 to vector<2x32xf32>
    %247 = arith.addf %246, %245 : vector<2x32xf32>
    %248 = arith.divf %246, %247 : vector<2x32xf32>
    %249 = vector.extract_strided_slice %236 {offsets = [0, 64], sizes = [2, 32], strides = [1, 1]} : vector<2x128xf32> to vector<2x32xf32>
    %250 = math.tanh %249 : vector<2x32xf32>
    %251 = vector.extract_strided_slice %236 {offsets = [0, 96], sizes = [2, 32], strides = [1, 1]} : vector<2x128xf32> to vector<2x32xf32>
    %252 = arith.negf %251 : vector<2x32xf32>
    %253 = math.exp %252 : vector<2x32xf32>
    %cst_70 = arith.constant 1.000000e+00 : f32
    %254 = vector.broadcast %cst_70 : f32 to vector<2x32xf32>
    %255 = arith.addf %254, %253 : vector<2x32xf32>
    %256 = arith.divf %254, %255 : vector<2x32xf32>
    %257 = arith.mulf %248, %185 : vector<2x32xf32>
    %258 = arith.mulf %242, %250 : vector<2x32xf32>
    %259 = arith.addf %257, %258 : vector<2x32xf32>
    %260 = math.tanh %259 : vector<2x32xf32>
    %261 = arith.mulf %256, %260 : vector<2x32xf32>
    %c7_i32_71 = arith.constant 7 : i32
    %262 = arith.subi %c7_i32_71, %c3_i32 : i32
    %263 = arith.index_cast %262 : i32 to index
    %c0_72 = arith.constant 0 : index
    %c0_73 = arith.constant 0 : index
    %264 = vector.load %arg2[%263, %c0_72, %c0_73] : memref<8x2x128xf32, #tpu.memory_space<vmem>>, vector<1x2x128xf32>
    %265 = vector.shape_cast %264 : vector<1x2x128xf32> to vector<2x128xf32>
    %266 = arith.truncf %219 : vector<2x32xf32> to vector<2x32xbf16>
    %cst_74 = arith.constant dense<0.000000e+00> : vector<2x128xf32>
    %267 = tpu.matmul %266, %4, %cst_74 {dimension_numbers = #tpu.dot_dimension_numbers<[1], [0], [0], [1], [0, 0, 1, 1], [], []>} : vector<2x32xbf16>, vector<32x128xbf16>, vector<2x128xf32> -> vector<2x128xf32>
    %268 = arith.addf %265, %267 : vector<2x128xf32>
    %269 = vector.extract_strided_slice %268 {offsets = [0, 0], sizes = [2, 32], strides = [1, 1]} : vector<2x128xf32> to vector<2x32xf32>
    %270 = arith.negf %269 : vector<2x32xf32>
    %271 = math.exp %270 : vector<2x32xf32>
    %cst_75 = arith.constant 1.000000e+00 : f32
    %272 = vector.broadcast %cst_75 : f32 to vector<2x32xf32>
    %273 = arith.addf %272, %271 : vector<2x32xf32>
    %274 = arith.divf %272, %273 : vector<2x32xf32>
    %275 = vector.extract_strided_slice %268 {offsets = [0, 32], sizes = [2, 32], strides = [1, 1]} : vector<2x128xf32> to vector<2x32xf32>
    %276 = arith.negf %275 : vector<2x32xf32>
    %277 = math.exp %276 : vector<2x32xf32>
    %cst_76 = arith.constant 1.000000e+00 : f32
    %278 = vector.broadcast %cst_76 : f32 to vector<2x32xf32>
    %279 = arith.addf %278, %277 : vector<2x32xf32>
    %280 = arith.divf %278, %279 : vector<2x32xf32>
    %281 = vector.extract_strided_slice %268 {offsets = [0, 64], sizes = [2, 32], strides = [1, 1]} : vector<2x128xf32> to vector<2x32xf32>
    %282 = math.tanh %281 : vector<2x32xf32>
    %283 = vector.extract_strided_slice %268 {offsets = [0, 96], sizes = [2, 32], strides = [1, 1]} : vector<2x128xf32> to vector<2x32xf32>
    %284 = arith.negf %283 : vector<2x32xf32>
    %285 = math.exp %284 : vector<2x32xf32>
    %cst_77 = arith.constant 1.000000e+00 : f32
    %286 = vector.broadcast %cst_77 : f32 to vector<2x32xf32>
    %287 = arith.addf %286, %285 : vector<2x32xf32>
    %288 = arith.divf %286, %287 : vector<2x32xf32>
    %289 = arith.mulf %280, %217 : vector<2x32xf32>
    %290 = arith.mulf %274, %282 : vector<2x32xf32>
    %291 = arith.addf %289, %290 : vector<2x32xf32>
    %292 = math.tanh %291 : vector<2x32xf32>
    %293 = arith.mulf %288, %292 : vector<2x32xf32>
    %294 = arith.truncf %261 : vector<2x32xf32> to vector<2x32xbf16>
    %295 = arith.index_cast %c3_i32 : i32 to index
    %c0_78 = arith.constant 0 : index
    %c0_79 = arith.constant 0 : index
    %296 = vector.load %arg5[%295, %c0_78, %c0_79] : memref<8x2x32xbf16, #tpu.memory_space<vmem>>, vector<1x2x32xbf16>
    %297 = vector.shape_cast %296 : vector<1x2x32xbf16> to vector<2x32xbf16>
    %298 = vector.shape_cast %294 : vector<2x32xbf16> to vector<1x2x32xbf16>
    tpu.vector_store %arg5[%295, %c0_78, %c0_79], %298 {strides = array<i32>} : memref<8x2x32xbf16, #tpu.memory_space<vmem>>, vector<1x2x32xbf16>,
    %299 = arith.truncf %293 : vector<2x32xf32> to vector<2x32xbf16>
    %c7_i32_80 = arith.constant 7 : i32
    %300 = arith.subi %c7_i32_80, %c3_i32 : i32
    %301 = arith.index_cast %300 : i32 to index
    %c0_81 = arith.constant 0 : index
    %c0_82 = arith.constant 0 : index
    %302 = vector.load %arg6[%301, %c0_81, %c0_82] : memref<8x2x32xbf16, #tpu.memory_space<vmem>>, vector<1x2x32xbf16>
    %303 = vector.shape_cast %302 : vector<1x2x32xbf16> to vector<2x32xbf16>
    %304 = vector.shape_cast %299 : vector<2x32xbf16> to vector<1x2x32xbf16>
    tpu.vector_store %arg6[%301, %c0_81, %c0_82], %304 {strides = array<i32>} : memref<8x2x32xbf16, #tpu.memory_space<vmem>>, vector<1x2x32xbf16>,
    %c4_i32 = arith.constant 4 : i32
    %305 = arith.index_cast %c4_i32 : i32 to index
    %c0_83 = arith.constant 0 : index
    %c0_84 = arith.constant 0 : index
    %306 = vector.load %arg1[%305, %c0_83, %c0_84] : memref<8x2x128xf32, #tpu.memory_space<vmem>>, vector<1x2x128xf32>
    %307 = vector.shape_cast %306 : vector<1x2x128xf32> to vector<2x128xf32>
    %308 = arith.truncf %261 : vector<2x32xf32> to vector<2x32xbf16>
    %cst_85 = arith.constant dense<0.000000e+00> : vector<2x128xf32>
    %309 = tpu.matmul %308, %3, %cst_85 {dimension_numbers = #tpu.dot_dimension_numbers<[1], [0], [0], [1], [0, 0, 1, 1], [], []>} : vector<2x32xbf16>, vector<32x128xbf16>, vector<2x128xf32> -> vector<2x128xf32>
    %310 = arith.addf %307, %309 : vector<2x128xf32>
    %311 = vector.extract_strided_slice %310 {offsets = [0, 0], sizes = [2, 32], strides = [1, 1]} : vector<2x128xf32> to vector<2x32xf32>
    %312 = arith.negf %311 : vector<2x32xf32>
    %313 = math.exp %312 : vector<2x32xf32>
    %cst_86 = arith.constant 1.000000e+00 : f32
    %314 = vector.broadcast %cst_86 : f32 to vector<2x32xf32>
    %315 = arith.addf %314, %313 : vector<2x32xf32>
    %316 = arith.divf %314, %315 : vector<2x32xf32>
    %317 = vector.extract_strided_slice %310 {offsets = [0, 32], sizes = [2, 32], strides = [1, 1]} : vector<2x128xf32> to vector<2x32xf32>
    %318 = arith.negf %317 : vector<2x32xf32>
    %319 = math.exp %318 : vector<2x32xf32>
    %cst_87 = arith.constant 1.000000e+00 : f32
    %320 = vector.broadcast %cst_87 : f32 to vector<2x32xf32>
    %321 = arith.addf %320, %319 : vector<2x32xf32>
    %322 = arith.divf %320, %321 : vector<2x32xf32>
    %323 = vector.extract_strided_slice %310 {offsets = [0, 64], sizes = [2, 32], strides = [1, 1]} : vector<2x128xf32> to vector<2x32xf32>
    %324 = math.tanh %323 : vector<2x32xf32>
    %325 = vector.extract_strided_slice %310 {offsets = [0, 96], sizes = [2, 32], strides = [1, 1]} : vector<2x128xf32> to vector<2x32xf32>
    %326 = arith.negf %325 : vector<2x32xf32>
    %327 = math.exp %326 : vector<2x32xf32>
    %cst_88 = arith.constant 1.000000e+00 : f32
    %328 = vector.broadcast %cst_88 : f32 to vector<2x32xf32>
    %329 = arith.addf %328, %327 : vector<2x32xf32>
    %330 = arith.divf %328, %329 : vector<2x32xf32>
    %331 = arith.mulf %322, %259 : vector<2x32xf32>
    %332 = arith.mulf %316, %324 : vector<2x32xf32>
    %333 = arith.addf %331, %332 : vector<2x32xf32>
    %334 = math.tanh %333 : vector<2x32xf32>
    %335 = arith.mulf %330, %334 : vector<2x32xf32>
    %c7_i32_89 = arith.constant 7 : i32
    %336 = arith.subi %c7_i32_89, %c4_i32 : i32
    %337 = arith.index_cast %336 : i32 to index
    %c0_90 = arith.constant 0 : index
    %c0_91 = arith.constant 0 : index
    %338 = vector.load %arg2[%337, %c0_90, %c0_91] : memref<8x2x128xf32, #tpu.memory_space<vmem>>, vector<1x2x128xf32>
    %339 = vector.shape_cast %338 : vector<1x2x128xf32> to vector<2x128xf32>
    %340 = arith.truncf %293 : vector<2x32xf32> to vector<2x32xbf16>
    %cst_92 = arith.constant dense<0.000000e+00> : vector<2x128xf32>
    %341 = tpu.matmul %340, %4, %cst_92 {dimension_numbers = #tpu.dot_dimension_numbers<[1], [0], [0], [1], [0, 0, 1, 1], [], []>} : vector<2x32xbf16>, vector<32x128xbf16>, vector<2x128xf32> -> vector<2x128xf32>
    %342 = arith.addf %339, %341 : vector<2x128xf32>
    %343 = vector.extract_strided_slice %342 {offsets = [0, 0], sizes = [2, 32], strides = [1, 1]} : vector<2x128xf32> to vector<2x32xf32>
    %344 = arith.negf %343 : vector<2x32xf32>
    %345 = math.exp %344 : vector<2x32xf32>
    %cst_93 = arith.constant 1.000000e+00 : f32
    %346 = vector.broadcast %cst_93 : f32 to vector<2x32xf32>
    %347 = arith.addf %346, %345 : vector<2x32xf32>
    %348 = arith.divf %346, %347 : vector<2x32xf32>
    %349 = vector.extract_strided_slice %342 {offsets = [0, 32], sizes = [2, 32], strides = [1, 1]} : vector<2x128xf32> to vector<2x32xf32>
    %350 = arith.negf %349 : vector<2x32xf32>
    %351 = math.exp %350 : vector<2x32xf32>
    %cst_94 = arith.constant 1.000000e+00 : f32
    %352 = vector.broadcast %cst_94 : f32 to vector<2x32xf32>
    %353 = arith.addf %352, %351 : vector<2x32xf32>
    %354 = arith.divf %352, %353 : vector<2x32xf32>
    %355 = vector.extract_strided_slice %342 {offsets = [0, 64], sizes = [2, 32], strides = [1, 1]} : vector<2x128xf32> to vector<2x32xf32>
    %356 = math.tanh %355 : vector<2x32xf32>
    %357 = vector.extract_strided_slice %342 {offsets = [0, 96], sizes = [2, 32], strides = [1, 1]} : vector<2x128xf32> to vector<2x32xf32>
    %358 = arith.negf %357 : vector<2x32xf32>
    %359 = math.exp %358 : vector<2x32xf32>
    %cst_95 = arith.constant 1.000000e+00 : f32
    %360 = vector.broadcast %cst_95 : f32 to vector<2x32xf32>
    %361 = arith.addf %360, %359 : vector<2x32xf32>
    %362 = arith.divf %360, %361 : vector<2x32xf32>
    %363 = arith.mulf %354, %291 : vector<2x32xf32>
    %364 = arith.mulf %348, %356 : vector<2x32xf32>
    %365 = arith.addf %363, %364 : vector<2x32xf32>
    %366 = math.tanh %365 : vector<2x32xf32>
    %367 = arith.mulf %362, %366 : vector<2x32xf32>
    %368 = arith.truncf %335 : vector<2x32xf32> to vector<2x32xbf16>
    %369 = arith.index_cast %c4_i32 : i32 to index
    %c0_96 = arith.constant 0 : index
    %c0_97 = arith.constant 0 : index
    %370 = vector.load %arg5[%369, %c0_96, %c0_97] : memref<8x2x32xbf16, #tpu.memory_space<vmem>>, vector<1x2x32xbf16>
    %371 = vector.shape_cast %370 : vector<1x2x32xbf16> to vector<2x32xbf16>
    %372 = vector.shape_cast %368 : vector<2x32xbf16> to vector<1x2x32xbf16>
    tpu.vector_store %arg5[%369, %c0_96, %c0_97], %372 {strides = array<i32>} : memref<8x2x32xbf16, #tpu.memory_space<vmem>>, vector<1x2x32xbf16>,
    %373 = arith.truncf %367 : vector<2x32xf32> to vector<2x32xbf16>
    %c7_i32_98 = arith.constant 7 : i32
    %374 = arith.subi %c7_i32_98, %c4_i32 : i32
    %375 = arith.index_cast %374 : i32 to index
    %c0_99 = arith.constant 0 : index
    %c0_100 = arith.constant 0 : index
    %376 = vector.load %arg6[%375, %c0_99, %c0_100] : memref<8x2x32xbf16, #tpu.memory_space<vmem>>, vector<1x2x32xbf16>
    %377 = vector.shape_cast %376 : vector<1x2x32xbf16> to vector<2x32xbf16>
    %378 = vector.shape_cast %373 : vector<2x32xbf16> to vector<1x2x32xbf16>
    tpu.vector_store %arg6[%375, %c0_99, %c0_100], %378 {strides = array<i32>} : memref<8x2x32xbf16, #tpu.memory_space<vmem>>, vector<1x2x32xbf16>,
    %c5_i32 = arith.constant 5 : i32
    %379 = arith.index_cast %c5_i32 : i32 to index
    %c0_101 = arith.constant 0 : index
    %c0_102 = arith.constant 0 : index
    %380 = vector.load %arg1[%379, %c0_101, %c0_102] : memref<8x2x128xf32, #tpu.memory_space<vmem>>, vector<1x2x128xf32>
    %381 = vector.shape_cast %380 : vector<1x2x128xf32> to vector<2x128xf32>
    %382 = arith.truncf %335 : vector<2x32xf32> to vector<2x32xbf16>
    %cst_103 = arith.constant dense<0.000000e+00> : vector<2x128xf32>
    %383 = tpu.matmul %382, %3, %cst_103 {dimension_numbers = #tpu.dot_dimension_numbers<[1], [0], [0], [1], [0, 0, 1, 1], [], []>} : vector<2x32xbf16>, vector<32x128xbf16>, vector<2x128xf32> -> vector<2x128xf32>
    %384 = arith.addf %381, %383 : vector<2x128xf32>
    %385 = vector.extract_strided_slice %384 {offsets = [0, 0], sizes = [2, 32], strides = [1, 1]} : vector<2x128xf32> to vector<2x32xf32>
    %386 = arith.negf %385 : vector<2x32xf32>
    %387 = math.exp %386 : vector<2x32xf32>
    %cst_104 = arith.constant 1.000000e+00 : f32
    %388 = vector.broadcast %cst_104 : f32 to vector<2x32xf32>
    %389 = arith.addf %388, %387 : vector<2x32xf32>
    %390 = arith.divf %388, %389 : vector<2x32xf32>
    %391 = vector.extract_strided_slice %384 {offsets = [0, 32], sizes = [2, 32], strides = [1, 1]} : vector<2x128xf32> to vector<2x32xf32>
    %392 = arith.negf %391 : vector<2x32xf32>
    %393 = math.exp %392 : vector<2x32xf32>
    %cst_105 = arith.constant 1.000000e+00 : f32
    %394 = vector.broadcast %cst_105 : f32 to vector<2x32xf32>
    %395 = arith.addf %394, %393 : vector<2x32xf32>
    %396 = arith.divf %394, %395 : vector<2x32xf32>
    %397 = vector.extract_strided_slice %384 {offsets = [0, 64], sizes = [2, 32], strides = [1, 1]} : vector<2x128xf32> to vector<2x32xf32>
    %398 = math.tanh %397 : vector<2x32xf32>
    %399 = vector.extract_strided_slice %384 {offsets = [0, 96], sizes = [2, 32], strides = [1, 1]} : vector<2x128xf32> to vector<2x32xf32>
    %400 = arith.negf %399 : vector<2x32xf32>
    %401 = math.exp %400 : vector<2x32xf32>
    %cst_106 = arith.constant 1.000000e+00 : f32
    %402 = vector.broadcast %cst_106 : f32 to vector<2x32xf32>
    %403 = arith.addf %402, %401 : vector<2x32xf32>
    %404 = arith.divf %402, %403 : vector<2x32xf32>
    %405 = arith.mulf %396, %333 : vector<2x32xf32>
    %406 = arith.mulf %390, %398 : vector<2x32xf32>
    %407 = arith.addf %405, %406 : vector<2x32xf32>
    %408 = math.tanh %407 : vector<2x32xf32>
    %409 = arith.mulf %404, %408 : vector<2x32xf32>
    %c7_i32_107 = arith.constant 7 : i32
    %410 = arith.subi %c7_i32_107, %c5_i32 : i32
    %411 = arith.index_cast %410 : i32 to index
    %c0_108 = arith.constant 0 : index
    %c0_109 = arith.constant 0 : index
    %412 = vector.load %arg2[%411, %c0_108, %c0_109] : memref<8x2x128xf32, #tpu.memory_space<vmem>>, vector<1x2x128xf32>
    %413 = vector.shape_cast %412 : vector<1x2x128xf32> to vector<2x128xf32>
    %414 = arith.truncf %367 : vector<2x32xf32> to vector<2x32xbf16>
    %cst_110 = arith.constant dense<0.000000e+00> : vector<2x128xf32>
    %415 = tpu.matmul %414, %4, %cst_110 {dimension_numbers = #tpu.dot_dimension_numbers<[1], [0], [0], [1], [0, 0, 1, 1], [], []>} : vector<2x32xbf16>, vector<32x128xbf16>, vector<2x128xf32> -> vector<2x128xf32>
    %416 = arith.addf %413, %415 : vector<2x128xf32>
    %417 = vector.extract_strided_slice %416 {offsets = [0, 0], sizes = [2, 32], strides = [1, 1]} : vector<2x128xf32> to vector<2x32xf32>
    %418 = arith.negf %417 : vector<2x32xf32>
    %419 = math.exp %418 : vector<2x32xf32>
    %cst_111 = arith.constant 1.000000e+00 : f32
    %420 = vector.broadcast %cst_111 : f32 to vector<2x32xf32>
    %421 = arith.addf %420, %419 : vector<2x32xf32>
    %422 = arith.divf %420, %421 : vector<2x32xf32>
    %423 = vector.extract_strided_slice %416 {offsets = [0, 32], sizes = [2, 32], strides = [1, 1]} : vector<2x128xf32> to vector<2x32xf32>
    %424 = arith.negf %423 : vector<2x32xf32>
    %425 = math.exp %424 : vector<2x32xf32>
    %cst_112 = arith.constant 1.000000e+00 : f32
    %426 = vector.broadcast %cst_112 : f32 to vector<2x32xf32>
    %427 = arith.addf %426, %425 : vector<2x32xf32>
    %428 = arith.divf %426, %427 : vector<2x32xf32>
    %429 = vector.extract_strided_slice %416 {offsets = [0, 64], sizes = [2, 32], strides = [1, 1]} : vector<2x128xf32> to vector<2x32xf32>
    %430 = math.tanh %429 : vector<2x32xf32>
    %431 = vector.extract_strided_slice %416 {offsets = [0, 96], sizes = [2, 32], strides = [1, 1]} : vector<2x128xf32> to vector<2x32xf32>
    %432 = arith.negf %431 : vector<2x32xf32>
    %433 = math.exp %432 : vector<2x32xf32>
    %cst_113 = arith.constant 1.000000e+00 : f32
    %434 = vector.broadcast %cst_113 : f32 to vector<2x32xf32>
    %435 = arith.addf %434, %433 : vector<2x32xf32>
    %436 = arith.divf %434, %435 : vector<2x32xf32>
    %437 = arith.mulf %428, %365 : vector<2x32xf32>
    %438 = arith.mulf %422, %430 : vector<2x32xf32>
    %439 = arith.addf %437, %438 : vector<2x32xf32>
    %440 = math.tanh %439 : vector<2x32xf32>
    %441 = arith.mulf %436, %440 : vector<2x32xf32>
    %442 = arith.truncf %409 : vector<2x32xf32> to vector<2x32xbf16>
    %443 = arith.index_cast %c5_i32 : i32 to index
    %c0_114 = arith.constant 0 : index
    %c0_115 = arith.constant 0 : index
    %444 = vector.load %arg5[%443, %c0_114, %c0_115] : memref<8x2x32xbf16, #tpu.memory_space<vmem>>, vector<1x2x32xbf16>
    %445 = vector.shape_cast %444 : vector<1x2x32xbf16> to vector<2x32xbf16>
    %446 = vector.shape_cast %442 : vector<2x32xbf16> to vector<1x2x32xbf16>
    tpu.vector_store %arg5[%443, %c0_114, %c0_115], %446 {strides = array<i32>} : memref<8x2x32xbf16, #tpu.memory_space<vmem>>, vector<1x2x32xbf16>,
    %447 = arith.truncf %441 : vector<2x32xf32> to vector<2x32xbf16>
    %c7_i32_116 = arith.constant 7 : i32
    %448 = arith.subi %c7_i32_116, %c5_i32 : i32
    %449 = arith.index_cast %448 : i32 to index
    %c0_117 = arith.constant 0 : index
    %c0_118 = arith.constant 0 : index
    %450 = vector.load %arg6[%449, %c0_117, %c0_118] : memref<8x2x32xbf16, #tpu.memory_space<vmem>>, vector<1x2x32xbf16>
    %451 = vector.shape_cast %450 : vector<1x2x32xbf16> to vector<2x32xbf16>
    %452 = vector.shape_cast %447 : vector<2x32xbf16> to vector<1x2x32xbf16>
    tpu.vector_store %arg6[%449, %c0_117, %c0_118], %452 {strides = array<i32>} : memref<8x2x32xbf16, #tpu.memory_space<vmem>>, vector<1x2x32xbf16>,
    %c6_i32 = arith.constant 6 : i32
    %453 = arith.index_cast %c6_i32 : i32 to index
    %c0_119 = arith.constant 0 : index
    %c0_120 = arith.constant 0 : index
    %454 = vector.load %arg1[%453, %c0_119, %c0_120] : memref<8x2x128xf32, #tpu.memory_space<vmem>>, vector<1x2x128xf32>
    %455 = vector.shape_cast %454 : vector<1x2x128xf32> to vector<2x128xf32>
    %456 = arith.truncf %409 : vector<2x32xf32> to vector<2x32xbf16>
    %cst_121 = arith.constant dense<0.000000e+00> : vector<2x128xf32>
    %457 = tpu.matmul %456, %3, %cst_121 {dimension_numbers = #tpu.dot_dimension_numbers<[1], [0], [0], [1], [0, 0, 1, 1], [], []>} : vector<2x32xbf16>, vector<32x128xbf16>, vector<2x128xf32> -> vector<2x128xf32>
    %458 = arith.addf %455, %457 : vector<2x128xf32>
    %459 = vector.extract_strided_slice %458 {offsets = [0, 0], sizes = [2, 32], strides = [1, 1]} : vector<2x128xf32> to vector<2x32xf32>
    %460 = arith.negf %459 : vector<2x32xf32>
    %461 = math.exp %460 : vector<2x32xf32>
    %cst_122 = arith.constant 1.000000e+00 : f32
    %462 = vector.broadcast %cst_122 : f32 to vector<2x32xf32>
    %463 = arith.addf %462, %461 : vector<2x32xf32>
    %464 = arith.divf %462, %463 : vector<2x32xf32>
    %465 = vector.extract_strided_slice %458 {offsets = [0, 32], sizes = [2, 32], strides = [1, 1]} : vector<2x128xf32> to vector<2x32xf32>
    %466 = arith.negf %465 : vector<2x32xf32>
    %467 = math.exp %466 : vector<2x32xf32>
    %cst_123 = arith.constant 1.000000e+00 : f32
    %468 = vector.broadcast %cst_123 : f32 to vector<2x32xf32>
    %469 = arith.addf %468, %467 : vector<2x32xf32>
    %470 = arith.divf %468, %469 : vector<2x32xf32>
    %471 = vector.extract_strided_slice %458 {offsets = [0, 64], sizes = [2, 32], strides = [1, 1]} : vector<2x128xf32> to vector<2x32xf32>
    %472 = math.tanh %471 : vector<2x32xf32>
    %473 = vector.extract_strided_slice %458 {offsets = [0, 96], sizes = [2, 32], strides = [1, 1]} : vector<2x128xf32> to vector<2x32xf32>
    %474 = arith.negf %473 : vector<2x32xf32>
    %475 = math.exp %474 : vector<2x32xf32>
    %cst_124 = arith.constant 1.000000e+00 : f32
    %476 = vector.broadcast %cst_124 : f32 to vector<2x32xf32>
    %477 = arith.addf %476, %475 : vector<2x32xf32>
    %478 = arith.divf %476, %477 : vector<2x32xf32>
    %479 = arith.mulf %470, %407 : vector<2x32xf32>
    %480 = arith.mulf %464, %472 : vector<2x32xf32>
    %481 = arith.addf %479, %480 : vector<2x32xf32>
    %482 = math.tanh %481 : vector<2x32xf32>
    %483 = arith.mulf %478, %482 : vector<2x32xf32>
    %c7_i32_125 = arith.constant 7 : i32
    %484 = arith.subi %c7_i32_125, %c6_i32 : i32
    %485 = arith.index_cast %484 : i32 to index
    %c0_126 = arith.constant 0 : index
    %c0_127 = arith.constant 0 : index
    %486 = vector.load %arg2[%485, %c0_126, %c0_127] : memref<8x2x128xf32, #tpu.memory_space<vmem>>, vector<1x2x128xf32>
    %487 = vector.shape_cast %486 : vector<1x2x128xf32> to vector<2x128xf32>
    %488 = arith.truncf %441 : vector<2x32xf32> to vector<2x32xbf16>
    %cst_128 = arith.constant dense<0.000000e+00> : vector<2x128xf32>
    %489 = tpu.matmul %488, %4, %cst_128 {dimension_numbers = #tpu.dot_dimension_numbers<[1], [0], [0], [1], [0, 0, 1, 1], [], []>} : vector<2x32xbf16>, vector<32x128xbf16>, vector<2x128xf32> -> vector<2x128xf32>
    %490 = arith.addf %487, %489 : vector<2x128xf32>
    %491 = vector.extract_strided_slice %490 {offsets = [0, 0], sizes = [2, 32], strides = [1, 1]} : vector<2x128xf32> to vector<2x32xf32>
    %492 = arith.negf %491 : vector<2x32xf32>
    %493 = math.exp %492 : vector<2x32xf32>
    %cst_129 = arith.constant 1.000000e+00 : f32
    %494 = vector.broadcast %cst_129 : f32 to vector<2x32xf32>
    %495 = arith.addf %494, %493 : vector<2x32xf32>
    %496 = arith.divf %494, %495 : vector<2x32xf32>
    %497 = vector.extract_strided_slice %490 {offsets = [0, 32], sizes = [2, 32], strides = [1, 1]} : vector<2x128xf32> to vector<2x32xf32>
    %498 = arith.negf %497 : vector<2x32xf32>
    %499 = math.exp %498 : vector<2x32xf32>
    %cst_130 = arith.constant 1.000000e+00 : f32
    %500 = vector.broadcast %cst_130 : f32 to vector<2x32xf32>
    %501 = arith.addf %500, %499 : vector<2x32xf32>
    %502 = arith.divf %500, %501 : vector<2x32xf32>
    %503 = vector.extract_strided_slice %490 {offsets = [0, 64], sizes = [2, 32], strides = [1, 1]} : vector<2x128xf32> to vector<2x32xf32>
    %504 = math.tanh %503 : vector<2x32xf32>
    %505 = vector.extract_strided_slice %490 {offsets = [0, 96], sizes = [2, 32], strides = [1, 1]} : vector<2x128xf32> to vector<2x32xf32>
    %506 = arith.negf %505 : vector<2x32xf32>
    %507 = math.exp %506 : vector<2x32xf32>
    %cst_131 = arith.constant 1.000000e+00 : f32
    %508 = vector.broadcast %cst_131 : f32 to vector<2x32xf32>
    %509 = arith.addf %508, %507 : vector<2x32xf32>
    %510 = arith.divf %508, %509 : vector<2x32xf32>
    %511 = arith.mulf %502, %439 : vector<2x32xf32>
    %512 = arith.mulf %496, %504 : vector<2x32xf32>
    %513 = arith.addf %511, %512 : vector<2x32xf32>
    %514 = math.tanh %513 : vector<2x32xf32>
    %515 = arith.mulf %510, %514 : vector<2x32xf32>
    %516 = arith.truncf %483 : vector<2x32xf32> to vector<2x32xbf16>
    %517 = arith.index_cast %c6_i32 : i32 to index
    %c0_132 = arith.constant 0 : index
    %c0_133 = arith.constant 0 : index
    %518 = vector.load %arg5[%517, %c0_132, %c0_133] : memref<8x2x32xbf16, #tpu.memory_space<vmem>>, vector<1x2x32xbf16>
    %519 = vector.shape_cast %518 : vector<1x2x32xbf16> to vector<2x32xbf16>
    %520 = vector.shape_cast %516 : vector<2x32xbf16> to vector<1x2x32xbf16>
    tpu.vector_store %arg5[%517, %c0_132, %c0_133], %520 {strides = array<i32>} : memref<8x2x32xbf16, #tpu.memory_space<vmem>>, vector<1x2x32xbf16>,
    %521 = arith.truncf %515 : vector<2x32xf32> to vector<2x32xbf16>
    %c7_i32_134 = arith.constant 7 : i32
    %522 = arith.subi %c7_i32_134, %c6_i32 : i32
    %523 = arith.index_cast %522 : i32 to index
    %c0_135 = arith.constant 0 : index
    %c0_136 = arith.constant 0 : index
    %524 = vector.load %arg6[%523, %c0_135, %c0_136] : memref<8x2x32xbf16, #tpu.memory_space<vmem>>, vector<1x2x32xbf16>
    %525 = vector.shape_cast %524 : vector<1x2x32xbf16> to vector<2x32xbf16>
    %526 = vector.shape_cast %521 : vector<2x32xbf16> to vector<1x2x32xbf16>
    tpu.vector_store %arg6[%523, %c0_135, %c0_136], %526 {strides = array<i32>} : memref<8x2x32xbf16, #tpu.memory_space<vmem>>, vector<1x2x32xbf16>,
    %c7_i32_137 = arith.constant 7 : i32
    %527 = arith.index_cast %c7_i32_137 : i32 to index
    %c0_138 = arith.constant 0 : index
    %c0_139 = arith.constant 0 : index
    %528 = vector.load %arg1[%527, %c0_138, %c0_139] : memref<8x2x128xf32, #tpu.memory_space<vmem>>, vector<1x2x128xf32>
    %529 = vector.shape_cast %528 : vector<1x2x128xf32> to vector<2x128xf32>
    %530 = arith.truncf %483 : vector<2x32xf32> to vector<2x32xbf16>
    %cst_140 = arith.constant dense<0.000000e+00> : vector<2x128xf32>
    %531 = tpu.matmul %530, %3, %cst_140 {dimension_numbers = #tpu.dot_dimension_numbers<[1], [0], [0], [1], [0, 0, 1, 1], [], []>} : vector<2x32xbf16>, vector<32x128xbf16>, vector<2x128xf32> -> vector<2x128xf32>
    %532 = arith.addf %529, %531 : vector<2x128xf32>
    %533 = vector.extract_strided_slice %532 {offsets = [0, 0], sizes = [2, 32], strides = [1, 1]} : vector<2x128xf32> to vector<2x32xf32>
    %534 = arith.negf %533 : vector<2x32xf32>
    %535 = math.exp %534 : vector<2x32xf32>
    %cst_141 = arith.constant 1.000000e+00 : f32
    %536 = vector.broadcast %cst_141 : f32 to vector<2x32xf32>
    %537 = arith.addf %536, %535 : vector<2x32xf32>
    %538 = arith.divf %536, %537 : vector<2x32xf32>
    %539 = vector.extract_strided_slice %532 {offsets = [0, 32], sizes = [2, 32], strides = [1, 1]} : vector<2x128xf32> to vector<2x32xf32>
    %540 = arith.negf %539 : vector<2x32xf32>
    %541 = math.exp %540 : vector<2x32xf32>
    %cst_142 = arith.constant 1.000000e+00 : f32
    %542 = vector.broadcast %cst_142 : f32 to vector<2x32xf32>
    %543 = arith.addf %542, %541 : vector<2x32xf32>
    %544 = arith.divf %542, %543 : vector<2x32xf32>
    %545 = vector.extract_strided_slice %532 {offsets = [0, 64], sizes = [2, 32], strides = [1, 1]} : vector<2x128xf32> to vector<2x32xf32>
    %546 = math.tanh %545 : vector<2x32xf32>
    %547 = vector.extract_strided_slice %532 {offsets = [0, 96], sizes = [2, 32], strides = [1, 1]} : vector<2x128xf32> to vector<2x32xf32>
    %548 = arith.negf %547 : vector<2x32xf32>
    %549 = math.exp %548 : vector<2x32xf32>
    %cst_143 = arith.constant 1.000000e+00 : f32
    %550 = vector.broadcast %cst_143 : f32 to vector<2x32xf32>
    %551 = arith.addf %550, %549 : vector<2x32xf32>
    %552 = arith.divf %550, %551 : vector<2x32xf32>
    %553 = arith.mulf %544, %481 : vector<2x32xf32>
    %554 = arith.mulf %538, %546 : vector<2x32xf32>
    %555 = arith.addf %553, %554 : vector<2x32xf32>
    %556 = math.tanh %555 : vector<2x32xf32>
    %557 = arith.mulf %552, %556 : vector<2x32xf32>
    %c7_i32_144 = arith.constant 7 : i32
    %558 = arith.subi %c7_i32_144, %c7_i32_137 : i32
    %559 = arith.index_cast %558 : i32 to index
    %c0_145 = arith.constant 0 : index
    %c0_146 = arith.constant 0 : index
    %560 = vector.load %arg2[%559, %c0_145, %c0_146] : memref<8x2x128xf32, #tpu.memory_space<vmem>>, vector<1x2x128xf32>
    %561 = vector.shape_cast %560 : vector<1x2x128xf32> to vector<2x128xf32>
    %562 = arith.truncf %515 : vector<2x32xf32> to vector<2x32xbf16>
    %cst_147 = arith.constant dense<0.000000e+00> : vector<2x128xf32>
    %563 = tpu.matmul %562, %4, %cst_147 {dimension_numbers = #tpu.dot_dimension_numbers<[1], [0], [0], [1], [0, 0, 1, 1], [], []>} : vector<2x32xbf16>, vector<32x128xbf16>, vector<2x128xf32> -> vector<2x128xf32>
    %564 = arith.addf %561, %563 : vector<2x128xf32>
    %565 = vector.extract_strided_slice %564 {offsets = [0, 0], sizes = [2, 32], strides = [1, 1]} : vector<2x128xf32> to vector<2x32xf32>
    %566 = arith.negf %565 : vector<2x32xf32>
    %567 = math.exp %566 : vector<2x32xf32>
    %cst_148 = arith.constant 1.000000e+00 : f32
    %568 = vector.broadcast %cst_148 : f32 to vector<2x32xf32>
    %569 = arith.addf %568, %567 : vector<2x32xf32>
    %570 = arith.divf %568, %569 : vector<2x32xf32>
    %571 = vector.extract_strided_slice %564 {offsets = [0, 32], sizes = [2, 32], strides = [1, 1]} : vector<2x128xf32> to vector<2x32xf32>
    %572 = arith.negf %571 : vector<2x32xf32>
    %573 = math.exp %572 : vector<2x32xf32>
    %cst_149 = arith.constant 1.000000e+00 : f32
    %574 = vector.broadcast %cst_149 : f32 to vector<2x32xf32>
    %575 = arith.addf %574, %573 : vector<2x32xf32>
    %576 = arith.divf %574, %575 : vector<2x32xf32>
    %577 = vector.extract_strided_slice %564 {offsets = [0, 64], sizes = [2, 32], strides = [1, 1]} : vector<2x128xf32> to vector<2x32xf32>
    %578 = math.tanh %577 : vector<2x32xf32>
    %579 = vector.extract_strided_slice %564 {offsets = [0, 96], sizes = [2, 32], strides = [1, 1]} : vector<2x128xf32> to vector<2x32xf32>
    %580 = arith.negf %579 : vector<2x32xf32>
    %581 = math.exp %580 : vector<2x32xf32>
    %cst_150 = arith.constant 1.000000e+00 : f32
    %582 = vector.broadcast %cst_150 : f32 to vector<2x32xf32>
    %583 = arith.addf %582, %581 : vector<2x32xf32>
    %584 = arith.divf %582, %583 : vector<2x32xf32>
    %585 = arith.mulf %576, %513 : vector<2x32xf32>
    %586 = arith.mulf %570, %578 : vector<2x32xf32>
    %587 = arith.addf %585, %586 : vector<2x32xf32>
    %588 = math.tanh %587 : vector<2x32xf32>
    %589 = arith.mulf %584, %588 : vector<2x32xf32>
    %590 = arith.truncf %557 : vector<2x32xf32> to vector<2x32xbf16>
    %591 = arith.index_cast %c7_i32_137 : i32 to index
    %c0_151 = arith.constant 0 : index
    %c0_152 = arith.constant 0 : index
    %592 = vector.load %arg5[%591, %c0_151, %c0_152] : memref<8x2x32xbf16, #tpu.memory_space<vmem>>, vector<1x2x32xbf16>
    %593 = vector.shape_cast %592 : vector<1x2x32xbf16> to vector<2x32xbf16>
    %594 = vector.shape_cast %590 : vector<2x32xbf16> to vector<1x2x32xbf16>
    tpu.vector_store %arg5[%591, %c0_151, %c0_152], %594 {strides = array<i32>} : memref<8x2x32xbf16, #tpu.memory_space<vmem>>, vector<1x2x32xbf16>,
    %595 = arith.truncf %589 : vector<2x32xf32> to vector<2x32xbf16>
    %c7_i32_153 = arith.constant 7 : i32
    %596 = arith.subi %c7_i32_153, %c7_i32_137 : i32
    %597 = arith.index_cast %596 : i32 to index
    %c0_154 = arith.constant 0 : index
    %c0_155 = arith.constant 0 : index
    %598 = vector.load %arg6[%597, %c0_154, %c0_155] : memref<8x2x32xbf16, #tpu.memory_space<vmem>>, vector<1x2x32xbf16>
    %599 = vector.shape_cast %598 : vector<1x2x32xbf16> to vector<2x32xbf16>
    %600 = vector.shape_cast %595 : vector<2x32xbf16> to vector<1x2x32xbf16>
    tpu.vector_store %arg6[%597, %c0_154, %c0_155], %600 {strides = array<i32>} : memref<8x2x32xbf16, #tpu.memory_space<vmem>>, vector<1x2x32xbf16>,
    %c8_i32 = arith.constant 8 : i32
    %c0_156 = arith.constant 0 : index
    %c0_157 = arith.constant 0 : index
    %601 = vector.load %arg7[%c0_156, %c0_157] : memref<2x32xf32, #tpu.memory_space<vmem>>, vector<2x32xf32>
    tpu.vector_store %arg7[%c0_156, %c0_157], %557 {strides = array<i32>} : memref<2x32xf32, #tpu.memory_space<vmem>>, vector<2x32xf32>,
    %c0_158 = arith.constant 0 : index
    %c0_159 = arith.constant 0 : index
    %602 = vector.load %arg8[%c0_158, %c0_159] : memref<2x32xf32, #tpu.memory_space<vmem>>, vector<2x32xf32>
    tpu.vector_store %arg8[%c0_158, %c0_159], %555 {strides = array<i32>} : memref<2x32xf32, #tpu.memory_space<vmem>>, vector<2x32xf32>,
    %c0_160 = arith.constant 0 : index
    %c0_161 = arith.constant 0 : index
    %603 = vector.load %arg9[%c0_160, %c0_161] : memref<2x32xf32, #tpu.memory_space<vmem>>, vector<2x32xf32>
    tpu.vector_store %arg9[%c0_160, %c0_161], %589 {strides = array<i32>} : memref<2x32xf32, #tpu.memory_space<vmem>>, vector<2x32xf32>,
    %c0_162 = arith.constant 0 : index
    %c0_163 = arith.constant 0 : index
    %604 = vector.load %arg10[%c0_162, %c0_163] : memref<2x32xf32, #tpu.memory_space<vmem>>, vector<2x32xf32>
    tpu.vector_store %arg10[%c0_162, %c0_163], %587 {strides = array<i32>} : memref<2x32xf32, #tpu.memory_space<vmem>>, vector<2x32xf32>,
    return
  }
  func.func @transform_0(%arg0: i32) -> (i32, i32, i32) {
    %c0_i32 = arith.constant 0 : i32
    %c0_i32_0 = arith.constant 0 : i32
    %c0_i32_1 = arith.constant 0 : i32
    return %arg0, %c0_i32, %c0_i32_0 : i32, i32, i32
  }
  func.func @transform_1(%arg0: i32) -> (i32, i32, i32) {
    %c0_i32 = arith.constant 0 : i32
    %0 = arith.subi %c0_i32, %arg0 : i32
    %c0_i32_0 = arith.constant 0 : i32
    %c1_i32 = arith.constant 1 : i32
    %c0_i32_1 = arith.constant 0 : i32
    return %0, %c0_i32_0, %c1_i32 : i32, i32, i32
  }
  func.func @transform_2(%arg0: i32) -> (i32, i32) {
    %c0_i32 = arith.constant 0 : i32
    %c0_i32_0 = arith.constant 0 : i32
    %c0_i32_1 = arith.constant 0 : i32
    return %c0_i32, %c0_i32_0 : i32, i32
  }
  func.func @transform_3(%arg0: i32) -> (i32, i32) {
    %c0_i32 = arith.constant 0 : i32
    %c0_i32_0 = arith.constant 0 : i32
    %c0_i32_1 = arith.constant 0 : i32
    return %c0_i32, %c0_i32_0 : i32, i32
  }
  func.func @transform_4(%arg0: i32) -> (i32, i32, i32) {
    %c0_i32 = arith.constant 0 : i32
    %c0_i32_0 = arith.constant 0 : i32
    %c0_i32_1 = arith.constant 0 : i32
    return %arg0, %c0_i32, %c0_i32_0 : i32, i32, i32
  }
  func.func @transform_5(%arg0: i32) -> (i32, i32, i32) {
    %c0_i32 = arith.constant 0 : i32
    %0 = arith.subi %c0_i32, %arg0 : i32
    %c0_i32_0 = arith.constant 0 : i32
    %c0_i32_1 = arith.constant 0 : i32
    %c0_i32_2 = arith.constant 0 : i32
    return %0, %c0_i32_0, %c0_i32_1 : i32, i32, i32
  }
}

</mosaic_0001>

<bundles_post_ra>
// kernel: protein_lstm_forward.3
= control target key start
LH: loop header
LB: loop body
LE: loop exit
PB: predicated region body
PF: predicated region fallthrough
CT: control target
= control target key end

     0   :  { %vm179_vm0 = vcmask 254976   ;;  %v1595_v4 = vmov 0.0   ;;  %s2002_s0 = inlined_call_operand.vmem [shape: f32[8,2,256], index: 0, kind: input, shape index: {}, may-alias: {0,1}]   ;;  %s2003_s1 = inlined_call_operand.vmem [shape: f32[8,2,256], index: 1, kind: input, shape index: {}, may-alias: {0,1}]   ;;  %s2004_s2 = inlined_call_operand.vmem [shape: bf16[32,128], index: 2, kind: input, shape index: {}]   ;;  %s2005_s3 = inlined_call_operand.vmem [shape: bf16[32,128], index: 3, kind: input, shape index: {}]   ;;  %s2006_s4 = inlined_call_operand.vmem [shape: f32[64,10], index: 4, kind: input, shape index: {}]   ;;  %s2007_s5 = inlined_call_operand.vmem [shape: f32[1,10], index: 5, kind: input, shape index: {}]   ;;  %s2008_s6 = inlined_call_operand.hbm [shape: f32[2,10], index: 6, kind: output, shape index: {}]  }
   0x1   :  { %v1639_v0 = vld [vmem:[%s2004_s2 + $0x8] sm:$0xff]  ;;  %v1649_v2 = vld [vmem:[%s2004_s2] sm:$0xff]  ;;  %180 = vst.msk [vmem:[#allocation2] sm:$0x3] %vm179_vm0, %v1595_v4 }
   0x2   :  { %v1644_v1 = vld [vmem:[%s2005_s3 + $0x8] sm:$0xff]  ;;  %v1654_v3 = vld [vmem:[%s2005_s3] sm:$0xff]  ;;  %224 = vmatpush.bf16.msra.mxu0 %v1639_v0  ;;  %181 = vst.msk [vmem:[#allocation3] sm:$0x3] %vm179_vm0, %v1595_v4 }
   0x3   :  { %v30_v5 = vld [vmem:[%s2002_s0] sm:$0x3]  ;;  %297 = vmatpush.bf16.msra.mxu1 %v1644_v1 }
   0x4   :  { %11 = vsyncpa [#allocation11], 0  ;;  %182 = vst.msk [vmem:[#allocation4] sm:$0x3] %vm179_vm0, %v1595_v4  ;;  %371 = vmatpush.bf16.msra.mxu2 %v1639_v0  ;;  %431 = vmatpush.bf16.msra.mxu3 %v1644_v1  ;;  %vm214_vm1 = vcmask 261120   ;;  %s1596_s2 = smov 32  }
   0x5   :  { %183 = vst.msk [vmem:[#allocation5] sm:$0x3] %vm179_vm0, %v1595_v4  ;;  %v1379_v12 = vld [vmem:[%s2003_s1 + $0x1e] sm:$0x3]  ;;  %s1597_s8 = smov 64   ;;  %s1600_s27 = smov [#allocation10]  }
   0x6   :  { %31 = vst [vmem:[#allocation8] sm:$0x3] %v30_v5  ;;  %225 = vmatpush.bf16.msra.mxu0 %v1649_v2  ;;  %s1349_s28 = sshll.u32 %s1600_s27, 4  ;;  %s1351_s3 = sshll.u32 %s2008_s6, 4  ;;  %s1350_s28 = int_to_ptr.vmem [resolvable:$true] %s1349_s28  ;;  %s1352_s3 = int_to_ptr.hbm [resolvable:$true] %s1351_s3 }
   0x7   :  { %298 = vmatpush.bf16.msra.mxu1 %v1654_v3  ;;  %122 = vst [vmem:[#allocation9 + $0xe] sm:$0x3] %v1379_v12  ;;  %v1378_v12 = vld [vmem:[%s2003_s1 + $0x1a] sm:$0x3] }
   0x8   :  { %372 = vmatpush.bf16.msra.mxu2 %v1649_v2  ;;  %432 = vmatpush.bf16.msra.mxu3 %v1654_v3  ;;  %v194_v6 = vld [vmem:[#allocation2] sm:$0x3]  ;;  %120 = vst [vmem:[#allocation9 + $0xc] sm:$0x3] %v1378_v12  ;;  %v1377_v12 = vld [vmem:[%s2003_s1 + $0x16] sm:$0x3] }
   0x9   :  { %v201_v7 = vpack.c.bf16 %v194_v6, %v194_v6  ;;  %v195_v8 = vld [vmem:[#allocation3] sm:$0x3]  ;;  %118 = vst [vmem:[#allocation9 + $0xa] sm:$0x3] %v1377_v12 }
   0xa   :  { %501 = vmatpush.bf16.msrb.mxu0 %v1639_v0  ;;  %253 = vrot.lane.b32.xlu1 %v195_v8, %s1596_s2 }
   0xb   :  { %561 = vmatpush.bf16.msrb.mxu1 %v1644_v1  ;;  %v196_v9 = vld [vmem:[#allocation4] sm:$0x3]  ;;  %1388 = vmatmul.msk.bf16.vlgmr.msra.gmra.mxu0 %vm214_vm1, %v201_v7 }
   0xc   :  { %691 = vmatpush.bf16.msrb.mxu3 %v1644_v1  ;;  %631 = vmatpush.bf16.msrb.mxu2 %v1639_v0  ;;  %v275_v10 = vpack.c.bf16 %v196_v9, %v196_v9  ;;  %v197_v11 = vld [vmem:[#allocation5] sm:$0x3] }
   0xd   :  { %v200_v13 = vld [vmem:[#allocation8] sm:$0x3] }
   0xe   :  { %502 = vmatpush.bf16.msrb.mxu0 %v1649_v2  ;;  %1398 = vmatmul.msk.bf16.vlgmr.msra.gmra.mxu1 %vm214_vm1, %v275_v10  ;;  %v274_v17 = vld [vmem:[#allocation9 + $0xe] sm:$0x3]  ;;  %v32_v10 = vld [vmem:[%s2002_s0 + $0x4] sm:$0x3] }
   0xf   :  { %562 = vmatpush.bf16.msrb.mxu1 %v1654_v3  ;;  %33 = vst [vmem:[#allocation8 + $0x2] sm:$0x3] %v32_v10 }
  0x10   :  { %632 = vmatpush.bf16.msrb.mxu2 %v1649_v2  ;;  %692 = vmatpush.bf16.msrb.mxu3 %v1654_v3 }
  0x12   :  { %761 = vmatpush.bf16.msra.mxu0 %v1639_v0  ;;  %326 = vrot.lane.b32.xlu1 %v197_v11, %s1596_s2 }
  0x13   :  { %821 = vmatpush.bf16.msra.mxu1 %v1644_v1 }
  0x16   :  { %762 = vmatpush.bf16.msra.mxu0 %v1649_v2 }
  0x17   :  { %822 = vmatpush.bf16.msra.mxu1 %v1654_v3 }
  0x7c   :  { %v254_v53 = vpop.permute.xlu1 %253 }
  0x84   :  { %v327_v57 = vpop.permute.xlu1 %326 }
  0x88   :  { %v227_v14 = vpop.f32.mrf.mxu0 }
  0x89   :  { %v231_v15 = vadd.f32 %v227_v14, %v200_v13  ;;  %v357_v13 = vld [vmem:[#allocation8 + $0x2] sm:$0x3] }
  0x8b   :  { %v300_v16 = vpop.f32.mrf.mxu1  ;;  %1441 = vtanh.f32 %v231_v15  ;;  %v1389_v23 = vmul.f32 -1.442695, %v231_v15 }
  0x8c   :  { %v304_v18 = vadd.f32 %v300_v16, %v274_v17 }
  0x8e   :  { %1443 = vtanh.f32 %v304_v18  ;;  %v1399_v24 = vmul.f32 -1.442695, %v304_v18  ;;  %v417_v18 = vld [vmem:[#allocation9 + $0xc] sm:$0x3] }
  0x8f   :  { %1445 = vpow2.f32 %v1389_v23 }
  0x90   :  { %v229_v19 = vpop.f32.mrf.mxu0  ;;  %1447 = vpow2.f32 %v1399_v24 }
  0x91   :  { %v1442_v20 = vpop.eup %1441 }
  0x92   :  { %258 = vrot.lane.b32.xlu0 %v1442_v20, %s1597_s8 }
  0x93   :  { %v302_v21 = vpop.f32.mrf.mxu1 }
  0x94   :  { %v1444_v22 = vpop.eup %1443 }
  0x95   :  { %v1446_v25 = vpop.eup %1445 }
  0x96   :  { %v235_v26 = vadd.f32 1.0, %v1446_v25  ;;  %v1448_v27 = vpop.eup %1447 }
  0x97   :  { %v308_v28 = vadd.f32 1.0, %v1448_v27 }
  0x98   :  { %1449 = vrcp.f32 %v235_v26  ;;  %v247_v37 = vand.u32 2147483648, %v235_v26  ;;  %vm241_vm3 = vweird.f32 %v235_v26  ;;  %v245_v38 = vand.u32 2147483647, %v235_v26 }
  0x99   :  { %1451 = vrcp.f32 %v308_v28  ;;  %vm314_vm6 = vweird.f32 %v308_v28  ;;  %v320_v46 = vand.u32 2147483648, %v308_v28  ;;  %v318_v47 = vand.u32 2147483647, %v308_v28 }
  0x9a   :  { %331 = vrot.lane.b32.xlu0 %v1444_v22, %s1597_s8  ;;  %v248_v41 = vor.u32 1.1754944e-38, %v247_v37  ;;  %vm246_vm5 = vcmp.eq.f32.partialorder %v245_v38, 8.507059e+37 }
  0x9b   :  { %v321_v49 = vor.u32 1.1754944e-38, %v320_v46  ;;  %vm319_vm9 = vcmp.eq.f32.partialorder %v318_v47, 8.507059e+37 }
  0x9e   :  { %v1450_v29 = vpop.eup %1449 }
  0x9f   :  { %v237_v30 = vmul.f32 %v1450_v29, %v235_v26  ;;  %v1452_v32 = vpop.eup %1451  ;;  %vm242_vm2 = vweird.f32 %v1450_v29 }
  0xa0   :  { %v310_v34 = vmul.f32 %v1452_v32, %v308_v28  ;;  %vm243_vm4 = vmor %vm241_vm3, %vm242_vm2  ;;  %vm315_vm7 = vweird.f32 %v1452_v32 }
  0xa1   :  { %v238_v31 = vsub.f32 1.0, %v237_v30  ;;  %vm316_vm8 = vmor %vm314_vm6, %vm315_vm7 }
  0xa2   :  { %v311_v36 = vsub.f32 1.0, %v310_v34 }
  0xa3   :  { %v239_v33 = vmul.f32 %v1450_v29, %v238_v31 }
  0xa4   :  { %v312_v40 = vmul.f32 %v1452_v32, %v311_v36 }
  0xa5   :  { %v240_v35 = vadd.f32 %v1450_v29, %v239_v33 }
  0xa6   :  { %v313_v44 = vadd.f32 %v1452_v32, %v312_v40 }
  0xa7   :  { %v244_v39 = vsel %vm243_vm4, %v1450_v29, %v240_v35 }
  0xa8   :  { %v249_v42 = vsel %vm246_vm5, %v248_v41, %v244_v39  ;;  %v317_v48 = vsel %vm316_vm8, %v1452_v32, %v313_v44 }
  0xa9   :  { %v322_v50 = vsel %vm319_vm9, %v321_v49, %v317_v48  ;;  %v256_v54 = vmul.f32 %v254_v53, %v249_v42 }
  0xaa   :  { %v329_v58 = vmul.f32 %v327_v57, %v322_v50 }
 0x104   :  { %v259_v43 = vpop.permute.xlu0 %258 }
 0x105   :  { %v261_v45 = vmul.f32 %v259_v43, %v249_v42 }
 0x107   :  { %263 = vrot.lane.b32.xlu2 %v261_v45, %s1596_s2 }
 0x10c   :  { %v332_v51 = vpop.permute.xlu0 %331 }
 0x10d   :  { %v334_v52 = vmul.f32 %v332_v51, %v322_v50 }
 0x10f   :  { %336 = vrot.lane.b32.xlu2 %v334_v52, %s1596_s2 }
 0x161   :  { %v264_v55 = vpop.permute.xlu2 %263 }
 0x162   :  { %v1694_v56 = vadd.f32 %v264_v55, %v256_v54 }
 0x164   :  { %1453 = vtanh.f32 %v1694_v56 }
 0x169   :  { %v337_v59 = vpop.permute.xlu2 %336 }
 0x16a   :  { %v1454_v60 = vpop.eup %1453  ;;  %v1697_v61 = vadd.f32 %v337_v59, %v329_v58 }
 0x16b   :  { %269 = vrot.lane.b32.xlu0 %v1454_v60, %s1597_s8 }
 0x16c   :  { %1455 = vtanh.f32 %v1697_v61 }
 0x172   :  { %v1456_v62 = vpop.eup %1455 }
 0x173   :  { %342 = vrot.lane.b32.xlu1 %v1456_v62, %s1597_s8 }
 0x1dd   :  { %v270_v63 = vpop.permute.xlu0 %269 }
 0x1de   :  { %v1702_v4 = vmul.f32 %v270_v63, %v249_v42 }
 0x1e0   :  { %v358_v5 = vpack.c.bf16 %v1702_v4, %v1702_v4 }
 0x1e2   :  { %360 = vrot.lane.b32.xlu2 %v358_v5, %s1596_s2 }
 0x1e5   :  { %v343_v6 = vpop.permute.xlu1 %342 }
 0x1e6   :  { %v1707_v7 = vmul.f32 %v343_v6, %v322_v50 }
 0x1e8   :  { %v418_v8 = vpack.c.bf16 %v1707_v7, %v1707_v7 }
 0x1ea   :  { %420 = vrot.lane.b32.xlu0 %v418_v8, %s1596_s2 }
 0x23c   :  { %v361_v9 = vpop.permute.xlu2 %360 }
 0x23d   :  { %1400 = vmatmul.msk.bf16.vlgmr.msra.gmra.mxu2 %vm214_vm1, %v361_v9  ;;  %v34_v9 = vld [vmem:[%s2002_s0 + $0x8] sm:$0x3] }
 0x23e   :  { %891 = vmatpush.bf16.msra.mxu2 %v1639_v0  ;;  %35 = vst [vmem:[#allocation8 + $0x4] sm:$0x3] %v34_v9 }
 0x242   :  { %892 = vmatpush.bf16.msra.mxu2 %v1649_v2 }
 0x25c   :  { %v421_v11 = vpop.permute.xlu0 %420 }
 0x25d   :  { %1402 = vmatmul.msk.bf16.vlgmr.msra.gmra.mxu3 %vm214_vm1, %v421_v11 }
 0x25e   :  { %951 = vmatpush.bf16.msra.mxu3 %v1644_v1 }
 0x262   :  { %952 = vmatpush.bf16.msra.mxu3 %v1654_v3 }
 0x2c0   :  { %v374_v14 = vpop.f32.mrf.mxu2 }
 0x2c1   :  { %v378_v15 = vadd.f32 %v374_v14, %v357_v13  ;;  %v487_v13 = vld [vmem:[#allocation8 + $0x4] sm:$0x3] }
 0x2c3   :  { %1457 = vtanh.f32 %v378_v15  ;;  %v1401_v23 = vmul.f32 -1.442695, %v378_v15 }
 0x2c8   :  { %v376_v16 = vpop.f32.mrf.mxu2 }
 0x2c9   :  { %v1458_v17 = vpop.eup %1457  ;;  %v547_v16 = vld [vmem:[#allocation9 + $0xa] sm:$0x3] }
 0x2ca   :  { %401 = vrot.lane.b32.xlu1 %v1458_v17, %s1597_s8 }
 0x2e0   :  { %v434_v19 = vpop.f32.mrf.mxu3 }
 0x2e1   :  { %v438_v20 = vadd.f32 %v434_v19, %v417_v18 }
 0x2e3   :  { %1459 = vtanh.f32 %v438_v20  ;;  %v1403_v24 = vmul.f32 -1.442695, %v438_v20 }
 0x2e4   :  { %1461 = vpow2.f32 %v1401_v23 }
 0x2e5   :  { %1463 = vpow2.f32 %v1403_v24 }
 0x2e8   :  { %v436_v21 = vpop.f32.mrf.mxu3 }
 0x2e9   :  { %v1460_v22 = vpop.eup %1459 }
 0x2ea   :  { %461 = vrot.lane.b32.xlu2 %v1460_v22, %s1597_s8  ;;  %v1462_v25 = vpop.eup %1461 }
 0x2eb   :  { %v382_v26 = vadd.f32 1.0, %v1462_v25  ;;  %v1464_v27 = vpop.eup %1463 }
 0x2ec   :  { %v442_v28 = vadd.f32 1.0, %v1464_v27 }
 0x2ed   :  { %1465 = vrcp.f32 %v382_v26  ;;  %v394_v37 = vand.u32 2147483648, %v382_v26  ;;  %vm388_vm11 = vweird.f32 %v382_v26  ;;  %v392_v38 = vand.u32 2147483647, %v382_v26 }
 0x2ee   :  { %1467 = vrcp.f32 %v442_v28  ;;  %v454_v46 = vand.u32 2147483648, %v442_v28  ;;  %vm448_vm15 = vweird.f32 %v442_v28  ;;  %v452_v47 = vand.u32 2147483647, %v442_v28 }
 0x2ef   :  { %v395_v41 = vor.u32 1.1754944e-38, %v394_v37  ;;  %vm393_vm13 = vcmp.eq.f32.partialorder %v392_v38, 8.507059e+37 }
 0x2f0   :  { %v455_v49 = vor.u32 1.1754944e-38, %v454_v46  ;;  %vm453_vm3 = vcmp.eq.f32.partialorder %v452_v47, 8.507059e+37 }
 0x2f3   :  { %v1466_v29 = vpop.eup %1465 }
 0x2f4   :  { %v384_v30 = vmul.f32 %v1466_v29, %v382_v26  ;;  %v1468_v32 = vpop.eup %1467  ;;  %vm389_vm10 = vweird.f32 %v1466_v29 }
 0x2f5   :  { %v444_v34 = vmul.f32 %v1468_v32, %v442_v28  ;;  %vm390_vm12 = vmor %vm388_vm11, %vm389_vm10  ;;  %vm449_vm14 = vweird.f32 %v1468_v32 }
 0x2f6   :  { %v385_v31 = vsub.f32 1.0, %v384_v30  ;;  %vm450_vm2 = vmor %vm448_vm15, %vm449_vm14 }
 0x2f7   :  { %v445_v36 = vsub.f32 1.0, %v444_v34 }
 0x2f8   :  { %v386_v33 = vmul.f32 %v1466_v29, %v385_v31 }
 0x2f9   :  { %v446_v40 = vmul.f32 %v1468_v32, %v445_v36 }
 0x2fa   :  { %v387_v35 = vadd.f32 %v1466_v29, %v386_v33 }
 0x2fb   :  { %v447_v45 = vadd.f32 %v1468_v32, %v446_v40 }
 0x2fc   :  { %v391_v39 = vsel %vm390_vm12, %v1466_v29, %v387_v35 }
 0x2fd   :  { %v396_v43 = vsel %vm393_vm13, %v395_v41, %v391_v39  ;;  %v451_v48 = vsel %vm450_vm2, %v1468_v32, %v447_v45 }
 0x2fe   :  { %v456_v51 = vsel %vm453_vm3, %v455_v49, %v451_v48  ;;  %v399_v53 = vmul.f32 %v396_v43, %v1694_v56 }
 0x2ff   :  { %v459_v57 = vmul.f32 %v456_v51, %v1697_v61 }
 0x33c   :  { %v402_v42 = vpop.permute.xlu1 %401 }
 0x33d   :  { %v404_v44 = vmul.f32 %v402_v42, %v396_v43 }
 0x33f   :  { %406 = vrot.lane.b32.xlu0 %v404_v44, %s1596_s2 }
 0x344   :  { %v462_v50 = vpop.permute.xlu2 %461 }
 0x345   :  { %v464_v52 = vmul.f32 %v462_v50, %v456_v51 }
 0x347   :  { %466 = vrot.lane.b32.xlu1 %v464_v52, %s1596_s2 }
 0x3b1   :  { %v407_v54 = vpop.permute.xlu0 %406 }
 0x3b2   :  { %v1729_v55 = vadd.f32 %v407_v54, %v399_v53 }
 0x3b4   :  { %1469 = vtanh.f32 %v1729_v55 }
 0x3b9   :  { %v467_v58 = vpop.permute.xlu1 %466 }
 0x3ba   :  { %v1470_v59 = vpop.eup %1469  ;;  %v1733_v60 = vadd.f32 %v467_v58, %v459_v57 }
 0x3bb   :  { %412 = vrot.lane.b32.xlu2 %v1470_v59, %s1597_s8 }
 0x3bc   :  { %1471 = vtanh.f32 %v1733_v60 }
 0x3c2   :  { %v1472_v62 = vpop.eup %1471 }
 0x3c3   :  { %472 = vrot.lane.b32.xlu0 %v1472_v62, %s1597_s8 }
 0x415   :  { %v413_v63 = vpop.permute.xlu2 %412 }
 0x416   :  { %v1738_v56 = vmul.f32 %v413_v63, %v396_v43 }
 0x418   :  { %v488_v5 = vpack.c.bf16 %v1738_v56, %v1738_v56 }
 0x41a   :  { %490 = vrot.lane.b32.xlu1 %v488_v5, %s1596_s2 }
 0x435   :  { %v473_v61 = vpop.permute.xlu0 %472 }
 0x436   :  { %v1743_v6 = vmul.f32 %v473_v61, %v456_v51 }
 0x438   :  { %v548_v8 = vpack.c.bf16 %v1743_v6, %v1743_v6 }
 0x43a   :  { %550 = vrot.lane.b32.xlu2 %v548_v8, %s1596_s2 }
 0x48c   :  { %v491_v10 = vpop.permute.xlu1 %490 }
 0x48d   :  { %1404 = vmatmul.msk.bf16.vlgmr.msrb.gmra.mxu0 %vm214_vm1, %v491_v10 }
 0x48e   :  { %1021 = vmatpush.bf16.msrb.mxu0 %v1639_v0 }
 0x492   :  { %1022 = vmatpush.bf16.msrb.mxu0 %v1649_v2 }
 0x494   :  { %v551_v11 = vpop.permute.xlu2 %550 }
 0x495   :  { %1406 = vmatmul.msk.bf16.vlgmr.msrb.gmra.mxu1 %vm214_vm1, %v551_v11  ;;  %v36_v11 = vld [vmem:[%s2002_s0 + $0xc] sm:$0x3] }
 0x496   :  { %1081 = vmatpush.bf16.msrb.mxu1 %v1644_v1  ;;  %37 = vst [vmem:[#allocation8 + $0x6] sm:$0x3] %v36_v11 }
 0x49a   :  { %1082 = vmatpush.bf16.msrb.mxu1 %v1654_v3 }
 0x50a   :  { %v504_v14 = vpop.f32.mrf.mxu0 }
 0x50b   :  { %v508_v15 = vadd.f32 %v504_v14, %v487_v13  ;;  %v1376_v14 = vld [vmem:[%s2003_s1 + $0x12] sm:$0x3] }
 0x50c   :  { %116 = vst [vmem:[#allocation9 + $0x8] sm:$0x3] %v1376_v14  ;;  %v1375_v14 = vld [vmem:[%s2003_s1 + $0xe] sm:$0x3] }
 0x50d   :  { %1473 = vtanh.f32 %v508_v15  ;;  %v1405_v23 = vmul.f32 -1.442695, %v508_v15  ;;  %v617_v15 = vld [vmem:[#allocation8 + $0x6] sm:$0x3]  ;;  %114 = vst [vmem:[#allocation9 + $0x6] sm:$0x3] %v1375_v14 }
 0x512   :  { %v506_v17 = vpop.f32.mrf.mxu0  ;;  %v564_v18 = vpop.f32.mrf.mxu1 }
 0x513   :  { %v1474_v19 = vpop.eup %1473  ;;  %v568_v20 = vadd.f32 %v564_v18, %v547_v16  ;;  %v677_v18 = vld [vmem:[#allocation9 + $0x8] sm:$0x3] }
 0x514   :  { %531 = vrot.lane.b32.xlu0 %v1474_v19, %s1597_s8 }
 0x515   :  { %1475 = vtanh.f32 %v568_v20  ;;  %v1407_v24 = vmul.f32 -1.442695, %v568_v20 }
 0x516   :  { %1477 = vpow2.f32 %v1405_v23 }
 0x517   :  { %1479 = vpow2.f32 %v1407_v24 }
 0x51a   :  { %v566_v21 = vpop.f32.mrf.mxu1 }
 0x51b   :  { %v1476_v22 = vpop.eup %1475 }
 0x51c   :  { %591 = vrot.lane.b32.xlu1 %v1476_v22, %s1597_s8  ;;  %v1478_v25 = vpop.eup %1477 }
 0x51d   :  { %v512_v26 = vadd.f32 1.0, %v1478_v25  ;;  %v1480_v27 = vpop.eup %1479 }
 0x51e   :  { %v572_v28 = vadd.f32 1.0, %v1480_v27 }
 0x51f   :  { %1481 = vrcp.f32 %v512_v26  ;;  %v524_v37 = vand.u32 2147483648, %v512_v26  ;;  %vm518_vm5 = vweird.f32 %v512_v26  ;;  %v522_v38 = vand.u32 2147483647, %v512_v26 }
 0x520   :  { %1483 = vrcp.f32 %v572_v28  ;;  %v584_v46 = vand.u32 2147483648, %v572_v28  ;;  %vm578_vm9 = vweird.f32 %v572_v28  ;;  %v582_v47 = vand.u32 2147483647, %v572_v28 }
 0x521   :  { %v525_v41 = vor.u32 1.1754944e-38, %v524_v37  ;;  %vm523_vm7 = vcmp.eq.f32.partialorder %v522_v38, 8.507059e+37 }
 0x522   :  { %v585_v49 = vor.u32 1.1754944e-38, %v584_v46  ;;  %vm583_vm11 = vcmp.eq.f32.partialorder %v582_v47, 8.507059e+37 }
 0x525   :  { %v1482_v29 = vpop.eup %1481 }
 0x526   :  { %v514_v30 = vmul.f32 %v1482_v29, %v512_v26  ;;  %v1484_v32 = vpop.eup %1483  ;;  %vm519_vm4 = vweird.f32 %v1482_v29 }
 0x527   :  { %v574_v34 = vmul.f32 %v1484_v32, %v572_v28  ;;  %vm520_vm6 = vmor %vm518_vm5, %vm519_vm4  ;;  %vm579_vm8 = vweird.f32 %v1484_v32 }
 0x528   :  { %v515_v31 = vsub.f32 1.0, %v514_v30  ;;  %vm580_vm10 = vmor %vm578_vm9, %vm579_vm8 }
 0x529   :  { %v575_v36 = vsub.f32 1.0, %v574_v34 }
 0x52a   :  { %v516_v33 = vmul.f32 %v1482_v29, %v515_v31 }
 0x52b   :  { %v576_v40 = vmul.f32 %v1484_v32, %v575_v36 }
 0x52c   :  { %v517_v35 = vadd.f32 %v1482_v29, %v516_v33 }
 0x52d   :  { %v577_v45 = vadd.f32 %v1484_v32, %v576_v40 }
 0x52e   :  { %v521_v39 = vsel %vm520_vm6, %v1482_v29, %v517_v35 }
 0x52f   :  { %v526_v42 = vsel %vm523_vm7, %v525_v41, %v521_v39  ;;  %v581_v48 = vsel %vm580_vm10, %v1484_v32, %v577_v45 }
 0x530   :  { %v586_v51 = vsel %vm583_vm11, %v585_v49, %v581_v48  ;;  %v529_v53 = vmul.f32 %v526_v42, %v1729_v55 }
 0x531   :  { %v589_v59 = vmul.f32 %v586_v51, %v1733_v60 }
 0x586   :  { %v532_v43 = vpop.permute.xlu0 %531 }
 0x587   :  { %v534_v44 = vmul.f32 %v532_v43, %v526_v42 }
 0x589   :  { %536 = vrot.lane.b32.xlu2 %v534_v44, %s1596_s2 }
 0x58e   :  { %v592_v50 = vpop.permute.xlu1 %591 }
 0x58f   :  { %v594_v52 = vmul.f32 %v592_v50, %v586_v51 }
 0x591   :  { %596 = vrot.lane.b32.xlu0 %v594_v52, %s1596_s2 }
 0x5e3   :  { %v537_v54 = vpop.permute.xlu2 %536 }
 0x5e4   :  { %v1765_v57 = vadd.f32 %v537_v54, %v529_v53 }
 0x5e6   :  { %1485 = vtanh.f32 %v1765_v57 }
 0x5ec   :  { %v1486_v58 = vpop.eup %1485 }
 0x5ed   :  { %542 = vrot.lane.b32.xlu1 %v1486_v58, %s1597_s8 }
 0x603   :  { %v597_v62 = vpop.permute.xlu0 %596 }
 0x604   :  { %v1770_v63 = vadd.f32 %v597_v62, %v589_v59 }
 0x606   :  { %1487 = vtanh.f32 %v1770_v63 }
 0x60c   :  { %v1488_v5 = vpop.eup %1487 }
 0x60d   :  { %602 = vrot.lane.b32.xlu2 %v1488_v5, %s1597_s8 }
 0x65f   :  { %v543_v61 = vpop.permute.xlu1 %542 }
 0x660   :  { %v1774_v55 = vmul.f32 %v543_v61, %v526_v42 }
 0x662   :  { %v618_v8 = vpack.c.bf16 %v1774_v55, %v1774_v55 }
 0x664   :  { %620 = vrot.lane.b32.xlu0 %v618_v8, %s1596_s2 }
 0x667   :  { %v603_v9 = vpop.permute.xlu2 %602 }
 0x668   :  { %v1779_v10 = vmul.f32 %v603_v9, %v586_v51 }
 0x66a   :  { %v678_v60 = vpack.c.bf16 %v1779_v10, %v1779_v10 }
 0x66c   :  { %680 = vrot.lane.b32.xlu1 %v678_v60, %s1596_s2 }
 0x6d6   :  { %v621_v12 = vpop.permute.xlu0 %620 }
 0x6d7   :  { %1408 = vmatmul.msk.bf16.vlgmr.msrb.gmra.mxu2 %vm214_vm1, %v621_v12  ;;  %v38_v12 = vld [vmem:[%s2002_s0 + $0x10] sm:$0x3] }
 0x6d8   :  { %1151 = vmatpush.bf16.msrb.mxu2 %v1639_v0  ;;  %39 = vst [vmem:[#allocation8 + $0x8] sm:$0x3] %v38_v12 }
 0x6dc   :  { %1152 = vmatpush.bf16.msrb.mxu2 %v1649_v2 }
 0x6de   :  { %v681_v13 = vpop.permute.xlu1 %680 }
 0x6df   :  { %1410 = vmatmul.msk.bf16.vlgmr.msrb.gmra.mxu3 %vm214_vm1, %v681_v13 }
 0x6e0   :  { %1210 = vmatpush.bf16.msrb.mxu3 %v1644_v1 }
 0x6e4   :  { %1211 = vmatpush.bf16.msrb.mxu3 %v1654_v3 }
 0x75a   :  { %v634_v16 = vpop.f32.mrf.mxu2 }
 0x75b   :  { %v638_v17 = vadd.f32 %v634_v16, %v617_v15  ;;  %v747_v15 = vld [vmem:[#allocation8 + $0x8] sm:$0x3] }
 0x75d   :  { %1489 = vtanh.f32 %v638_v17  ;;  %v1409_v3 = vmul.f32 -1.442695, %v638_v17 }
 0x762   :  { %v636_v0 = vpop.f32.mrf.mxu2  ;;  %v694_v19 = vpop.f32.mrf.mxu3 }
 0x763   :  { %v1490_v2 = vpop.eup %1489  ;;  %v698_v20 = vadd.f32 %v694_v19, %v677_v18  ;;  %v807_v19 = vld [vmem:[#allocation9 + $0x6] sm:$0x3] }
 0x764   :  { %661 = vrot.lane.b32.xlu2 %v1490_v2, %s1597_s8 }
 0x765   :  { %1491 = vtanh.f32 %v698_v20  ;;  %v1411_v27 = vmul.f32 -1.442695, %v698_v20 }
 0x766   :  { %1493 = vpow2.f32 %v1409_v3 }
 0x76a   :  { %v696_v1 = vpop.f32.mrf.mxu3 }
 0x76b   :  { %v1492_v21 = vpop.eup %1491 }
 0x76c   :  { %721 = vrot.lane.b32.xlu0 %v1492_v21, %s1597_s8  ;;  %v1494_v22 = vpop.eup %1493 }
 0x76d   :  { %v642_v23 = vadd.f32 1.0, %v1494_v22 }
 0x76f   :  { %1495 = vrcp.f32 %v642_v23  ;;  %v654_v30 = vand.u32 2147483648, %v642_v23  ;;  %vm648_vm13 = vweird.f32 %v642_v23  ;;  %v652_v31 = vand.u32 2147483647, %v642_v23 }
 0x770   :  { %1497 = vpow2.f32 %v1411_v27 }
 0x771   :  { %v655_v34 = vor.u32 1.1754944e-38, %v654_v30  ;;  %vm653_vm15 = vcmp.eq.f32.partialorder %v652_v31, 8.507059e+37 }
 0x775   :  { %v1496_v24 = vpop.eup %1495 }
 0x776   :  { %v644_v25 = vmul.f32 %v1496_v24, %v642_v23  ;;  %vm649_vm12 = vweird.f32 %v1496_v24  ;;  %v1498_v32 = vpop.eup %1497 }
 0x777   :  { %vm650_vm14 = vmor %vm648_vm13, %vm649_vm12  ;;  %v702_v35 = vadd.f32 1.0, %v1498_v32 }
 0x778   :  { %v645_v26 = vsub.f32 1.0, %v644_v25 }
 0x779   :  { %1499 = vrcp.f32 %v702_v35  ;;  %v714_v44 = vand.u32 2147483648, %v702_v35  ;;  %vm708_vm3 = vweird.f32 %v702_v35  ;;  %v712_v45 = vand.u32 2147483647, %v702_v35 }
 0x77a   :  { %v646_v28 = vmul.f32 %v1496_v24, %v645_v26 }
 0x77b   :  { %v715_v47 = vor.u32 1.1754944e-38, %v714_v44  ;;  %vm713_vm5 = vcmp.eq.f32.partialorder %v712_v45, 8.507059e+37 }
 0x77c   :  { %v647_v29 = vadd.f32 %v1496_v24, %v646_v28 }
 0x77e   :  { %v651_v33 = vsel %vm650_vm14, %v1496_v24, %v647_v29 }
 0x77f   :  { %v656_v37 = vsel %vm653_vm15, %v655_v34, %v651_v33  ;;  %v1500_v39 = vpop.eup %1499 }
 0x780   :  { %v704_v40 = vmul.f32 %v1500_v39, %v702_v35  ;;  %vm709_vm2 = vweird.f32 %v1500_v39  ;;  %v659_v51 = vmul.f32 %v656_v37, %v1765_v57 }
 0x781   :  { %vm710_vm4 = vmor %vm708_vm3, %vm709_vm2 }
 0x782   :  { %v705_v41 = vsub.f32 1.0, %v704_v40 }
 0x784   :  { %v706_v42 = vmul.f32 %v1500_v39, %v705_v41 }
 0x786   :  { %v707_v43 = vadd.f32 %v1500_v39, %v706_v42 }
 0x788   :  { %v711_v46 = vsel %vm710_vm4, %v1500_v39, %v707_v43 }
 0x789   :  { %v716_v48 = vsel %vm713_vm5, %v715_v47, %v711_v46 }
 0x78a   :  { %v719_v54 = vmul.f32 %v716_v48, %v1770_v63 }
 0x7be   :  { %v662_v36 = vpop.permute.xlu2 %661 }
 0x7bf   :  { %v664_v38 = vmul.f32 %v662_v36, %v656_v37 }
 0x7c1   :  { %666 = vrot.lane.b32.xlu1 %v664_v38, %s1596_s2 }
 0x7de   :  { %v722_v49 = vpop.permute.xlu0 %721 }
 0x7df   :  { %v724_v50 = vmul.f32 %v722_v49, %v716_v48 }
 0x7e1   :  { %726 = vrot.lane.b32.xlu2 %v724_v50, %s1596_s2 }
 0x833   :  { %v667_v52 = vpop.permute.xlu1 %666 }
 0x834   :  { %v1801_v53 = vadd.f32 %v667_v52, %v659_v51 }
 0x836   :  { %1501 = vtanh.f32 %v1801_v53 }
 0x83b   :  { %v727_v58 = vpop.permute.xlu2 %726 }
 0x83c   :  { %v1502_v59 = vpop.eup %1501  ;;  %v1805_v62 = vadd.f32 %v727_v58, %v719_v54 }
 0x83d   :  { %672 = vrot.lane.b32.xlu0 %v1502_v59, %s1597_s8 }
 0x83e   :  { %1503 = vtanh.f32 %v1805_v62 }
 0x844   :  { %v1504_v5 = vpop.eup %1503 }
 0x845   :  { %732 = vrot.lane.b32.xlu1 %v1504_v5, %s1597_s8 }
 0x8af   :  { %v673_v61 = vpop.permute.xlu0 %672 }
 0x8b0   :  { %v1810_v57 = vmul.f32 %v673_v61, %v656_v37 }
 0x8b2   :  { %v748_v8 = vpack.c.bf16 %v1810_v57, %v1810_v57 }
 0x8b4   :  { %750 = vrot.lane.b32.xlu2 %v748_v8, %s1596_s2 }
 0x8b7   :  { %v733_v63 = vpop.permute.xlu1 %732 }
 0x8b8   :  { %v1815_v9 = vmul.f32 %v733_v63, %v716_v48 }
 0x8ba   :  { %v808_v60 = vpack.c.bf16 %v1815_v9, %v1815_v9 }
 0x8bc   :  { %810 = vrot.lane.b32.xlu0 %v808_v60, %s1596_s2 }
 0x90e   :  { %v751_v11 = vpop.permute.xlu2 %750 }
 0x90f   :  { %1412 = vmatmul.msk.bf16.vlgmr.msra.gmra.mxu0 %vm214_vm1, %v751_v11 }
 0x92e   :  { %v811_v13 = vpop.permute.xlu0 %810 }
 0x92f   :  { %1414 = vmatmul.msk.bf16.vlgmr.msra.gmra.mxu1 %vm214_vm1, %v811_v13  ;;  %v40_v13 = vld [vmem:[%s2002_s0 + $0x14] sm:$0x3] }
 0x930   :  { %41 = vst [vmem:[#allocation8 + $0xa] sm:$0x3] %v40_v13 }
 0x98c   :  { %v764_v16 = vpop.f32.mrf.mxu0 }
 0x98d   :  { %v768_v17 = vadd.f32 %v764_v16, %v747_v15  ;;  %v1374_v16 = vld [vmem:[%s2003_s1 + $0xa] sm:$0x3] }
 0x98e   :  { %112 = vst [vmem:[#allocation9 + $0x4] sm:$0x3] %v1374_v16 }
 0x98f   :  { %1505 = vtanh.f32 %v768_v17  ;;  %v1413_v3 = vmul.f32 -1.442695, %v768_v17  ;;  %v877_v17 = vld [vmem:[#allocation8 + $0xa] sm:$0x3] }
 0x994   :  { %v766_v18 = vpop.f32.mrf.mxu0 }
 0x995   :  { %v1506_v0 = vpop.eup %1505 }
 0x996   :  { %791 = vrot.lane.b32.xlu1 %v1506_v0, %s1597_s8 }
 0x9ac   :  { %v824_v2 = vpop.f32.mrf.mxu1 }
 0x9ad   :  { %v828_v20 = vadd.f32 %v824_v2, %v807_v19  ;;  %v937_v19 = vld [vmem:[#allocation9 + $0x4] sm:$0x3] }
 0x9af   :  { %1507 = vtanh.f32 %v828_v20  ;;  %v1415_v22 = vmul.f32 -1.442695, %v828_v20 }
 0x9b0   :  { %1509 = vpow2.f32 %v1413_v3 }
 0x9b1   :  { %1511 = vpow2.f32 %v1415_v22 }
 0x9b4   :  { %v826_v1 = vpop.f32.mrf.mxu1 }
 0x9b5   :  { %v1508_v21 = vpop.eup %1507 }
 0x9b6   :  { %851 = vrot.lane.b32.xlu2 %v1508_v21, %s1597_s8  ;;  %v1510_v23 = vpop.eup %1509 }
 0x9b7   :  { %v772_v24 = vadd.f32 1.0, %v1510_v23  ;;  %v1512_v25 = vpop.eup %1511 }
 0x9b8   :  { %v832_v26 = vadd.f32 1.0, %v1512_v25 }
 0x9b9   :  { %1513 = vrcp.f32 %v772_v24  ;;  %v784_v35 = vand.u32 2147483648, %v772_v24  ;;  %vm778_vm7 = vweird.f32 %v772_v24  ;;  %v782_v36 = vand.u32 2147483647, %v772_v24 }
 0x9ba   :  { %1515 = vrcp.f32 %v832_v26  ;;  %v844_v44 = vand.u32 2147483648, %v832_v26  ;;  %vm838_vm11 = vweird.f32 %v832_v26  ;;  %v842_v45 = vand.u32 2147483647, %v832_v26 }
 0x9bb   :  { %v785_v39 = vor.u32 1.1754944e-38, %v784_v35  ;;  %vm783_vm9 = vcmp.eq.f32.partialorder %v782_v36, 8.507059e+37 }
 0x9bc   :  { %v845_v47 = vor.u32 1.1754944e-38, %v844_v44  ;;  %vm843_vm13 = vcmp.eq.f32.partialorder %v842_v45, 8.507059e+37 }
 0x9bf   :  { %v1514_v27 = vpop.eup %1513 }
 0x9c0   :  { %v774_v28 = vmul.f32 %v1514_v27, %v772_v24  ;;  %v1516_v30 = vpop.eup %1515  ;;  %vm779_vm6 = vweird.f32 %v1514_v27 }
 0x9c1   :  { %v834_v32 = vmul.f32 %v1516_v30, %v832_v26  ;;  %vm780_vm8 = vmor %vm778_vm7, %vm779_vm6  ;;  %vm839_vm10 = vweird.f32 %v1516_v30 }
 0x9c2   :  { %v775_v29 = vsub.f32 1.0, %v774_v28  ;;  %vm840_vm12 = vmor %vm838_vm11, %vm839_vm10 }
 0x9c3   :  { %v835_v34 = vsub.f32 1.0, %v834_v32 }
 0x9c4   :  { %v776_v31 = vmul.f32 %v1514_v27, %v775_v29 }
 0x9c5   :  { %v836_v38 = vmul.f32 %v1516_v30, %v835_v34 }
 0x9c6   :  { %v777_v33 = vadd.f32 %v1514_v27, %v776_v31 }
 0x9c7   :  { %v837_v43 = vadd.f32 %v1516_v30, %v836_v38 }
 0x9c8   :  { %v781_v37 = vsel %vm780_vm8, %v1514_v27, %v777_v33 }
 0x9c9   :  { %v786_v41 = vsel %vm783_vm9, %v785_v39, %v781_v37  ;;  %v841_v46 = vsel %vm840_vm12, %v1516_v30, %v837_v43 }
 0x9ca   :  { %v846_v49 = vsel %vm843_vm13, %v845_v47, %v841_v46  ;;  %v789_v51 = vmul.f32 %v786_v41, %v1801_v53 }
 0x9cb   :  { %v849_v58 = vmul.f32 %v846_v49, %v1805_v62 }
 0xa08   :  { %v792_v40 = vpop.permute.xlu1 %791 }
 0xa09   :  { %v794_v42 = vmul.f32 %v792_v40, %v786_v41 }
 0xa0b   :  { %796 = vrot.lane.b32.xlu0 %v794_v42, %s1596_s2 }
 0xa10   :  { %v852_v48 = vpop.permute.xlu2 %851 }
 0xa11   :  { %v854_v50 = vmul.f32 %v852_v48, %v846_v49 }
 0xa13   :  { %856 = vrot.lane.b32.xlu1 %v854_v50, %s1596_s2 }
 0xa7d   :  { %v797_v52 = vpop.permute.xlu0 %796 }
 0xa7e   :  { %v1833_v54 = vadd.f32 %v797_v52, %v789_v51 }
 0xa80   :  { %1517 = vtanh.f32 %v1833_v54 }
 0xa85   :  { %v857_v59 = vpop.permute.xlu1 %856 }
 0xa86   :  { %v1518_v5 = vpop.eup %1517  ;;  %v1837_v61 = vadd.f32 %v857_v59, %v849_v58 }
 0xa87   :  { %802 = vrot.lane.b32.xlu2 %v1518_v5, %s1597_s8 }
 0xa88   :  { %1519 = vtanh.f32 %v1837_v61 }
 0xa8e   :  { %v1520_v8 = vpop.eup %1519 }
 0xa8f   :  { %862 = vrot.lane.b32.xlu0 %v1520_v8, %s1597_s8 }
 0xae1   :  { %v803_v63 = vpop.permute.xlu2 %802 }
 0xae2   :  { %v1842_v53 = vmul.f32 %v803_v63, %v786_v41 }
 0xae4   :  { %v878_v60 = vpack.c.bf16 %v1842_v53, %v1842_v53 }
 0xae6   :  { %880 = vrot.lane.b32.xlu1 %v878_v60, %s1596_s2 }
 0xb01   :  { %v863_v62 = vpop.permute.xlu0 %862 }
 0xb02   :  { %v1847_v11 = vmul.f32 %v863_v62, %v846_v49 }
 0xb04   :  { %v938_v12 = vpack.c.bf16 %v1847_v11, %v1847_v11 }
 0xb06   :  { %940 = vrot.lane.b32.xlu2 %v938_v12, %s1596_s2 }
 0xb58   :  { %v881_v14 = vpop.permute.xlu1 %880 }
 0xb59   :  { %1416 = vmatmul.msk.bf16.vlgmr.msra.gmra.mxu2 %vm214_vm1, %v881_v14 }
 0xb60   :  { %v941_v15 = vpop.permute.xlu2 %940 }
 0xb61   :  { %1418 = vmatmul.msk.bf16.vlgmr.msra.gmra.mxu3 %vm214_vm1, %v941_v15 }
 0xbdc   :  { %v894_v18 = vpop.f32.mrf.mxu2 }
 0xbdd   :  { %v898_v0 = vadd.f32 %v894_v18, %v877_v17  ;;  %v42_v17 = vld [vmem:[%s2002_s0 + $0x18] sm:$0x3] }
 0xbde   :  { %43 = vst [vmem:[#allocation8 + $0xc] sm:$0x3] %v42_v17 }
 0xbdf   :  { %1521 = vtanh.f32 %v898_v0  ;;  %v1417_v23 = vmul.f32 -1.442695, %v898_v0 }
 0xbe4   :  { %v896_v2 = vpop.f32.mrf.mxu2  ;;  %v954_v20 = vpop.f32.mrf.mxu3 }
 0xbe5   :  { %v1522_v1 = vpop.eup %1521  ;;  %v958_v21 = vadd.f32 %v954_v20, %v937_v19  ;;  %v1373_v19 = vld [vmem:[%s2003_s1 + $0x6] sm:$0x3]  ;;  %v1007_v2 = vld [vmem:[#allocation8 + $0xc] sm:$0x3] }
 0xbe6   :  { %921 = vrot.lane.b32.xlu0 %v1522_v1, %s1597_s8  ;;  %110 = vst [vmem:[#allocation9 + $0x2] sm:$0x3] %v1373_v19 }
 0xbe7   :  { %1523 = vtanh.f32 %v958_v21  ;;  %v1419_v24 = vmul.f32 -1.442695, %v958_v21 }
 0xbe8   :  { %1525 = vpow2.f32 %v1417_v23 }
 0xbe9   :  { %1527 = vpow2.f32 %v1419_v24 }
 0xbec   :  { %v956_v3 = vpop.f32.mrf.mxu3 }
 0xbed   :  { %v1524_v22 = vpop.eup %1523  ;;  %v1067_v21 = vld [vmem:[#allocation9 + $0x2] sm:$0x3] }
 0xbee   :  { %981 = vrot.lane.b32.xlu1 %v1524_v22, %s1597_s8  ;;  %v1526_v25 = vpop.eup %1525 }
 0xbef   :  { %v902_v26 = vadd.f32 1.0, %v1526_v25  ;;  %v1528_v27 = vpop.eup %1527 }
 0xbf0   :  { %v962_v28 = vadd.f32 1.0, %v1528_v27 }
 0xbf1   :  { %1529 = vrcp.f32 %v902_v26  ;;  %v914_v37 = vand.u32 2147483648, %v902_v26  ;;  %vm908_vm15 = vweird.f32 %v902_v26  ;;  %v912_v38 = vand.u32 2147483647, %v902_v26 }
 0xbf2   :  { %1531 = vrcp.f32 %v962_v28  ;;  %v974_v46 = vand.u32 2147483648, %v962_v28  ;;  %vm968_vm5 = vweird.f32 %v962_v28  ;;  %v972_v47 = vand.u32 2147483647, %v962_v28 }
 0xbf3   :  { %v915_v41 = vor.u32 1.1754944e-38, %v914_v37  ;;  %vm913_vm3 = vcmp.eq.f32.partialorder %v912_v38, 8.507059e+37 }
 0xbf4   :  { %v975_v49 = vor.u32 1.1754944e-38, %v974_v46  ;;  %vm973_vm7 = vcmp.eq.f32.partialorder %v972_v47, 8.507059e+37 }
 0xbf7   :  { %v1530_v29 = vpop.eup %1529 }
 0xbf8   :  { %v904_v30 = vmul.f32 %v1530_v29, %v902_v26  ;;  %v1532_v32 = vpop.eup %1531  ;;  %vm909_vm14 = vweird.f32 %v1530_v29 }
 0xbf9   :  { %v964_v34 = vmul.f32 %v1532_v32, %v962_v28  ;;  %vm910_vm2 = vmor %vm908_vm15, %vm909_vm14  ;;  %vm969_vm4 = vweird.f32 %v1532_v32 }
 0xbfa   :  { %v905_v31 = vsub.f32 1.0, %v904_v30  ;;  %vm970_vm6 = vmor %vm968_vm5, %vm969_vm4 }
 0xbfb   :  { %v965_v36 = vsub.f32 1.0, %v964_v34 }
 0xbfc   :  { %v906_v33 = vmul.f32 %v1530_v29, %v905_v31 }
 0xbfd   :  { %v966_v40 = vmul.f32 %v1532_v32, %v965_v36 }
 0xbfe   :  { %v907_v35 = vadd.f32 %v1530_v29, %v906_v33 }
 0xbff   :  { %v967_v45 = vadd.f32 %v1532_v32, %v966_v40 }
 0xc00   :  { %v911_v39 = vsel %vm910_vm2, %v1530_v29, %v907_v35 }
 0xc01   :  { %v916_v42 = vsel %vm913_vm3, %v915_v41, %v911_v39  ;;  %v971_v48 = vsel %vm970_vm6, %v1532_v32, %v967_v45 }
 0xc02   :  { %v976_v51 = vsel %vm973_vm7, %v975_v49, %v971_v48  ;;  %v919_v58 = vmul.f32 %v916_v42, %v1833_v54 }
 0xc03   :  { %v979_v63 = vmul.f32 %v976_v51, %v1837_v61 }
 0xc58   :  { %v922_v43 = vpop.permute.xlu0 %921 }
 0xc59   :  { %v924_v44 = vmul.f32 %v922_v43, %v916_v42 }
 0xc5b   :  { %926 = vrot.lane.b32.xlu2 %v924_v44, %s1596_s2 }
 0xc60   :  { %v982_v50 = vpop.permute.xlu1 %981 }
 0xc61   :  { %v984_v52 = vmul.f32 %v982_v50, %v976_v51 }
 0xc63   :  { %986 = vrot.lane.b32.xlu0 %v984_v52, %s1596_s2 }
 0xcb5   :  { %v927_v59 = vpop.permute.xlu2 %926 }
 0xcb6   :  { %v1865_v5 = vadd.f32 %v927_v59, %v919_v58 }
 0xcb8   :  { %1533 = vtanh.f32 %v1865_v5 }
 0xcbe   :  { %v1534_v8 = vpop.eup %1533 }
 0xcbf   :  { %932 = vrot.lane.b32.xlu1 %v1534_v8, %s1597_s8 }
 0xcd5   :  { %v987_v60 = vpop.permute.xlu0 %986 }
 0xcd6   :  { %v1870_v62 = vadd.f32 %v987_v60, %v979_v63 }
 0xcd8   :  { %1535 = vtanh.f32 %v1870_v62 }
 0xcde   :  { %v1536_v12 = vpop.eup %1535 }
 0xcdf   :  { %992 = vrot.lane.b32.xlu2 %v1536_v12, %s1597_s8 }
 0xd31   :  { %v933_v13 = vpop.permute.xlu1 %932 }
 0xd32   :  { %v1874_v54 = vmul.f32 %v933_v13, %v916_v42 }
 0xd34   :  { %v1008_v14 = vpack.c.bf16 %v1874_v54, %v1874_v54 }
 0xd36   :  { %1010 = vrot.lane.b32.xlu0 %v1008_v14, %s1596_s2 }
 0xd39   :  { %v993_v15 = vpop.permute.xlu2 %992 }
 0xd3a   :  { %v1879_v16 = vmul.f32 %v993_v15, %v976_v51 }
 0xd3c   :  { %v1068_v61 = vpack.c.bf16 %v1879_v16, %v1879_v16 }
 0xd3e   :  { %1070 = vrot.lane.b32.xlu1 %v1068_v61, %s1596_s2 }
 0xda8   :  { %v1011_v18 = vpop.permute.xlu0 %1010 }
 0xda9   :  { %1420 = vmatmul.msk.bf16.vlgmr.msrb.gmra.mxu0 %vm214_vm1, %v1011_v18 }
 0xdb0   :  { %v1071_v0 = vpop.permute.xlu1 %1070 }
 0xdb1   :  { %1422 = vmatmul.msk.bf16.vlgmr.msrb.gmra.mxu1 %vm214_vm1, %v1071_v0 }
 0xe26   :  { %v1024_v20 = vpop.f32.mrf.mxu0 }
 0xe27   :  { %v1028_v1 = vadd.f32 %v1024_v20, %v1007_v2 }
 0xe29   :  { %1537 = vtanh.f32 %v1028_v1  ;;  %v1421_v27 = vmul.f32 -1.442695, %v1028_v1 }
 0xe2e   :  { %v1026_v3 = vpop.f32.mrf.mxu0  ;;  %v1084_v22 = vpop.f32.mrf.mxu1 }
 0xe2f   :  { %v1538_v23 = vpop.eup %1537  ;;  %v1088_v24 = vadd.f32 %v1084_v22, %v1067_v21  ;;  %v44_v21 = vld [vmem:[%s2002_s0 + $0x1c] sm:$0x3]  ;;  %v1372_v22 = vld [vmem:[%s2003_s1 + $0x2] sm:$0x3]  ;;  %s1599_s0 = smov 96  }
 0xe30   :  { %1051 = vrot.lane.b32.xlu2 %v1538_v23, %s1597_s8  ;;  %45 = vst [vmem:[#allocation8 + $0xe] sm:$0x3] %v44_v21 }
 0xe31   :  { %1539 = vtanh.f32 %v1088_v24  ;;  %v1423_v33 = vmul.f32 -1.442695, %v1088_v24  ;;  %108 = vst [vmem:[#allocation9] sm:$0x3] %v1372_v22 }
 0xe32   :  { %1541 = vpow2.f32 %v1421_v27 }
 0xe36   :  { %v1086_v25 = vpop.f32.mrf.mxu1 }
 0xe37   :  { %v1540_v26 = vpop.eup %1539  ;;  %v1137_v23 = vld [vmem:[#allocation8 + $0xe] sm:$0x3] }
 0xe38   :  { %1111 = vrot.lane.b32.xlu0 %v1540_v26, %s1597_s8  ;;  %v1542_v28 = vpop.eup %1541 }
 0xe39   :  { %v1032_v29 = vadd.f32 1.0, %v1542_v28  ;;  %v1196_v28 = vld [vmem:[#allocation9] sm:$0x3] }
 0xe3b   :  { %1543 = vrcp.f32 %v1032_v29  ;;  %v1044_v36 = vand.u32 2147483648, %v1032_v29  ;;  %vm1038_vm9 = vweird.f32 %v1032_v29  ;;  %v1042_v37 = vand.u32 2147483647, %v1032_v29 }
 0xe3c   :  { %1545 = vpow2.f32 %v1423_v33 }
 0xe3d   :  { %v1045_v40 = vor.u32 1.1754944e-38, %v1044_v36  ;;  %vm1043_vm11 = vcmp.eq.f32.partialorder %v1042_v37, 8.507059e+37 }
 0xe41   :  { %v1544_v30 = vpop.eup %1543 }
 0xe42   :  { %v1034_v31 = vmul.f32 %v1544_v30, %v1032_v29  ;;  %vm1039_vm8 = vweird.f32 %v1544_v30  ;;  %v1546_v38 = vpop.eup %1545 }
 0xe43   :  { %vm1040_vm10 = vmor %vm1038_vm9, %vm1039_vm8  ;;  %v1092_v41 = vadd.f32 1.0, %v1546_v38 }
 0xe44   :  { %v1035_v32 = vsub.f32 1.0, %v1034_v31 }
 0xe45   :  { %1547 = vrcp.f32 %v1092_v41  ;;  %v1104_v50 = vand.u32 2147483648, %v1092_v41  ;;  %vm1098_vm13 = vweird.f32 %v1092_v41  ;;  %v1102_v51 = vand.u32 2147483647, %v1092_v41 }
 0xe46   :  { %v1036_v34 = vmul.f32 %v1544_v30, %v1035_v32 }
 0xe47   :  { %v1105_v58 = vor.u32 1.1754944e-38, %v1104_v50  ;;  %vm1103_vm15 = vcmp.eq.f32.partialorder %v1102_v51, 8.507059e+37 }
 0xe48   :  { %v1037_v35 = vadd.f32 %v1544_v30, %v1036_v34 }
 0xe4a   :  { %v1041_v39 = vsel %vm1040_vm10, %v1544_v30, %v1037_v35  ;;  %vm1342_vm10 = vcmask 74752  }
 0xe4b   :  { %v1046_v43 = vsel %vm1043_vm11, %v1045_v40, %v1041_v39  ;;  %v1548_v45 = vpop.eup %1547 }
 0xe4c   :  { %v1094_v46 = vmul.f32 %v1548_v45, %v1092_v41  ;;  %vm1099_vm12 = vweird.f32 %v1548_v45  ;;  %v1049_v60 = vmul.f32 %v1046_v43, %v1865_v5 }
 0xe4d   :  { %vm1100_vm14 = vmor %vm1098_vm13, %vm1099_vm12 }
 0xe4e   :  { %v1095_v47 = vsub.f32 1.0, %v1094_v46 }
 0xe50   :  { %v1096_v48 = vmul.f32 %v1548_v45, %v1095_v47 }
 0xe52   :  { %v1097_v49 = vadd.f32 %v1548_v45, %v1096_v48 }
 0xe54   :  { %v1101_v52 = vsel %vm1100_vm14, %v1548_v45, %v1097_v49 }
 0xe55   :  { %v1106_v59 = vsel %vm1103_vm15, %v1105_v58, %v1101_v52 }
 0xe56   :  { %v1109_v14 = vmul.f32 %v1106_v59, %v1870_v62 }
 0xe8a   :  { %v1052_v42 = vpop.permute.xlu2 %1051 }
 0xe8b   :  { %v1054_v44 = vmul.f32 %v1052_v42, %v1046_v43 }
 0xe8d   :  { %1056 = vrot.lane.b32.xlu1 %v1054_v44, %s1596_s2 }
 0xeaa   :  { %v1112_v8 = vpop.permute.xlu0 %1111 }
 0xeab   :  { %v1114_v63 = vmul.f32 %v1112_v8, %v1106_v59 }
 0xead   :  { %1116 = vrot.lane.b32.xlu2 %v1114_v63, %s1596_s2 }
 0xeff   :  { %v1057_v12 = vpop.permute.xlu1 %1056 }
 0xf00   :  { %v1897_v13 = vadd.f32 %v1057_v12, %v1049_v60 }
 0xf02   :  { %1549 = vtanh.f32 %v1897_v13 }
 0xf07   :  { %v1117_v15 = vpop.permute.xlu2 %1116 }
 0xf08   :  { %v1550_v61 = vpop.eup %1549  ;;  %v1901_v17 = vadd.f32 %v1117_v15, %v1109_v14 }
 0xf09   :  { %1062 = vrot.lane.b32.xlu0 %v1550_v61, %s1597_s8 }
 0xf0a   :  { %1551 = vtanh.f32 %v1901_v17 }
 0xf10   :  { %v1552_v18 = vpop.eup %1551 }
 0xf11   :  { %1122 = vrot.lane.b32.xlu1 %v1552_v18, %s1597_s8 }
 0xf7b   :  { %v1063_v0 = vpop.permute.xlu0 %1062 }
 0xf7c   :  { %v1906_v5 = vmul.f32 %v1063_v0, %v1046_v43  ;;  %v1598_v0 = vmov -inf  }
 0xf7d   :  { %184 = vst.msk [vmem:[#allocation6] sm:$0x3] %vm179_vm0, %v1598_v0 }
 0xf7e   :  { %v1138_v19 = vpack.c.bf16 %v1906_v5, %v1906_v5  ;;  %185 = vst.msk [vmem:[#allocation7] sm:$0x3] %vm179_vm0, %v1598_v0 }
 0xf80   :  { %1140 = vrot.lane.b32.xlu2 %v1138_v19, %s1596_s2 }
 0xf83   :  { %v1123_v62 = vpop.permute.xlu1 %1122 }
 0xf84   :  { %v1911_v2 = vmul.f32 %v1123_v62, %v1106_v59 }
 0xf85   :  { %v199_v21 = vld [vmem:[#allocation7] sm:$0x3] }
 0xf86   :  { %v1197_v20 = vpack.c.bf16 %v1911_v2, %v1911_v2 }
 0xf88   :  { %1199 = vrot.lane.b32.xlu0 %v1197_v20, %s1596_s2 }
 0xfda   :  { %v1141_v1 = vpop.permute.xlu2 %1140 }
 0xfdb   :  { %1424 = vmatmul.msk.bf16.vlgmr.msrb.gmra.mxu2 %vm214_vm1, %v1141_v1 }
 0xffa   :  { %v1200_v3 = vpop.permute.xlu0 %1199 }
 0xffb   :  { %1426 = vmatmul.msk.bf16.vlgmr.msrb.gmra.mxu3 %vm214_vm1, %v1200_v3 }
0x105e   :  { %v1154_v24 = vpop.f32.mrf.mxu2 }
0x105f   :  { %v1158_v25 = vadd.f32 %v1154_v24, %v1137_v23  ;;  %v198_v23 = vld [vmem:[#allocation6] sm:$0x3] }
0x1061   :  { %1553 = vtanh.f32 %v1158_v25  ;;  %v1425_v33 = vmul.f32 -1.442695, %v1158_v25 }
0x1066   :  { %v1156_v26 = vpop.f32.mrf.mxu2 }
0x1067   :  { %v1554_v27 = vpop.eup %1553 }
0x1068   :  { %1181 = vrot.lane.b32.xlu1 %v1554_v27, %s1597_s8 }
0x107e   :  { %v1213_v29 = vpop.f32.mrf.mxu3 }
0x107f   :  { %v1217_v30 = vadd.f32 %v1213_v29, %v1196_v28 }
0x1081   :  { %1555 = vtanh.f32 %v1217_v30  ;;  %v1427_v34 = vmul.f32 -1.442695, %v1217_v30 }
0x1082   :  { %1557 = vpow2.f32 %v1425_v33 }
0x1083   :  { %1559 = vpow2.f32 %v1427_v34 }
0x1086   :  { %v1215_v31 = vpop.f32.mrf.mxu3 }
0x1087   :  { %v1556_v32 = vpop.eup %1555 }
0x1088   :  { %1240 = vrot.lane.b32.xlu2 %v1556_v32, %s1597_s8  ;;  %v1558_v35 = vpop.eup %1557 }
0x1089   :  { %v1162_v36 = vadd.f32 1.0, %v1558_v35  ;;  %v1560_v37 = vpop.eup %1559 }
0x108a   :  { %v1221_v38 = vadd.f32 1.0, %v1560_v37 }
0x108b   :  { %1561 = vrcp.f32 %v1162_v36  ;;  %v1174_v47 = vand.u32 2147483648, %v1162_v36  ;;  %vm1168_vm3 = vweird.f32 %v1162_v36  ;;  %v1172_v48 = vand.u32 2147483647, %v1162_v36 }
0x108c   :  { %1563 = vrcp.f32 %v1221_v38  ;;  %v1233_v63 = vand.u32 2147483648, %v1221_v38  ;;  %vm1227_vm7 = vweird.f32 %v1221_v38  ;;  %v1231_v60 = vand.u32 2147483647, %v1221_v38 }
0x108d   :  { %v1175_v51 = vor.u32 1.1754944e-38, %v1174_v47  ;;  %vm1173_vm5 = vcmp.eq.f32.partialorder %v1172_v48, 8.507059e+37  ;;  %v1288_v47 = vld [vmem:[%s2006_s4 + $0x28] sm:$0xff]  ;;  %v1287_v48 = vld [vmem:[%s2006_s4 + $0x20] sm:$0xff] }
0x108e   :  { %v1234_v14 = vor.u32 1.1754944e-38, %v1233_v63  ;;  %vm1232_vm9 = vcmp.eq.f32.partialorder %v1231_v60, 8.507059e+37  ;;  %v1440_v63 = vld [vmem:[%s2007_s5] ss:$0 sm:$0xff] }
0x1091   :  { %v1562_v39 = vpop.eup %1561 }
0x1092   :  { %v1164_v40 = vmul.f32 %v1562_v39, %v1162_v36  ;;  %v1564_v42 = vpop.eup %1563  ;;  %vm1169_vm2 = vweird.f32 %v1562_v39 }
0x1093   :  { %v1223_v44 = vmul.f32 %v1564_v42, %v1221_v38  ;;  %vm1170_vm4 = vmor %vm1168_vm3, %vm1169_vm2  ;;  %vm1228_vm6 = vweird.f32 %v1564_v42 }
0x1094   :  { %v1165_v41 = vsub.f32 1.0, %v1164_v40  ;;  %vm1229_vm8 = vmor %vm1227_vm7, %vm1228_vm6 }
0x1095   :  { %v1224_v46 = vsub.f32 1.0, %v1223_v44  ;;  %v1283_v44 = vld [vmem:[%s2006_s4] sm:$0xff] }
0x1096   :  { %v1166_v43 = vmul.f32 %v1562_v39, %v1165_v41 }
0x1097   :  { %v1225_v50 = vmul.f32 %v1564_v42, %v1224_v46  ;;  %v1289_v46 = vld [vmem:[%s2006_s4 + $0x30] sm:$0xff] }
0x1098   :  { %v1167_v45 = vadd.f32 %v1562_v39, %v1166_v43 }
0x1099   :  { %v1226_v8 = vadd.f32 %v1564_v42, %v1225_v50 }
0x109a   :  { %v1171_v49 = vsel %vm1170_vm4, %v1562_v39, %v1167_v45  ;;  %v1290_v45 = vld [vmem:[%s2006_s4 + $0x38] sm:$0xff] }
0x109b   :  { %v1176_v58 = vsel %vm1173_vm5, %v1175_v51, %v1171_v49  ;;  %v1230_v12 = vsel %vm1229_vm8, %v1564_v42, %v1226_v8  ;;  %1306 = vmatpush.msra.mxu0 %v1290_v45 }
0x109c   :  { %v1235_v61 = vsel %vm1232_vm9, %v1234_v14, %v1230_v12  ;;  %v1179_v19 = vmul.f32 %v1176_v58, %v1897_v13 }
0x109d   :  { %1307 = vmatpush.msra.mxu0 %v1289_v46 }
0x109f   :  { %1308 = vmatpush.msra.mxu0 %v1288_v47 }
0x10a1   :  { %1309 = vmatpush.msra.mxu0 %v1287_v48 }
0x10da   :  { %v1182_v52 = vpop.permute.xlu1 %1181 }
0x10db   :  { %v1184_v59 = vmul.f32 %v1182_v52, %v1176_v58 }
0x10dd   :  { %1186 = vrot.lane.b32.xlu0 %v1184_v59, %s1596_s2 }
0x10e2   :  { %v1241_v15 = vpop.permute.xlu2 %1240 }
0x10e3   :  { %v1243_v18 = vmul.f32 %v1241_v15, %v1235_v61 }
0x10e5   :  { %1245 = vrot.lane.b32.xlu1 %v1243_v18, %s1596_s2 }
0x10ed   :  { %347 = vrot.lane.b32.xlu1 %v1702_v4, %s1596_s2 }
0x10f5   :  { %482 = vrot.lane.b32.xlu1 %v1743_v6, %s1596_s2  ;;  %v1238_v6 = vmul.f32 %v1235_v61, %v1901_v17 }
0x10fd   :  { %737 = vrot.lane.b32.xlu1 %v1810_v57, %s1596_s2 }
0x1105   :  { %872 = vrot.lane.b32.xlu1 %v1847_v11, %s1596_s2 }
0x110d   :  { %1127 = vrot.lane.b32.xlu1 %v1906_v5, %s1596_s2  ;;  %v1285_v5 = vld [vmem:[%s2006_s4 + $0x10] sm:$0xff] }
0x114f   :  { %v1187_v4 = vpop.permute.xlu0 %1186 }
0x1150   :  { %v1189_v62 = vadd.f32 %v1187_v4, %v1179_v19 }
0x1152   :  { %1565 = vtanh.f32 %v1189_v62 }
0x1157   :  { %v1246_v20 = vpop.permute.xlu1 %1245 }
0x1158   :  { %v1566_v57 = vpop.eup %1565  ;;  %v1248_v1 = vadd.f32 %v1246_v20, %v1238_v6 }
0x1159   :  { %1192 = vrot.lane.b32.xlu2 %v1566_v57, %s1597_s8 }
0x115a   :  { %1567 = vtanh.f32 %v1248_v1 }
0x1160   :  { %v1568_v11 = vpop.eup %1567 }
0x1161   :  { %1251 = vrot.lane.b32.xlu0 %v1568_v11, %s1597_s8  ;;  %352 = vrot.lane.b32.xlu2 %v1707_v7, %s1596_s2 }
0x1169   :  { %477 = vrot.lane.b32.xlu0 %v1738_v56, %s1596_s2  ;;  %607 = vrot.lane.b32.xlu2 %v1774_v55, %s1596_s2 }
0x1171   :  { %612 = vrot.lane.b32.xlu0 %v1779_v10, %s1596_s2  ;;  %742 = vrot.lane.b32.xlu2 %v1815_v9, %s1596_s2 }
0x1179   :  { %867 = vrot.lane.b32.xlu0 %v1842_v53, %s1596_s2  ;;  %997 = vrot.lane.b32.xlu2 %v1874_v54, %s1596_s2  ;;  %v348_v53 = vpop.permute.xlu1 %347 }
0x117a   :  { %v350_v26 = vmax.f32 %v198_v23, %v348_v53 }
0x1181   :  { %1002 = vrot.lane.b32.xlu0 %v1879_v16, %s1596_s2  ;;  %1132 = vrot.lane.b32.xlu2 %v1911_v2, %s1596_s2  ;;  %v1286_v16 = vld [vmem:[%s2006_s4 + $0x18] sm:$0xff]  ;;  %v1284_v2 = vld [vmem:[%s2006_s4 + $0x8] sm:$0xff]  ;;  %v483_v24 = vpop.permute.xlu1 %482 }
0x1182   :  { %1329 = vmatpush.msra.mxu1 %v1286_v16 }
0x1184   :  { %1330 = vmatpush.msra.mxu1 %v1285_v5 }
0x1186   :  { %1331 = vmatpush.msra.mxu1 %v1284_v2 }
0x1188   :  { %1332 = vmatpush.msra.mxu1 %v1283_v44 }
0x1189   :  { %1268 = vrot.lane.b32.xlu2 %v1189_v62, %s1599_s0  ;;  %v738_v34 = vpop.permute.xlu1 %737 }
0x1191   :  { %v873_v39 = vpop.permute.xlu1 %872 }
0x1199   :  { %v1128_v49 = vpop.permute.xlu1 %1127 }
0x11b3   :  { %v1193_v7 = vpop.permute.xlu2 %1192 }
0x11b4   :  { %v1195_v56 = vmul.f32 %v1193_v7, %v1176_v58 }
0x11b6   :  { %1256 = vrot.lane.b32.xlu0 %v1195_v56, %s1596_s2 }
0x11bb   :  { %v353_v55 = vpop.permute.xlu2 %352 }
0x11bc   :  { %v355_v25 = vmax.f32 %v199_v21, %v353_v55 }
0x11be   :  { %1274 = vrot.lane.b32.xlu0 %v1248_v1, %s1599_s0  ;;  %v485_v28 = vmax.f32 %v355_v25, %v483_v24 }
0x11c3   :  { %v608_v10 = vpop.permute.xlu2 %607 }
0x11cb   :  { %v743_v9 = vpop.permute.xlu2 %742 }
0x11d3   :  { %v998_v13 = vpop.permute.xlu2 %997  ;;  %v1252_v17 = vpop.permute.xlu0 %1251 }
0x11d4   :  { %v1254_v54 = vmul.f32 %v1252_v17, %v1235_v61 }
0x11d6   :  { %1261 = vrot.lane.b32.xlu1 %v1254_v54, %s1596_s2 }
0x11db   :  { %v1133_v3 = vpop.permute.xlu2 %1132  ;;  %v478_v22 = vpop.permute.xlu0 %477 }
0x11dc   :  { %v480_v27 = vmax.f32 %v350_v26, %v478_v22 }
0x11de   :  { %v610_v32 = vmax.f32 %v480_v27, %v608_v10 }
0x11e0   :  { %v740_v35 = vmax.f32 %v610_v32, %v738_v34 }
0x11e3   :  { %v1269_v29 = vpop.permute.xlu2 %1268  ;;  %v613_v30 = vpop.permute.xlu0 %612 }
0x11e4   :  { %1271 = vst.msk [vmem:[#allocation3] sm:$0x3] %vm179_vm0, %v1269_v29  ;;  %v615_v31 = vmax.f32 %v485_v28, %v613_v30 }
0x11e6   :  { %v745_v33 = vmax.f32 %v615_v31, %v743_v9 }
0x11e8   :  { %v875_v40 = vmax.f32 %v745_v33, %v873_v39 }
0x11eb   :  { %v868_v36 = vpop.permute.xlu0 %867 }
0x11ec   :  { %v870_v37 = vmax.f32 %v740_v35, %v868_v36 }
0x11ee   :  { %v1000_v38 = vmax.f32 %v870_v37, %v998_v13 }
0x11f0   :  { %v1130_v50 = vmax.f32 %v1000_v38, %v1128_v49 }
0x11f3   :  { %v1003_v41 = vpop.permute.xlu0 %1002 }
0x11f4   :  { %v1005_v42 = vmax.f32 %v875_v40, %v1003_v41 }
0x11f6   :  { %v1135_v43 = vmax.f32 %v1005_v42, %v1133_v3 }
0x1228   :  { %v1257_v51 = vpop.permute.xlu0 %1256 }
0x1229   :  { %v1259_v52 = vmax.f32 %v1130_v50, %v1257_v51  ;;  %1266 = vst.msk [vmem:[#allocation2] sm:$0x3] %vm179_vm0, %v1257_v51 }
0x122b   :  { %1278 = vst.msk [vmem:[#allocation6] sm:$0x3] %vm179_vm0, %v1259_v52  ;;  %1429 = vmatmul.msk.f32.vlgmr.msra.gmra.mxu1 %vm214_vm1, %v1259_v52 }
0x1230   :  { %v1275_v58 = vpop.permute.xlu0 %1274 }
0x1231   :  { %1277 = vst.msk [vmem:[#allocation5] sm:$0x3] %vm179_vm0, %v1275_v58 }
0x1248   :  { %v1262_v59 = vpop.permute.xlu1 %1261 }
0x1249   :  { %v1264_v8 = vmax.f32 %v1135_v43, %v1262_v59  ;;  %1272 = vst.msk [vmem:[#allocation4] sm:$0x3] %vm179_vm0, %v1262_v59 }
0x124b   :  { %1279 = vst.msk [vmem:[#allocation7] sm:$0x3] %vm179_vm0, %v1264_v8  ;;  %1428 = vmatmul.msk.f32.vlgmr.msra.gmra.mxu0 %vm214_vm1, %v1264_v8 }
0x12a8   :  { %v1334_v60 = vpop.f32.mrf.mxu1 }
0x12c8   :  { %v1311_v12 = vpop.f32.mrf.mxu0 }
0x12c9   :  { %v1335_v14 = vadd.f32 %v1334_v60, %v1311_v12 }
0x12cb   :  { %v1341_v15 = vadd.f32 %v1440_v63, %v1335_v14 }
0x12cd   :  { %1343 = vst.msk [vmem:[#allocation10] sm:$0x3] %vm1342_vm10, %v1341_v15 }
0x12ce   :  { %1354 = dma.vmem_to_hbm [thread:$0]  %s1350_s28, 32, %s1352_s3, [#allocation11]  }
0x12cf   :  { %1593 = dma.done.wait [#allocation11], 32  }
0x12d0   :  { %1594 = vsyncadd [#allocation11], 4294967264 }
0x12d1   :  { %1359 = vsyncpa [#allocation11], 1 }

// kernel: protein_lstm_forward.2
= control target key start
LH: loop header
LB: loop body
LE: loop exit
PB: predicated region body
PF: predicated region fallthrough
CT: control target
= control target key end

     0   :  { %vm186_vm0 = vcmask 254976   ;;  %v1643_v2 = vmov 0.0   ;;  %vm217_vm1 = vcmask 261120   ;;  %s1645_s29 = smov 64   ;;  %s1646_s19 = smov 96   ;;  %s2099_s0 = inlined_call_operand.vmem [shape: f32[8,2,256], index: 0, kind: input, shape index: {}, may-alias: {0,1}]   ;;  %s2100_s1 = inlined_call_operand.vmem [shape: f32[8,2,256], index: 1, kind: input, shape index: {}, may-alias: {0,1}]   ;;  %s2101_s2 = inlined_call_operand.vmem [shape: bf16[32,128], index: 2, kind: input, shape index: {}]   ;;  %s2102_s3 = inlined_call_operand.vmem [shape: bf16[32,128], index: 3, kind: input, shape index: {}]   ;;  %s2103_s4 = inlined_call_operand.vmem [shape: bf16[8,2,32], index: 4, kind: output, shape index: {0}]   ;;  %s2104_s5 = inlined_call_operand.vmem [shape: bf16[8,2,32], index: 5, kind: output, shape index: {1}]  }
   0x1   :  { %v1680_v0 = vld [vmem:[%s2101_s2 + $0x8] sm:$0xff]  ;;  %187 = vst.msk [vmem:[#allocation2] sm:$0x3] %vm186_vm0, %v1643_v2  ;;  %v1693_v3 = vld [vmem:[%s2101_s2] sm:$0xff]  ;;  %s1644_s2 = smov 32  }
   0x2   :  { %v1685_v1 = vld [vmem:[%s2102_s3 + $0x8] sm:$0xff]  ;;  %227 = vmatpush.bf16.msra.mxu0 %v1680_v0  ;;  %v1698_v4 = vld [vmem:[%s2102_s3] sm:$0xff]  ;;  %188 = vst.msk [vmem:[#allocation3] sm:$0x3] %vm186_vm0, %v1643_v2  ;;  %389 = vmatpush.bf16.msra.mxu2 %v1680_v0  ;;  %v1444_v12 = vld [vmem:[%s2100_s1 + $0x1e] sm:$0x3] }
   0x3   :  { %300 = vmatpush.bf16.msra.mxu1 %v1685_v1  ;;  %v29_v5 = vld [vmem:[%s2099_s0] sm:$0x3]  ;;  %189 = vst.msk [vmem:[#allocation4] sm:$0x3] %vm186_vm0, %v1643_v2  ;;  %449 = vmatpush.bf16.msra.mxu3 %v1685_v1 }
   0x4   :  { %190 = vst.msk [vmem:[#allocation5] sm:$0x3] %vm186_vm0, %v1643_v2 }
   0x5   :  { %30 = vst [vmem:[#allocation6] sm:$0x3] %v29_v5 }
   0x6   :  { %228 = vmatpush.bf16.msra.mxu0 %v1693_v3  ;;  %390 = vmatpush.bf16.msra.mxu2 %v1693_v3  ;;  %121 = vst [vmem:[#allocation7 + $0xe] sm:$0x3] %v1444_v12 }
   0x7   :  { %301 = vmatpush.bf16.msra.mxu1 %v1698_v4  ;;  %450 = vmatpush.bf16.msra.mxu3 %v1698_v4 }
   0x8   :  { %v199_v6 = vld [vmem:[#allocation2] sm:$0x3] }
   0x9   :  { %v204_v7 = vpack.c.bf16 %v199_v6, %v199_v6  ;;  %v200_v8 = vld [vmem:[#allocation3] sm:$0x3] }
   0xa   :  { %533 = vmatpush.bf16.msrb.mxu0 %v1680_v0  ;;  %677 = vmatpush.bf16.msrb.mxu2 %v1680_v0  ;;  %v201_v9 = vld [vmem:[#allocation4] sm:$0x3] }
   0xb   :  { %593 = vmatpush.bf16.msrb.mxu1 %v1685_v1  ;;  %737 = vmatpush.bf16.msrb.mxu3 %v1685_v1  ;;  %v278_v10 = vpack.c.bf16 %v201_v9, %v201_v9  ;;  %v202_v11 = vld [vmem:[#allocation5] sm:$0x3] }
   0xc   :  { %256 = vrot.lane.b32.xlu1 %v200_v8, %s1644_s2  ;;  %1453 = vmatmul.msk.bf16.vlgmr.msra.gmra.mxu0 %vm217_vm1, %v204_v7  ;;  %v203_v13 = vld [vmem:[#allocation6] sm:$0x3] }
   0xd   :  { %1463 = vmatmul.msk.bf16.vlgmr.msra.gmra.mxu1 %vm217_vm1, %v278_v10  ;;  %v277_v17 = vld [vmem:[#allocation7 + $0xe] sm:$0x3] }
   0xe   :  { %534 = vmatpush.bf16.msrb.mxu0 %v1693_v3  ;;  %678 = vmatpush.bf16.msrb.mxu2 %v1693_v3 }
   0xf   :  { %594 = vmatpush.bf16.msrb.mxu1 %v1698_v4  ;;  %738 = vmatpush.bf16.msrb.mxu3 %v1698_v4 }
  0x12   :  { %821 = vmatpush.bf16.msra.mxu0 %v1680_v0 }
  0x13   :  { %881 = vmatpush.bf16.msra.mxu1 %v1685_v1 }
  0x14   :  { %329 = vrot.lane.b32.xlu1 %v202_v11, %s1644_s2 }
  0x16   :  { %822 = vmatpush.bf16.msra.mxu0 %v1693_v3 }
  0x17   :  { %882 = vmatpush.bf16.msra.mxu1 %v1698_v4 }
  0x7e   :  { %v257_v53 = vpop.permute.xlu1 %256 }
  0x86   :  { %v330_v57 = vpop.permute.xlu1 %329 }
  0x89   :  { %v230_v14 = vpop.f32.mrf.mxu0 }
  0x8a   :  { %v234_v15 = vadd.f32 %v230_v14, %v203_v13  ;;  %v303_v16 = vpop.f32.mrf.mxu1  ;;  %v31_v14 = vld [vmem:[%s2099_s0 + $0x4] sm:$0x3] }
  0x8b   :  { %v307_v18 = vadd.f32 %v303_v16, %v277_v17  ;;  %32 = vst [vmem:[#allocation6 + $0x2] sm:$0x3] %v31_v14  ;;  %v1443_v16 = vld [vmem:[%s2100_s1 + $0x1a] sm:$0x3] }
  0x8c   :  { %1515 = vtanh.f32 %v234_v15  ;;  %v1454_v23 = vmul.f32 -1.442695, %v234_v15  ;;  %119 = vst [vmem:[#allocation7 + $0xc] sm:$0x3] %v1443_v16 }
  0x8d   :  { %1517 = vtanh.f32 %v307_v18  ;;  %v1464_v24 = vmul.f32 -1.442695, %v307_v18 }
  0x8e   :  { %1519 = vpow2.f32 %v1454_v23 }
  0x8f   :  { %1521 = vpow2.f32 %v1464_v24 }
  0x91   :  { %v232_v19 = vpop.f32.mrf.mxu0 }
  0x92   :  { %v1516_v20 = vpop.eup %1515  ;;  %v305_v21 = vpop.f32.mrf.mxu1  ;;  %v375_v17 = vld [vmem:[#allocation6 + $0x2] sm:$0x3] }
  0x93   :  { %261 = vrot.lane.b32.xlu0 %v1516_v20, %s1645_s29  ;;  %v1518_v22 = vpop.eup %1517 }
  0x94   :  { %v1520_v25 = vpop.eup %1519 }
  0x95   :  { %v238_v26 = vadd.f32 1.0, %v1520_v25  ;;  %v1522_v27 = vpop.eup %1521 }
  0x96   :  { %v311_v28 = vadd.f32 1.0, %v1522_v27 }
  0x97   :  { %1523 = vrcp.f32 %v238_v26  ;;  %v250_v37 = vand.u32 2147483648, %v238_v26  ;;  %vm244_vm3 = vweird.f32 %v238_v26  ;;  %v248_v38 = vand.u32 2147483647, %v238_v26 }
  0x98   :  { %1525 = vrcp.f32 %v311_v28  ;;  %vm317_vm6 = vweird.f32 %v311_v28  ;;  %v323_v46 = vand.u32 2147483648, %v311_v28  ;;  %v321_v47 = vand.u32 2147483647, %v311_v28 }
  0x99   :  { %v251_v41 = vor.u32 1.1754944e-38, %v250_v37  ;;  %vm249_vm5 = vcmp.eq.f32.partialorder %v248_v38, 8.507059e+37 }
  0x9a   :  { %v324_v49 = vor.u32 1.1754944e-38, %v323_v46  ;;  %vm322_vm9 = vcmp.eq.f32.partialorder %v321_v47, 8.507059e+37 }
  0x9b   :  { %334 = vrot.lane.b32.xlu0 %v1518_v22, %s1645_s29  ;;  %v435_v22 = vld [vmem:[#allocation7 + $0xc] sm:$0x3] }
  0x9d   :  { %v1524_v29 = vpop.eup %1523 }
  0x9e   :  { %v240_v30 = vmul.f32 %v1524_v29, %v238_v26  ;;  %v1526_v32 = vpop.eup %1525  ;;  %vm245_vm2 = vweird.f32 %v1524_v29 }
  0x9f   :  { %v313_v34 = vmul.f32 %v1526_v32, %v311_v28  ;;  %vm246_vm4 = vmor %vm244_vm3, %vm245_vm2  ;;  %vm318_vm7 = vweird.f32 %v1526_v32 }
  0xa0   :  { %v241_v31 = vsub.f32 1.0, %v240_v30  ;;  %vm319_vm8 = vmor %vm317_vm6, %vm318_vm7 }
  0xa1   :  { %v314_v36 = vsub.f32 1.0, %v313_v34 }
  0xa2   :  { %v242_v33 = vmul.f32 %v1524_v29, %v241_v31 }
  0xa3   :  { %v315_v40 = vmul.f32 %v1526_v32, %v314_v36 }
  0xa4   :  { %v243_v35 = vadd.f32 %v1524_v29, %v242_v33 }
  0xa5   :  { %v316_v44 = vadd.f32 %v1526_v32, %v315_v40 }
  0xa6   :  { %v247_v39 = vsel %vm246_vm4, %v1524_v29, %v243_v35 }
  0xa7   :  { %v252_v42 = vsel %vm249_vm5, %v251_v41, %v247_v39  ;;  %v320_v48 = vsel %vm319_vm8, %v1526_v32, %v316_v44 }
  0xa8   :  { %v325_v50 = vsel %vm322_vm9, %v324_v49, %v320_v48  ;;  %v259_v54 = vmul.f32 %v257_v53, %v252_v42 }
  0xa9   :  { %v332_v58 = vmul.f32 %v330_v57, %v325_v50 }
 0x105   :  { %v262_v43 = vpop.permute.xlu0 %261 }
 0x106   :  { %v264_v45 = vmul.f32 %v262_v43, %v252_v42 }
 0x108   :  { %266 = vrot.lane.b32.xlu2 %v264_v45, %s1644_s2 }
 0x10d   :  { %v335_v51 = vpop.permute.xlu0 %334 }
 0x10e   :  { %v337_v52 = vmul.f32 %v335_v51, %v325_v50 }
 0x110   :  { %339 = vrot.lane.b32.xlu2 %v337_v52, %s1644_s2 }
 0x162   :  { %v267_v55 = vpop.permute.xlu2 %266 }
 0x163   :  { %v1735_v56 = vadd.f32 %v267_v55, %v259_v54 }
 0x165   :  { %1527 = vtanh.f32 %v1735_v56 }
 0x16a   :  { %v340_v59 = vpop.permute.xlu2 %339 }
 0x16b   :  { %v1528_v60 = vpop.eup %1527  ;;  %v1738_v61 = vadd.f32 %v340_v59, %v332_v58 }
 0x16c   :  { %272 = vrot.lane.b32.xlu0 %v1528_v60, %s1645_s29 }
 0x16d   :  { %1529 = vtanh.f32 %v1738_v61 }
 0x173   :  { %v1530_v62 = vpop.eup %1529 }
 0x174   :  { %345 = vrot.lane.b32.xlu1 %v1530_v62, %s1645_s29 }
 0x1de   :  { %v273_v63 = vpop.permute.xlu0 %272 }
 0x1df   :  { %v275_v2 = vmul.f32 %v273_v63, %v252_v42 }
 0x1e1   :  { %v1743_v5 = vpack.c.bf16 %v275_v2, %v275_v2 }
 0x1e3   :  { %v376_v6 = vunpack.c.l.b16 %v1743_v5 }
 0x1e5   :  { %v377_v7 = vpack.c.b16 %v376_v6, %v376_v6 }
 0x1e6   :  { %v346_v8 = vpop.permute.xlu1 %345 }
 0x1e7   :  { %v348_v9 = vmul.f32 %v346_v8, %v325_v50  ;;  %378 = vrot.lane.b32.xlu2 %v377_v7, %s1644_s2 }
 0x1e9   :  { %v1747_v10 = vpack.c.bf16 %v348_v9, %v348_v9 }
 0x1eb   :  { %v436_v11 = vunpack.c.l.b16 %v1747_v10 }
 0x1ed   :  { %v437_v12 = vpack.c.b16 %v436_v11, %v436_v11 }
 0x1ef   :  { %438 = vrot.lane.b32.xlu0 %v437_v12, %s1644_s2 }
 0x241   :  { %v379_v13 = vpop.permute.xlu2 %378 }
 0x242   :  { %1466 = vmatmul.msk.bf16.vlgmr.msra.gmra.mxu2 %vm217_vm1, %v379_v13 }
 0x243   :  { %965 = vmatpush.bf16.msra.mxu2 %v1680_v0 }
 0x247   :  { %966 = vmatpush.bf16.msra.mxu2 %v1693_v3 }
 0x261   :  { %v439_v15 = vpop.permute.xlu0 %438 }
 0x262   :  { %1468 = vmatmul.msk.bf16.vlgmr.msra.gmra.mxu3 %vm217_vm1, %v439_v15 }
 0x263   :  { %1025 = vmatpush.bf16.msra.mxu3 %v1685_v1 }
 0x267   :  { %1026 = vmatpush.bf16.msra.mxu3 %v1698_v4 }
 0x2c5   :  { %v392_v18 = vpop.f32.mrf.mxu2 }
 0x2c6   :  { %v396_v19 = vadd.f32 %v392_v18, %v375_v17  ;;  %v33_v17 = vld [vmem:[%s2099_s0 + $0x8] sm:$0x3] }
 0x2c7   :  { %34 = vst [vmem:[#allocation6 + $0x4] sm:$0x3] %v33_v17 }
 0x2c8   :  { %1531 = vtanh.f32 %v396_v19  ;;  %v1467_v27 = vmul.f32 -1.442695, %v396_v19 }
 0x2cd   :  { %v394_v20 = vpop.f32.mrf.mxu2 }
 0x2ce   :  { %v1532_v21 = vpop.eup %1531  ;;  %v1442_v20 = vld [vmem:[%s2100_s1 + $0x16] sm:$0x3] }
 0x2cf   :  { %419 = vrot.lane.b32.xlu1 %v1532_v21, %s1645_s29  ;;  %117 = vst [vmem:[#allocation7 + $0xa] sm:$0x3] %v1442_v20  ;;  %v519_v21 = vld [vmem:[#allocation6 + $0x4] sm:$0x3] }
 0x2e5   :  { %v452_v23 = vpop.f32.mrf.mxu3 }
 0x2e6   :  { %v456_v24 = vadd.f32 %v452_v23, %v435_v22 }
 0x2e8   :  { %1533 = vtanh.f32 %v456_v24  ;;  %v1469_v28 = vmul.f32 -1.442695, %v456_v24  ;;  %v579_v24 = vld [vmem:[#allocation7 + $0xa] sm:$0x3] }
 0x2e9   :  { %1535 = vpow2.f32 %v1467_v27 }
 0x2ea   :  { %1537 = vpow2.f32 %v1469_v28 }
 0x2ed   :  { %v454_v25 = vpop.f32.mrf.mxu3 }
 0x2ee   :  { %v1534_v26 = vpop.eup %1533 }
 0x2ef   :  { %479 = vrot.lane.b32.xlu2 %v1534_v26, %s1645_s29  ;;  %v1536_v29 = vpop.eup %1535 }
 0x2f0   :  { %v400_v30 = vadd.f32 1.0, %v1536_v29  ;;  %v1538_v31 = vpop.eup %1537 }
 0x2f1   :  { %v460_v32 = vadd.f32 1.0, %v1538_v31 }
 0x2f2   :  { %1539 = vrcp.f32 %v400_v30  ;;  %v412_v41 = vand.u32 2147483648, %v400_v30  ;;  %vm406_vm11 = vweird.f32 %v400_v30  ;;  %v410_v42 = vand.u32 2147483647, %v400_v30 }
 0x2f3   :  { %1541 = vrcp.f32 %v460_v32  ;;  %v472_v50 = vand.u32 2147483648, %v460_v32  ;;  %vm466_vm15 = vweird.f32 %v460_v32  ;;  %v470_v51 = vand.u32 2147483647, %v460_v32 }
 0x2f4   :  { %v413_v45 = vor.u32 1.1754944e-38, %v412_v41  ;;  %vm411_vm13 = vcmp.eq.f32.partialorder %v410_v42, 8.507059e+37 }
 0x2f5   :  { %v473_v53 = vor.u32 1.1754944e-38, %v472_v50  ;;  %vm471_vm3 = vcmp.eq.f32.partialorder %v470_v51, 8.507059e+37 }
 0x2f8   :  { %v1540_v33 = vpop.eup %1539 }
 0x2f9   :  { %v402_v34 = vmul.f32 %v1540_v33, %v400_v30  ;;  %v1542_v36 = vpop.eup %1541  ;;  %vm407_vm10 = vweird.f32 %v1540_v33 }
 0x2fa   :  { %v462_v38 = vmul.f32 %v1542_v36, %v460_v32  ;;  %vm408_vm12 = vmor %vm406_vm11, %vm407_vm10  ;;  %vm467_vm14 = vweird.f32 %v1542_v36 }
 0x2fb   :  { %v403_v35 = vsub.f32 1.0, %v402_v34  ;;  %vm468_vm2 = vmor %vm466_vm15, %vm467_vm14 }
 0x2fc   :  { %v463_v40 = vsub.f32 1.0, %v462_v38 }
 0x2fd   :  { %v404_v37 = vmul.f32 %v1540_v33, %v403_v35 }
 0x2fe   :  { %v464_v44 = vmul.f32 %v1542_v36, %v463_v40 }
 0x2ff   :  { %v405_v39 = vadd.f32 %v1540_v33, %v404_v37 }
 0x300   :  { %v465_v49 = vadd.f32 %v1542_v36, %v464_v44 }
 0x301   :  { %v409_v43 = vsel %vm408_vm12, %v1540_v33, %v405_v39 }
 0x302   :  { %v414_v47 = vsel %vm411_vm13, %v413_v45, %v409_v43  ;;  %v469_v52 = vsel %vm468_vm2, %v1542_v36, %v465_v49 }
 0x303   :  { %v474_v55 = vsel %vm471_vm3, %v473_v53, %v469_v52  ;;  %v417_v58 = vmul.f32 %v414_v47, %v1735_v56 }
 0x304   :  { %v477_v62 = vmul.f32 %v474_v55, %v1738_v61 }
 0x341   :  { %v420_v46 = vpop.permute.xlu1 %419 }
 0x342   :  { %v422_v48 = vmul.f32 %v420_v46, %v414_v47 }
 0x344   :  { %424 = vrot.lane.b32.xlu0 %v422_v48, %s1644_s2 }
 0x349   :  { %v480_v54 = vpop.permute.xlu2 %479 }
 0x34a   :  { %v482_v57 = vmul.f32 %v480_v54, %v474_v55 }
 0x34c   :  { %484 = vrot.lane.b32.xlu1 %v482_v57, %s1644_s2 }
 0x3b6   :  { %v425_v59 = vpop.permute.xlu0 %424 }
 0x3b7   :  { %v1768_v60 = vadd.f32 %v425_v59, %v417_v58 }
 0x3b9   :  { %1543 = vtanh.f32 %v1768_v60 }
 0x3be   :  { %v485_v63 = vpop.permute.xlu1 %484 }
 0x3bf   :  { %v1544_v2 = vpop.eup %1543  ;;  %v1772_v6 = vadd.f32 %v485_v63, %v477_v62 }
 0x3c0   :  { %430 = vrot.lane.b32.xlu2 %v1544_v2, %s1645_s29 }
 0x3c1   :  { %1545 = vtanh.f32 %v1772_v6 }
 0x3c7   :  { %v1546_v7 = vpop.eup %1545 }
 0x3c8   :  { %490 = vrot.lane.b32.xlu0 %v1546_v7, %s1645_s29 }
 0x41a   :  { %v431_v8 = vpop.permute.xlu2 %430 }
 0x41b   :  { %v433_v56 = vmul.f32 %v431_v8, %v414_v47 }
 0x41d   :  { %v1777_v9 = vpack.c.bf16 %v433_v56, %v433_v56 }
 0x41f   :  { %v520_v11 = vunpack.c.l.b16 %v1777_v9 }
 0x421   :  { %v521_v12 = vpack.c.b16 %v520_v11, %v520_v11 }
 0x423   :  { %522 = vrot.lane.b32.xlu1 %v521_v12, %s1644_s2 }
 0x43a   :  { %v491_v61 = vpop.permute.xlu0 %490 }
 0x43b   :  { %v493_v13 = vmul.f32 %v491_v61, %v474_v55 }
 0x43d   :  { %v1781_v14 = vpack.c.bf16 %v493_v13, %v493_v13 }
 0x43f   :  { %v580_v15 = vunpack.c.l.b16 %v1781_v14 }
 0x441   :  { %v581_v16 = vpack.c.b16 %v580_v15, %v580_v15 }
 0x443   :  { %582 = vrot.lane.b32.xlu2 %v581_v16, %s1644_s2 }
 0x495   :  { %v523_v18 = vpop.permute.xlu1 %522 }
 0x496   :  { %1472 = vmatmul.msk.bf16.vlgmr.msrb.gmra.mxu0 %vm217_vm1, %v523_v18 }
 0x497   :  { %1109 = vmatpush.bf16.msrb.mxu0 %v1680_v0 }
 0x49b   :  { %1110 = vmatpush.bf16.msrb.mxu0 %v1693_v3 }
 0x49d   :  { %v583_v19 = vpop.permute.xlu2 %582 }
 0x49e   :  { %1474 = vmatmul.msk.bf16.vlgmr.msrb.gmra.mxu1 %vm217_vm1, %v583_v19 }
 0x49f   :  { %1169 = vmatpush.bf16.msrb.mxu1 %v1685_v1 }
 0x4a3   :  { %1170 = vmatpush.bf16.msrb.mxu1 %v1698_v4 }
 0x513   :  { %v536_v22 = vpop.f32.mrf.mxu0 }
 0x514   :  { %v540_v23 = vadd.f32 %v536_v22, %v519_v21 }
 0x516   :  { %1547 = vtanh.f32 %v540_v23  ;;  %v1473_v31 = vmul.f32 -1.442695, %v540_v23  ;;  %v35_v23 = vld [vmem:[%s2099_s0 + $0xc] sm:$0x3] }
 0x517   :  { %36 = vst [vmem:[#allocation6 + $0x6] sm:$0x3] %v35_v23 }
 0x51b   :  { %v538_v25 = vpop.f32.mrf.mxu0  ;;  %v596_v26 = vpop.f32.mrf.mxu1 }
 0x51c   :  { %v1548_v27 = vpop.eup %1547  ;;  %v600_v28 = vadd.f32 %v596_v26, %v579_v24  ;;  %v1441_v26 = vld [vmem:[%s2100_s1 + $0x12] sm:$0x3] }
 0x51d   :  { %563 = vrot.lane.b32.xlu0 %v1548_v27, %s1645_s29  ;;  %115 = vst [vmem:[#allocation7 + $0x8] sm:$0x3] %v1441_v26 }
 0x51e   :  { %1549 = vtanh.f32 %v600_v28  ;;  %v1475_v32 = vmul.f32 -1.442695, %v600_v28  ;;  %v663_v27 = vld [vmem:[#allocation6 + $0x6] sm:$0x3] }
 0x51f   :  { %1551 = vpow2.f32 %v1473_v31 }
 0x520   :  { %1553 = vpow2.f32 %v1475_v32 }
 0x523   :  { %v598_v29 = vpop.f32.mrf.mxu1 }
 0x524   :  { %v1550_v30 = vpop.eup %1549 }
 0x525   :  { %623 = vrot.lane.b32.xlu1 %v1550_v30, %s1645_s29  ;;  %v1552_v33 = vpop.eup %1551  ;;  %v723_v30 = vld [vmem:[#allocation7 + $0x8] sm:$0x3] }
 0x526   :  { %v544_v34 = vadd.f32 1.0, %v1552_v33  ;;  %v1554_v35 = vpop.eup %1553 }
 0x527   :  { %v604_v36 = vadd.f32 1.0, %v1554_v35 }
 0x528   :  { %1555 = vrcp.f32 %v544_v34  ;;  %v556_v45 = vand.u32 2147483648, %v544_v34  ;;  %vm550_vm5 = vweird.f32 %v544_v34  ;;  %v554_v46 = vand.u32 2147483647, %v544_v34 }
 0x529   :  { %1557 = vrcp.f32 %v604_v36  ;;  %v616_v54 = vand.u32 2147483648, %v604_v36  ;;  %vm610_vm9 = vweird.f32 %v604_v36  ;;  %v614_v55 = vand.u32 2147483647, %v604_v36 }
 0x52a   :  { %v557_v49 = vor.u32 1.1754944e-38, %v556_v45  ;;  %vm555_vm7 = vcmp.eq.f32.partialorder %v554_v46, 8.507059e+37 }
 0x52b   :  { %v617_v58 = vor.u32 1.1754944e-38, %v616_v54  ;;  %vm615_vm11 = vcmp.eq.f32.partialorder %v614_v55, 8.507059e+37 }
 0x52e   :  { %v1556_v37 = vpop.eup %1555 }
 0x52f   :  { %v546_v38 = vmul.f32 %v1556_v37, %v544_v34  ;;  %v1558_v40 = vpop.eup %1557  ;;  %vm551_vm4 = vweird.f32 %v1556_v37 }
 0x530   :  { %v606_v42 = vmul.f32 %v1558_v40, %v604_v36  ;;  %vm552_vm6 = vmor %vm550_vm5, %vm551_vm4  ;;  %vm611_vm8 = vweird.f32 %v1558_v40 }
 0x531   :  { %v547_v39 = vsub.f32 1.0, %v546_v38  ;;  %vm612_vm10 = vmor %vm610_vm9, %vm611_vm8 }
 0x532   :  { %v607_v44 = vsub.f32 1.0, %v606_v42 }
 0x533   :  { %v548_v41 = vmul.f32 %v1556_v37, %v547_v39 }
 0x534   :  { %v608_v48 = vmul.f32 %v1558_v40, %v607_v44 }
 0x535   :  { %v549_v43 = vadd.f32 %v1556_v37, %v548_v41 }
 0x536   :  { %v609_v53 = vadd.f32 %v1558_v40, %v608_v48 }
 0x537   :  { %v553_v47 = vsel %vm552_vm6, %v1556_v37, %v549_v43 }
 0x538   :  { %v558_v50 = vsel %vm555_vm7, %v557_v49, %v553_v47  ;;  %v613_v57 = vsel %vm612_vm10, %v1558_v40, %v609_v53 }
 0x539   :  { %v618_v62 = vsel %vm615_vm11, %v617_v58, %v613_v57  ;;  %v561_v2 = vmul.f32 %v558_v50, %v1768_v60 }
 0x53a   :  { %v621_v11 = vmul.f32 %v618_v62, %v1772_v6 }
 0x58f   :  { %v564_v51 = vpop.permute.xlu0 %563 }
 0x590   :  { %v566_v52 = vmul.f32 %v564_v51, %v558_v50 }
 0x592   :  { %568 = vrot.lane.b32.xlu2 %v566_v52, %s1644_s2 }
 0x597   :  { %v624_v59 = vpop.permute.xlu1 %623 }
 0x598   :  { %v626_v63 = vmul.f32 %v624_v59, %v618_v62 }
 0x59a   :  { %628 = vrot.lane.b32.xlu0 %v626_v63, %s1644_s2 }
 0x5ec   :  { %v569_v7 = vpop.permute.xlu2 %568 }
 0x5ed   :  { %v1802_v8 = vadd.f32 %v569_v7, %v561_v2 }
 0x5ef   :  { %1559 = vtanh.f32 %v1802_v8 }
 0x5f5   :  { %v1560_v56 = vpop.eup %1559 }
 0x5f6   :  { %574 = vrot.lane.b32.xlu1 %v1560_v56, %s1645_s29 }
 0x60c   :  { %v629_v12 = vpop.permute.xlu0 %628 }
 0x60d   :  { %v1807_v61 = vadd.f32 %v629_v12, %v621_v11 }
 0x60f   :  { %1561 = vtanh.f32 %v1807_v61 }
 0x615   :  { %v1562_v13 = vpop.eup %1561 }
 0x616   :  { %634 = vrot.lane.b32.xlu2 %v1562_v13, %s1645_s29 }
 0x668   :  { %v575_v15 = vpop.permute.xlu1 %574 }
 0x669   :  { %v577_v60 = vmul.f32 %v575_v15, %v558_v50 }
 0x66b   :  { %v1811_v16 = vpack.c.bf16 %v577_v60, %v577_v60 }
 0x66d   :  { %v664_v17 = vunpack.c.l.b16 %v1811_v16 }
 0x66f   :  { %v665_v18 = vpack.c.b16 %v664_v17, %v664_v17 }
 0x670   :  { %v635_v19 = vpop.permute.xlu2 %634 }
 0x671   :  { %v637_v20 = vmul.f32 %v635_v19, %v618_v62  ;;  %666 = vrot.lane.b32.xlu0 %v665_v18, %s1644_s2 }
 0x673   :  { %v1815_v6 = vpack.c.bf16 %v637_v20, %v637_v20 }
 0x675   :  { %v724_v21 = vunpack.c.l.b16 %v1815_v6 }
 0x677   :  { %v725_v22 = vpack.c.b16 %v724_v21, %v724_v21 }
 0x679   :  { %726 = vrot.lane.b32.xlu1 %v725_v22, %s1644_s2 }
 0x6e3   :  { %v667_v24 = vpop.permute.xlu0 %666 }
 0x6e4   :  { %1478 = vmatmul.msk.bf16.vlgmr.msrb.gmra.mxu2 %vm217_vm1, %v667_v24 }
 0x6e5   :  { %1253 = vmatpush.bf16.msrb.mxu2 %v1680_v0 }
 0x6e9   :  { %1254 = vmatpush.bf16.msrb.mxu2 %v1693_v3 }
 0x6eb   :  { %v727_v25 = vpop.permute.xlu1 %726 }
 0x6ec   :  { %1480 = vmatmul.msk.bf16.vlgmr.msrb.gmra.mxu3 %vm217_vm1, %v727_v25 }
 0x6ed   :  { %1312 = vmatpush.bf16.msrb.mxu3 %v1685_v1 }
 0x6f1   :  { %1313 = vmatpush.bf16.msrb.mxu3 %v1698_v4 }
 0x767   :  { %v680_v28 = vpop.f32.mrf.mxu2 }
 0x768   :  { %v684_v29 = vadd.f32 %v680_v28, %v663_v27  ;;  %v37_v28 = vld [vmem:[%s2099_s0 + $0x10] sm:$0x3] }
 0x769   :  { %38 = vst [vmem:[#allocation6 + $0x8] sm:$0x3] %v37_v28 }
 0x76a   :  { %1563 = vtanh.f32 %v684_v29  ;;  %v1479_v4 = vmul.f32 -1.442695, %v684_v29 }
 0x76f   :  { %v682_v0 = vpop.f32.mrf.mxu2  ;;  %v740_v31 = vpop.f32.mrf.mxu3 }
 0x770   :  { %v1564_v3 = vpop.eup %1563  ;;  %v744_v32 = vadd.f32 %v740_v31, %v723_v30  ;;  %v1440_v30 = vld [vmem:[%s2100_s1 + $0xe] sm:$0x3]  ;;  %v807_v0 = vld [vmem:[#allocation6 + $0x8] sm:$0x3] }
 0x771   :  { %707 = vrot.lane.b32.xlu2 %v1564_v3, %s1645_s29  ;;  %113 = vst [vmem:[#allocation7 + $0x6] sm:$0x3] %v1440_v30 }
 0x772   :  { %1565 = vtanh.f32 %v744_v32  ;;  %v1481_v39 = vmul.f32 -1.442695, %v744_v32 }
 0x773   :  { %1567 = vpow2.f32 %v1479_v4 }
 0x777   :  { %v742_v1 = vpop.f32.mrf.mxu3 }
 0x778   :  { %v1566_v33 = vpop.eup %1565 }
 0x779   :  { %767 = vrot.lane.b32.xlu0 %v1566_v33, %s1645_s29  ;;  %v1568_v34 = vpop.eup %1567  ;;  %v867_v33 = vld [vmem:[#allocation7 + $0x6] sm:$0x3] }
 0x77a   :  { %v688_v35 = vadd.f32 1.0, %v1568_v34 }
 0x77c   :  { %1569 = vrcp.f32 %v688_v35  ;;  %v700_v42 = vand.u32 2147483648, %v688_v35  ;;  %vm694_vm13 = vweird.f32 %v688_v35  ;;  %v698_v43 = vand.u32 2147483647, %v688_v35 }
 0x77d   :  { %1571 = vpow2.f32 %v1481_v39 }
 0x77e   :  { %v701_v46 = vor.u32 1.1754944e-38, %v700_v42  ;;  %vm699_vm15 = vcmp.eq.f32.partialorder %v698_v43, 8.507059e+37 }
 0x782   :  { %v1570_v36 = vpop.eup %1569 }
 0x783   :  { %v690_v37 = vmul.f32 %v1570_v36, %v688_v35  ;;  %vm695_vm12 = vweird.f32 %v1570_v36  ;;  %v1572_v44 = vpop.eup %1571 }
 0x784   :  { %vm696_vm14 = vmor %vm694_vm13, %vm695_vm12  ;;  %v748_v47 = vadd.f32 1.0, %v1572_v44 }
 0x785   :  { %v691_v38 = vsub.f32 1.0, %v690_v37 }
 0x786   :  { %1573 = vrcp.f32 %v748_v47  ;;  %v760_v57 = vand.u32 2147483648, %v748_v47  ;;  %vm754_vm3 = vweird.f32 %v748_v47  ;;  %v758_v58 = vand.u32 2147483647, %v748_v47 }
 0x787   :  { %v692_v40 = vmul.f32 %v1570_v36, %v691_v38 }
 0x788   :  { %v761_v62 = vor.u32 1.1754944e-38, %v760_v57  ;;  %vm759_vm5 = vcmp.eq.f32.partialorder %v758_v58, 8.507059e+37 }
 0x789   :  { %v693_v41 = vadd.f32 %v1570_v36, %v692_v40 }
 0x78b   :  { %v697_v45 = vsel %vm696_vm14, %v1570_v36, %v693_v41 }
 0x78c   :  { %v702_v49 = vsel %vm699_vm15, %v701_v46, %v697_v45  ;;  %v1574_v51 = vpop.eup %1573 }
 0x78d   :  { %v750_v52 = vmul.f32 %v1574_v51, %v748_v47  ;;  %vm755_vm2 = vweird.f32 %v1574_v51  ;;  %v705_v56 = vmul.f32 %v702_v49, %v1802_v8 }
 0x78e   :  { %vm756_vm4 = vmor %vm754_vm3, %vm755_vm2 }
 0x78f   :  { %v751_v53 = vsub.f32 1.0, %v750_v52 }
 0x791   :  { %v752_v54 = vmul.f32 %v1574_v51, %v751_v53 }
 0x793   :  { %v753_v55 = vadd.f32 %v1574_v51, %v752_v54 }
 0x795   :  { %v757_v59 = vsel %vm756_vm4, %v1574_v51, %v753_v55 }
 0x796   :  { %v762_v63 = vsel %vm759_vm5, %v761_v62, %v757_v59 }
 0x797   :  { %v765_v13 = vmul.f32 %v762_v63, %v1807_v61 }
 0x7cb   :  { %v708_v48 = vpop.permute.xlu2 %707 }
 0x7cc   :  { %v710_v50 = vmul.f32 %v708_v48, %v702_v49 }
 0x7ce   :  { %712 = vrot.lane.b32.xlu1 %v710_v50, %s1644_s2 }
 0x7eb   :  { %v768_v2 = vpop.permute.xlu0 %767 }
 0x7ec   :  { %v770_v7 = vmul.f32 %v768_v2, %v762_v63 }
 0x7ee   :  { %772 = vrot.lane.b32.xlu2 %v770_v7, %s1644_s2 }
 0x840   :  { %v713_v11 = vpop.permute.xlu1 %712 }
 0x841   :  { %v1836_v12 = vadd.f32 %v713_v11, %v705_v56 }
 0x843   :  { %1575 = vtanh.f32 %v1836_v12 }
 0x848   :  { %v773_v15 = vpop.permute.xlu2 %772 }
 0x849   :  { %v1576_v60 = vpop.eup %1575  ;;  %v1840_v17 = vadd.f32 %v773_v15, %v765_v13 }
 0x84a   :  { %718 = vrot.lane.b32.xlu0 %v1576_v60, %s1645_s29 }
 0x84b   :  { %1577 = vtanh.f32 %v1840_v17 }
 0x851   :  { %v1578_v18 = vpop.eup %1577 }
 0x852   :  { %778 = vrot.lane.b32.xlu1 %v1578_v18, %s1645_s29 }
 0x8bc   :  { %v719_v19 = vpop.permute.xlu0 %718 }
 0x8bd   :  { %v721_v8 = vmul.f32 %v719_v19, %v702_v49 }
 0x8bf   :  { %v1845_v20 = vpack.c.bf16 %v721_v8, %v721_v8 }
 0x8c1   :  { %v808_v21 = vunpack.c.l.b16 %v1845_v20 }
 0x8c3   :  { %v809_v22 = vpack.c.b16 %v808_v21, %v808_v21 }
 0x8c4   :  { %v779_v23 = vpop.permute.xlu1 %778 }
 0x8c5   :  { %v781_v61 = vmul.f32 %v779_v23, %v762_v63  ;;  %810 = vrot.lane.b32.xlu2 %v809_v22, %s1644_s2 }
 0x8c7   :  { %v1849_v24 = vpack.c.bf16 %v781_v61, %v781_v61 }
 0x8c9   :  { %v868_v25 = vunpack.c.l.b16 %v1849_v24 }
 0x8cb   :  { %v869_v26 = vpack.c.b16 %v868_v25, %v868_v25 }
 0x8cd   :  { %870 = vrot.lane.b32.xlu0 %v869_v26, %s1644_s2 }
 0x91f   :  { %v811_v27 = vpop.permute.xlu2 %810 }
 0x920   :  { %1484 = vmatmul.msk.bf16.vlgmr.msra.gmra.mxu0 %vm217_vm1, %v811_v27 }
 0x93f   :  { %v871_v29 = vpop.permute.xlu0 %870 }
 0x940   :  { %1486 = vmatmul.msk.bf16.vlgmr.msra.gmra.mxu1 %vm217_vm1, %v871_v29 }
 0x99d   :  { %v824_v31 = vpop.f32.mrf.mxu0 }
 0x99e   :  { %v828_v3 = vadd.f32 %v824_v31, %v807_v0 }
 0x9a0   :  { %1579 = vtanh.f32 %v828_v3  ;;  %v1485_v37 = vmul.f32 -1.442695, %v828_v3  ;;  %v39_v3 = vld [vmem:[%s2099_s0 + $0x14] sm:$0x3] }
 0x9a1   :  { %40 = vst [vmem:[#allocation6 + $0xa] sm:$0x3] %v39_v3 }
 0x9a5   :  { %v826_v32 = vpop.f32.mrf.mxu0 }
 0x9a6   :  { %v1580_v1 = vpop.eup %1579 }
 0x9a7   :  { %851 = vrot.lane.b32.xlu1 %v1580_v1, %s1645_s29 }
 0x9bd   :  { %v884_v4 = vpop.f32.mrf.mxu1 }
 0x9be   :  { %v888_v34 = vadd.f32 %v884_v4, %v867_v33  ;;  %v1439_v33 = vld [vmem:[%s2100_s1 + $0xa] sm:$0x3]  ;;  %v951_v4 = vld [vmem:[#allocation6 + $0xa] sm:$0x3] }
 0x9bf   :  { %111 = vst [vmem:[#allocation7 + $0x4] sm:$0x3] %v1439_v33 }
 0x9c0   :  { %1581 = vtanh.f32 %v888_v34  ;;  %v1487_v38 = vmul.f32 -1.442695, %v888_v34 }
 0x9c1   :  { %1583 = vpow2.f32 %v1485_v37 }
 0x9c2   :  { %1585 = vpow2.f32 %v1487_v38 }
 0x9c5   :  { %v886_v35 = vpop.f32.mrf.mxu1 }
 0x9c6   :  { %v1582_v36 = vpop.eup %1581 }
 0x9c7   :  { %911 = vrot.lane.b32.xlu2 %v1582_v36, %s1645_s29  ;;  %v1584_v39 = vpop.eup %1583  ;;  %v1011_v36 = vld [vmem:[#allocation7 + $0x4] sm:$0x3] }
 0x9c8   :  { %v832_v40 = vadd.f32 1.0, %v1584_v39  ;;  %v1586_v41 = vpop.eup %1585 }
 0x9c9   :  { %v892_v42 = vadd.f32 1.0, %v1586_v41 }
 0x9ca   :  { %1587 = vrcp.f32 %v832_v40  ;;  %v844_v51 = vand.u32 2147483648, %v832_v40  ;;  %vm838_vm7 = vweird.f32 %v832_v40  ;;  %v842_v52 = vand.u32 2147483647, %v832_v40 }
 0x9cb   :  { %1589 = vrcp.f32 %v892_v42  ;;  %v904_v63 = vand.u32 2147483648, %v892_v42  ;;  %vm898_vm11 = vweird.f32 %v892_v42  ;;  %v902_v2 = vand.u32 2147483647, %v892_v42 }
 0x9cc   :  { %v845_v55 = vor.u32 1.1754944e-38, %v844_v51  ;;  %vm843_vm9 = vcmp.eq.f32.partialorder %v842_v52, 8.507059e+37 }
 0x9cd   :  { %v905_v56 = vor.u32 1.1754944e-38, %v904_v63  ;;  %vm903_vm13 = vcmp.eq.f32.partialorder %v902_v2, 8.507059e+37 }
 0x9d0   :  { %v1588_v43 = vpop.eup %1587 }
 0x9d1   :  { %v834_v44 = vmul.f32 %v1588_v43, %v832_v40  ;;  %v1590_v46 = vpop.eup %1589  ;;  %vm839_vm6 = vweird.f32 %v1588_v43 }
 0x9d2   :  { %v894_v48 = vmul.f32 %v1590_v46, %v892_v42  ;;  %vm840_vm8 = vmor %vm838_vm7, %vm839_vm6  ;;  %vm899_vm10 = vweird.f32 %v1590_v46 }
 0x9d3   :  { %v835_v45 = vsub.f32 1.0, %v834_v44  ;;  %vm900_vm12 = vmor %vm898_vm11, %vm899_vm10 }
 0x9d4   :  { %v895_v50 = vsub.f32 1.0, %v894_v48 }
 0x9d5   :  { %v836_v47 = vmul.f32 %v1588_v43, %v835_v45 }
 0x9d6   :  { %v896_v54 = vmul.f32 %v1590_v46, %v895_v50 }
 0x9d7   :  { %v837_v49 = vadd.f32 %v1588_v43, %v836_v47 }
 0x9d8   :  { %v897_v62 = vadd.f32 %v1590_v46, %v896_v54 }
 0x9d9   :  { %v841_v53 = vsel %vm840_vm8, %v1588_v43, %v837_v49 }
 0x9da   :  { %v846_v58 = vsel %vm843_vm9, %v845_v55, %v841_v53  ;;  %v901_v7 = vsel %vm900_vm12, %v1590_v46, %v897_v62 }
 0x9db   :  { %v906_v13 = vsel %vm903_vm13, %v905_v56, %v901_v7  ;;  %v849_v60 = vmul.f32 %v846_v58, %v1836_v12 }
 0x9dc   :  { %v909_v8 = vmul.f32 %v906_v13, %v1840_v17 }
 0xa19   :  { %v852_v57 = vpop.permute.xlu1 %851 }
 0xa1a   :  { %v854_v59 = vmul.f32 %v852_v57, %v846_v58 }
 0xa1c   :  { %856 = vrot.lane.b32.xlu0 %v854_v59, %s1644_s2 }
 0xa21   :  { %v912_v11 = vpop.permute.xlu2 %911 }
 0xa22   :  { %v914_v15 = vmul.f32 %v912_v11, %v906_v13 }
 0xa24   :  { %916 = vrot.lane.b32.xlu1 %v914_v15, %s1644_s2 }
 0xa8e   :  { %v857_v18 = vpop.permute.xlu0 %856 }
 0xa8f   :  { %v1866_v19 = vadd.f32 %v857_v18, %v849_v60 }
 0xa91   :  { %1591 = vtanh.f32 %v1866_v19 }
 0xa96   :  { %v917_v21 = vpop.permute.xlu1 %916 }
 0xa97   :  { %v1592_v22 = vpop.eup %1591  ;;  %v1870_v23 = vadd.f32 %v917_v21, %v909_v8 }
 0xa98   :  { %862 = vrot.lane.b32.xlu2 %v1592_v22, %s1645_s29 }
 0xa99   :  { %1593 = vtanh.f32 %v1870_v23 }
 0xa9f   :  { %v1594_v61 = vpop.eup %1593 }
 0xaa0   :  { %922 = vrot.lane.b32.xlu0 %v1594_v61, %s1645_s29 }
 0xaf2   :  { %v863_v25 = vpop.permute.xlu2 %862 }
 0xaf3   :  { %v865_v12 = vmul.f32 %v863_v25, %v846_v58 }
 0xaf5   :  { %v1875_v26 = vpack.c.bf16 %v865_v12, %v865_v12 }
 0xaf7   :  { %v952_v27 = vunpack.c.l.b16 %v1875_v26 }
 0xaf9   :  { %v953_v28 = vpack.c.b16 %v952_v27, %v952_v27 }
 0xafb   :  { %954 = vrot.lane.b32.xlu1 %v953_v28, %s1644_s2 }
 0xb12   :  { %v923_v17 = vpop.permute.xlu0 %922 }
 0xb13   :  { %v925_v29 = vmul.f32 %v923_v17, %v906_v13 }
 0xb15   :  { %v1879_v30 = vpack.c.bf16 %v925_v29, %v925_v29 }
 0xb17   :  { %v1012_v0 = vunpack.c.l.b16 %v1879_v30 }
 0xb19   :  { %v1013_v31 = vpack.c.b16 %v1012_v0, %v1012_v0 }
 0xb1b   :  { %1014 = vrot.lane.b32.xlu2 %v1013_v31, %s1644_s2 }
 0xb6d   :  { %v955_v32 = vpop.permute.xlu1 %954 }
 0xb6e   :  { %1490 = vmatmul.msk.bf16.vlgmr.msra.gmra.mxu2 %vm217_vm1, %v955_v32 }
 0xb75   :  { %v1015_v1 = vpop.permute.xlu2 %1014 }
 0xb76   :  { %1492 = vmatmul.msk.bf16.vlgmr.msra.gmra.mxu3 %vm217_vm1, %v1015_v1 }
 0xbf1   :  { %v968_v34 = vpop.f32.mrf.mxu2 }
 0xbf2   :  { %v972_v35 = vadd.f32 %v968_v34, %v951_v4 }
 0xbf4   :  { %1595 = vtanh.f32 %v972_v35  ;;  %v1491_v43 = vmul.f32 -1.442695, %v972_v35 }
 0xbf9   :  { %v970_v37 = vpop.f32.mrf.mxu2  ;;  %v1028_v38 = vpop.f32.mrf.mxu3 }
 0xbfa   :  { %v1596_v39 = vpop.eup %1595  ;;  %v1032_v40 = vadd.f32 %v1028_v38, %v1011_v36  ;;  %v41_v37 = vld [vmem:[%s2099_s0 + $0x18] sm:$0x3] }
 0xbfb   :  { %995 = vrot.lane.b32.xlu0 %v1596_v39, %s1645_s29  ;;  %42 = vst [vmem:[#allocation6 + $0xc] sm:$0x3] %v41_v37 }
 0xbfc   :  { %1597 = vtanh.f32 %v1032_v40  ;;  %v1493_v44 = vmul.f32 -1.442695, %v1032_v40  ;;  %v1438_v40 = vld [vmem:[%s2100_s1 + $0x6] sm:$0x3] }
 0xbfd   :  { %1599 = vpow2.f32 %v1491_v43  ;;  %109 = vst [vmem:[#allocation7 + $0x2] sm:$0x3] %v1438_v40 }
 0xbfe   :  { %1601 = vpow2.f32 %v1493_v44 }
 0xc01   :  { %v1030_v41 = vpop.f32.mrf.mxu3 }
 0xc02   :  { %v1598_v42 = vpop.eup %1597  ;;  %v1095_v41 = vld [vmem:[#allocation6 + $0xc] sm:$0x3] }
 0xc03   :  { %1055 = vrot.lane.b32.xlu1 %v1598_v42, %s1645_s29  ;;  %v1600_v45 = vpop.eup %1599 }
 0xc04   :  { %v976_v46 = vadd.f32 1.0, %v1600_v45  ;;  %v1602_v47 = vpop.eup %1601  ;;  %v1155_v44 = vld [vmem:[#allocation7 + $0x2] sm:$0x3] }
 0xc05   :  { %v1036_v48 = vadd.f32 1.0, %v1602_v47 }
 0xc06   :  { %1603 = vrcp.f32 %v976_v46  ;;  %v988_v58 = vand.u32 2147483648, %v976_v46  ;;  %vm982_vm15 = vweird.f32 %v976_v46  ;;  %v986_v59 = vand.u32 2147483647, %v976_v46 }
 0xc07   :  { %1605 = vrcp.f32 %v1036_v48  ;;  %v1048_v15 = vand.u32 2147483648, %v1036_v48  ;;  %vm1042_vm5 = vweird.f32 %v1036_v48  ;;  %v1046_v60 = vand.u32 2147483647, %v1036_v48 }
 0xc08   :  { %v989_v2 = vor.u32 1.1754944e-38, %v988_v58  ;;  %vm987_vm3 = vcmp.eq.f32.partialorder %v986_v59, 8.507059e+37 }
 0xc09   :  { %v1049_v8 = vor.u32 1.1754944e-38, %v1048_v15  ;;  %vm1047_vm7 = vcmp.eq.f32.partialorder %v1046_v60, 8.507059e+37 }
 0xc0c   :  { %v1604_v49 = vpop.eup %1603 }
 0xc0d   :  { %v978_v50 = vmul.f32 %v1604_v49, %v976_v46  ;;  %v1606_v52 = vpop.eup %1605  ;;  %vm983_vm14 = vweird.f32 %v1604_v49 }
 0xc0e   :  { %v1038_v54 = vmul.f32 %v1606_v52, %v1036_v48  ;;  %vm984_vm2 = vmor %vm982_vm15, %vm983_vm14  ;;  %vm1043_vm4 = vweird.f32 %v1606_v52 }
 0xc0f   :  { %v979_v51 = vsub.f32 1.0, %v978_v50  ;;  %vm1044_vm6 = vmor %vm1042_vm5, %vm1043_vm4 }
 0xc10   :  { %v1039_v57 = vsub.f32 1.0, %v1038_v54 }
 0xc11   :  { %v980_v53 = vmul.f32 %v1604_v49, %v979_v51 }
 0xc12   :  { %v1040_v63 = vmul.f32 %v1606_v52, %v1039_v57 }
 0xc13   :  { %v981_v55 = vadd.f32 %v1604_v49, %v980_v53 }
 0xc14   :  { %v1041_v13 = vadd.f32 %v1606_v52, %v1040_v63 }
 0xc15   :  { %v985_v62 = vsel %vm984_vm2, %v1604_v49, %v981_v55 }
 0xc16   :  { %v990_v7 = vsel %vm987_vm3, %v989_v2, %v985_v62  ;;  %v1045_v18 = vsel %vm1044_vm6, %v1606_v52, %v1041_v13 }
 0xc17   :  { %v1050_v22 = vsel %vm1047_vm7, %v1049_v8, %v1045_v18  ;;  %v993_v25 = vmul.f32 %v990_v7, %v1866_v19 }
 0xc18   :  { %v1053_v17 = vmul.f32 %v1050_v22, %v1870_v23 }
 0xc6d   :  { %v996_v56 = vpop.permute.xlu0 %995 }
 0xc6e   :  { %v998_v11 = vmul.f32 %v996_v56, %v990_v7 }
 0xc70   :  { %1000 = vrot.lane.b32.xlu2 %v998_v11, %s1644_s2 }
 0xc75   :  { %v1056_v21 = vpop.permute.xlu1 %1055 }
 0xc76   :  { %v1058_v61 = vmul.f32 %v1056_v21, %v1050_v22 }
 0xc78   :  { %1060 = vrot.lane.b32.xlu0 %v1058_v61, %s1644_s2 }
 0xcca   :  { %v1001_v12 = vpop.permute.xlu2 %1000 }
 0xccb   :  { %v1896_v27 = vadd.f32 %v1001_v12, %v993_v25 }
 0xccd   :  { %1607 = vtanh.f32 %v1896_v27 }
 0xcd3   :  { %v1608_v28 = vpop.eup %1607 }
 0xcd4   :  { %1006 = vrot.lane.b32.xlu1 %v1608_v28, %s1645_s29 }
 0xcea   :  { %v1061_v29 = vpop.permute.xlu0 %1060 }
 0xceb   :  { %v1901_v0 = vadd.f32 %v1061_v29, %v1053_v17 }
 0xced   :  { %1609 = vtanh.f32 %v1901_v0 }
 0xcf3   :  { %v1610_v31 = vpop.eup %1609 }
 0xcf4   :  { %1066 = vrot.lane.b32.xlu2 %v1610_v31, %s1645_s29 }
 0xd46   :  { %v1007_v3 = vpop.permute.xlu1 %1006 }
 0xd47   :  { %v1009_v19 = vmul.f32 %v1007_v3, %v990_v7 }
 0xd49   :  { %v1905_v32 = vpack.c.bf16 %v1009_v19, %v1009_v19 }
 0xd4b   :  { %v1096_v1 = vunpack.c.l.b16 %v1905_v32 }
 0xd4d   :  { %v1097_v33 = vpack.c.b16 %v1096_v1, %v1096_v1 }
 0xd4e   :  { %v1067_v4 = vpop.permute.xlu2 %1066 }
 0xd4f   :  { %v1069_v34 = vmul.f32 %v1067_v4, %v1050_v22  ;;  %1098 = vrot.lane.b32.xlu0 %v1097_v33, %s1644_s2 }
 0xd51   :  { %v1909_v23 = vpack.c.bf16 %v1069_v34, %v1069_v34 }
 0xd53   :  { %v1156_v35 = vunpack.c.l.b16 %v1909_v23 }
 0xd55   :  { %v1157_v36 = vpack.c.b16 %v1156_v35, %v1156_v35 }
 0xd57   :  { %1158 = vrot.lane.b32.xlu1 %v1157_v36, %s1644_s2 }
 0xdc1   :  { %v1099_v38 = vpop.permute.xlu0 %1098 }
 0xdc2   :  { %1496 = vmatmul.msk.bf16.vlgmr.msrb.gmra.mxu0 %vm217_vm1, %v1099_v38 }
 0xdc9   :  { %v1159_v39 = vpop.permute.xlu1 %1158 }
 0xdca   :  { %1498 = vmatmul.msk.bf16.vlgmr.msrb.gmra.mxu1 %vm217_vm1, %v1159_v39 }
 0xe3f   :  { %v1112_v42 = vpop.f32.mrf.mxu0 }
 0xe40   :  { %v1116_v43 = vadd.f32 %v1112_v42, %v1095_v41 }
 0xe42   :  { %1611 = vtanh.f32 %v1116_v43  ;;  %v1497_v51 = vmul.f32 -1.442695, %v1116_v43 }
 0xe47   :  { %v1114_v45 = vpop.f32.mrf.mxu0  ;;  %v1172_v46 = vpop.f32.mrf.mxu1 }
 0xe48   :  { %v1612_v47 = vpop.eup %1611  ;;  %v1176_v48 = vadd.f32 %v1172_v46, %v1155_v44 }
 0xe49   :  { %1139 = vrot.lane.b32.xlu2 %v1612_v47, %s1645_s29 }
 0xe4a   :  { %1613 = vtanh.f32 %v1176_v48  ;;  %v1499_v58 = vmul.f32 -1.442695, %v1176_v48  ;;  %v43_v48 = vld [vmem:[%s2099_s0 + $0x1c] sm:$0x3] }
 0xe4b   :  { %1615 = vpow2.f32 %v1497_v51  ;;  %44 = vst [vmem:[#allocation6 + $0xe] sm:$0x3] %v43_v48 }
 0xe4f   :  { %v1174_v49 = vpop.f32.mrf.mxu1 }
 0xe50   :  { %v1614_v50 = vpop.eup %1613 }
 0xe51   :  { %1199 = vrot.lane.b32.xlu0 %v1614_v50, %s1645_s29  ;;  %v1616_v52 = vpop.eup %1615  ;;  %v1437_v50 = vld [vmem:[%s2100_s1 + $0x2] sm:$0x3] }
 0xe52   :  { %v1120_v53 = vadd.f32 1.0, %v1616_v52  ;;  %107 = vst [vmem:[#allocation7] sm:$0x3] %v1437_v50  ;;  %v1239_v51 = vld [vmem:[#allocation6 + $0xe] sm:$0x3] }
 0xe54   :  { %1617 = vrcp.f32 %v1120_v53  ;;  %v1132_v63 = vand.u32 2147483648, %v1120_v53  ;;  %vm1126_vm9 = vweird.f32 %v1120_v53  ;;  %v1130_v2 = vand.u32 2147483647, %v1120_v53 }
 0xe55   :  { %1619 = vpow2.f32 %v1499_v58 }
 0xe56   :  { %v1133_v11 = vor.u32 1.1754944e-38, %v1132_v63  ;;  %vm1131_vm11 = vcmp.eq.f32.partialorder %v1130_v2, 8.507059e+37  ;;  %v364_v2 = vrot.slane %v1747_v10, 3 }
 0xe5a   :  { %v1618_v54 = vpop.eup %1617 }
 0xe5b   :  { %v1122_v55 = vmul.f32 %v1618_v54, %v1120_v53  ;;  %vm1127_vm8 = vweird.f32 %v1618_v54  ;;  %v1620_v7 = vpop.eup %1619 }
 0xe5c   :  { %vm1128_vm10 = vmor %vm1126_vm9, %vm1127_vm8  ;;  %v1180_v13 = vadd.f32 1.0, %v1620_v7 }
 0xe5d   :  { %v1123_v57 = vsub.f32 1.0, %v1122_v55 }
 0xe5e   :  { %1621 = vrcp.f32 %v1180_v13  ;;  %v1192_v12 = vand.u32 2147483648, %v1180_v13  ;;  %vm1186_vm13 = vweird.f32 %v1180_v13  ;;  %v1190_v28 = vand.u32 2147483647, %v1180_v13 }
 0xe5f   :  { %v1124_v59 = vmul.f32 %v1618_v54, %v1123_v57  ;;  %v1298_v57 = vld [vmem:[#allocation7] sm:$0x3] }
 0xe60   :  { %v1193_v29 = vor.u32 1.1754944e-38, %v1192_v12  ;;  %vm1191_vm15 = vcmp.eq.f32.partialorder %v1190_v28, 8.507059e+37 }
 0xe61   :  { %v1125_v62 = vadd.f32 %v1618_v54, %v1124_v59 }
 0xe63   :  { %v1129_v56 = vsel %vm1128_vm10, %v1618_v54, %v1125_v62  ;;  %vm360_vm10 = vcmask 253952  }
 0xe64   :  { %v1134_v60 = vsel %vm1131_vm11, %v1133_v11, %v1129_v56  ;;  %v1622_v8 = vpop.eup %1621 }
 0xe65   :  { %v1182_v21 = vmul.f32 %v1622_v8, %v1180_v13  ;;  %vm1187_vm12 = vweird.f32 %v1622_v8  ;;  %v1137_v1 = vmul.f32 %v1134_v60, %v1896_v27 }
 0xe66   :  { %vm1188_vm14 = vmor %vm1186_vm13, %vm1187_vm12 }
 0xe67   :  { %v1183_v22 = vsub.f32 1.0, %v1182_v21 }
 0xe69   :  { %v1184_v61 = vmul.f32 %v1622_v8, %v1183_v22 }
 0xe6b   :  { %v1185_v25 = vadd.f32 %v1622_v8, %v1184_v61 }
 0xe6d   :  { %v1189_v17 = vsel %vm1188_vm14, %v1622_v8, %v1185_v25 }
 0xe6e   :  { %v1194_v31 = vsel %vm1191_vm15, %v1193_v29, %v1189_v17 }
 0xe6f   :  { %v1197_v34 = vmul.f32 %v1194_v31, %v1901_v0 }
 0xea3   :  { %v1140_v15 = vpop.permute.xlu2 %1139 }
 0xea4   :  { %v1142_v18 = vmul.f32 %v1140_v15, %v1134_v60 }
 0xea6   :  { %1144 = vrot.lane.b32.xlu1 %v1142_v18, %s1644_s2 }
 0xec3   :  { %v1200_v3 = vpop.permute.xlu0 %1199 }
 0xec4   :  { %v1202_v19 = vmul.f32 %v1200_v3, %v1194_v31 }
 0xec6   :  { %1204 = vrot.lane.b32.xlu2 %v1202_v19, %s1644_s2 }
 0xf18   :  { %v1145_v33 = vpop.permute.xlu1 %1144 }
 0xf19   :  { %v1926_v4 = vadd.f32 %v1145_v33, %v1137_v1 }
 0xf1b   :  { %1623 = vtanh.f32 %v1926_v4 }
 0xf20   :  { %v1205_v35 = vpop.permute.xlu2 %1204 }
 0xf21   :  { %v1624_v36 = vpop.eup %1623  ;;  %v1930_v37 = vadd.f32 %v1205_v35, %v1197_v34 }
 0xf22   :  { %1150 = vrot.lane.b32.xlu0 %v1624_v36, %s1645_s29 }
 0xf23   :  { %1625 = vtanh.f32 %v1930_v37 }
 0xf29   :  { %v1626_v38 = vpop.eup %1625 }
 0xf2a   :  { %1210 = vrot.lane.b32.xlu1 %v1626_v38, %s1645_s29 }
 0xf94   :  { %v1151_v39 = vpop.permute.xlu0 %1150 }
 0xf95   :  { %v1153_v27 = vmul.f32 %v1151_v39, %v1134_v60 }
 0xf97   :  { %v1935_v40 = vpack.c.bf16 %v1153_v27, %v1153_v27 }
 0xf99   :  { %v1240_v41 = vunpack.c.l.b16 %v1935_v40 }
 0xf9b   :  { %v1241_v42 = vpack.c.b16 %v1240_v41, %v1240_v41 }
 0xf9c   :  { %v1211_v43 = vpop.permute.xlu1 %1210 }
 0xf9d   :  { %v1213_v0 = vmul.f32 %v1211_v43, %v1194_v31  ;;  %1242 = vrot.lane.b32.xlu2 %v1241_v42, %s1644_s2 }
 0xf9f   :  { %v1939_v44 = vpack.c.bf16 %v1213_v0, %v1213_v0  ;;  %v351_v0 = vrot.slane %v1743_v5, 3 }
 0xfa1   :  { %v1299_v45 = vunpack.c.l.b16 %v1939_v44 }
 0xfa3   :  { %v1300_v46 = vpack.c.b16 %v1299_v45, %v1299_v45 }
 0xfa5   :  { %1301 = vrot.lane.b32.xlu0 %v1300_v46, %s1644_s2 }
 0xff7   :  { %v1243_v47 = vpop.permute.xlu2 %1242 }
 0xff8   :  { %1502 = vmatmul.msk.bf16.vlgmr.msrb.gmra.mxu2 %vm217_vm1, %v1243_v47  ;;  %v508_v47 = vrot.slane %v1781_v14, 3 }
0x1017   :  { %v1302_v49 = vpop.permute.xlu0 %1301 }
0x1018   :  { %1504 = vmatmul.msk.bf16.vlgmr.msrb.gmra.mxu3 %vm217_vm1, %v1302_v49  ;;  %vm352_vm1 = vcmask 1040384   ;;  %v784_v49 = vrot.slane %v1845_v20, 3 }
0x1019   :  { %v367_v7 = vsel %vm352_vm1, %v1747_v10, %v364_v2  ;;  %v355_v46 = vsel %vm352_vm1, %v1743_v5, %v351_v0  ;;  %v511_v48 = vsel %vm352_vm1, %v1781_v14, %v508_v47 }
0x101a   :  { %v787_v50 = vsel %vm352_vm1, %v1845_v20, %v784_v49 }
0x107b   :  { %v1256_v52 = vpop.f32.mrf.mxu2 }
0x107c   :  { %v1260_v53 = vadd.f32 %v1256_v52, %v1239_v51  ;;  %v940_v51 = vrot.slane %v1879_v30, 3  ;;  %v1216_v52 = vrot.slane %v1935_v40, 3 }
0x107e   :  { %1627 = vtanh.f32 %v1260_v53  ;;  %v1503_v56 = vmul.f32 -1.442695, %v1260_v53  ;;  %v943_v5 = vsel %vm352_vm1, %v1879_v30, %v940_v51  ;;  %v1219_v14 = vsel %vm352_vm1, %v1935_v40, %v1216_v52 }
0x1083   :  { %v1258_v54 = vpop.f32.mrf.mxu2 }
0x1084   :  { %v1628_v55 = vpop.eup %1627 }
0x1085   :  { %1283 = vrot.lane.b32.xlu1 %v1628_v55, %s1645_s29 }
0x109b   :  { %v1315_v58 = vpop.f32.mrf.mxu3 }
0x109c   :  { %v1319_v59 = vadd.f32 %v1315_v58, %v1298_v57 }
0x109e   :  { %1629 = vtanh.f32 %v1319_v59  ;;  %v1505_v11 = vmul.f32 -1.442695, %v1319_v59  ;;  %v640_v59 = vrot.slane %v1811_v16, 3 }
0x109f   :  { %1631 = vpow2.f32 %v1503_v56  ;;  %v652_v56 = vrot.slane %v1815_v6, 3 }
0x10a0   :  { %1633 = vpow2.f32 %v1505_v11  ;;  %v1072_v11 = vrot.slane %v1905_v32, 3 }
0x10a3   :  { %v1317_v62 = vpop.f32.mrf.mxu3 }
0x10a4   :  { %v1630_v63 = vpop.eup %1629 }
0x10a5   :  { %1342 = vrot.lane.b32.xlu2 %v1630_v63, %s1645_s29  ;;  %v1632_v13 = vpop.eup %1631  ;;  %v796_v63 = vrot.slane %v1849_v24, 3 }
0x10a6   :  { %v1264_v15 = vadd.f32 1.0, %v1632_v13  ;;  %v1634_v60 = vpop.eup %1633 }
0x10a7   :  { %v1323_v18 = vadd.f32 1.0, %v1634_v60  ;;  %v1228_v60 = vrot.slane %v1939_v44, 3 }
0x10a8   :  { %1635 = vrcp.f32 %v1264_v15  ;;  %v1276_v17 = vand.u32 2147483648, %v1264_v15  ;;  %vm1270_vm3 = vweird.f32 %v1264_v15  ;;  %v1274_v29 = vand.u32 2147483647, %v1264_v15 }
0x10a9   :  { %1637 = vrcp.f32 %v1323_v18  ;;  %v1335_v36 = vand.u32 2147483648, %v1323_v18  ;;  %vm1329_vm7 = vweird.f32 %v1323_v18  ;;  %v1333_v38 = vand.u32 2147483647, %v1323_v18 }
0x10aa   :  { %v1277_v19 = vor.u32 1.1754944e-38, %v1276_v17  ;;  %vm1275_vm5 = vcmp.eq.f32.partialorder %v1274_v29, 8.507059e+37 }
0x10ab   :  { %v1336_v27 = vor.u32 1.1754944e-38, %v1335_v36  ;;  %vm1334_vm9 = vcmp.eq.f32.partialorder %v1333_v38, 8.507059e+37 }
0x10ad   :  { %369 = vrot.lane.b32.xlu2 %v367_v7, %s1644_s2 }
0x10ae   :  { %v1636_v8 = vpop.eup %1635 }
0x10af   :  { %v1266_v21 = vmul.f32 %v1636_v8, %v1264_v15  ;;  %v1638_v61 = vpop.eup %1637  ;;  %vm1271_vm2 = vweird.f32 %v1636_v8  ;;  %v928_v15 = vrot.slane %v1875_v26, 3 }
0x10b0   :  { %v1325_v12 = vmul.f32 %v1638_v61, %v1323_v18  ;;  %vm1272_vm4 = vmor %vm1270_vm3, %vm1271_vm2  ;;  %vm1330_vm6 = vweird.f32 %v1638_v61 }
0x10b1   :  { %v1267_v22 = vsub.f32 1.0, %v1266_v21  ;;  %vm1331_vm8 = vmor %vm1329_vm7, %vm1330_vm6 }
0x10b2   :  { %v1326_v10 = vsub.f32 1.0, %v1325_v12 }
0x10b3   :  { %v1268_v25 = vmul.f32 %v1636_v8, %v1267_v22 }
0x10b4   :  { %v1327_v3 = vmul.f32 %v1638_v61, %v1326_v10 }
0x10b5   :  { %v1269_v28 = vadd.f32 %v1636_v8, %v1268_v25 }
0x10b6   :  { %v1328_v35 = vadd.f32 %v1638_v61, %v1327_v3 }
0x10b7   :  { %v1273_v31 = vsel %vm1272_vm4, %v1636_v8, %v1269_v28  ;;  %v1084_v8 = vrot.slane %v1909_v23, 3 }
0x10b8   :  { %v1957_v33 = vsel %vm1275_vm5, %v1277_v19, %v1273_v31  ;;  %v1332_v39 = vsel %vm1331_vm8, %v1638_v61, %v1328_v35 }
0x10b9   :  { %v1961_v42 = vsel %vm1334_vm9, %v1336_v27, %v1332_v39  ;;  %v1281_v53 = vmul.f32 %v1957_v33, %v1926_v4  ;;  %v643_v4 = vsel %vm352_vm1, %v1811_v16, %v640_v59  ;;  %v799_v16 = vsel %vm352_vm1, %v1849_v24, %v796_v63 }
0x10ba   :  { %v1340_v55 = vmul.f32 %v1961_v42, %v1930_v37  ;;  %v496_v37 = vrot.slane %v1777_v9, 3  ;;  %v1075_v24 = vsel %vm352_vm1, %v1905_v32, %v1072_v11  ;;  %v1231_v32 = vsel %vm352_vm1, %v1939_v44, %v1228_v60 }
0x10bb   :  { %v1087_v22 = vsel %vm352_vm1, %v1909_v23, %v1084_v8 }
0x10bc   :  { %v499_v7 = vsel %vm352_vm1, %v1777_v9, %v496_v37  ;;  %v655_v9 = vsel %vm352_vm1, %v1815_v6, %v652_v56  ;;  %v931_v6 = vsel %vm352_vm1, %v1875_v26, %v928_v15 }
0x10f7   :  { %v1284_v1 = vpop.permute.xlu1 %1283 }
0x10f8   :  { %v1286_v34 = vmul.f32 %v1284_v1, %v1957_v33 }
0x10fa   :  { %1288 = vrot.lane.b32.xlu0 %v1286_v34, %s1644_s2 }
0x10ff   :  { %v1343_v41 = vpop.permute.xlu2 %1342 }
0x1100   :  { %v1345_v43 = vmul.f32 %v1343_v41, %v1961_v42 }
0x1102   :  { %1347 = vrot.lane.b32.xlu1 %v1345_v43, %s1644_s2 }
0x1107   :  { %v370_v45 = vpop.permute.xlu2 %369 }
0x1108   :  { %1465 = vst.msk [vmem:[%s2104_s5 + $0x7] sm:$0x1] %vm360_vm10, %v370_v45 }
0x110a   :  { %357 = vrot.lane.b32.xlu1 %v355_v46, %s1644_s2 }
0x1112   :  { %513 = vrot.lane.b32.xlu1 %v511_v48, %s1644_s2 }
0x111a   :  { %789 = vrot.lane.b32.xlu1 %v787_v50, %s1644_s2 }
0x1122   :  { %945 = vrot.lane.b32.xlu1 %v943_v5, %s1644_s2 }
0x112a   :  { %1221 = vrot.lane.b32.xlu1 %v1219_v14, %s1644_s2 }
0x116c   :  { %v1289_v20 = vpop.permute.xlu0 %1288 }
0x116d   :  { %v1291_v54 = vadd.f32 %v1289_v20, %v1281_v53 }
0x116f   :  { %1639 = vtanh.f32 %v1291_v54 }
0x1174   :  { %v1348_v57 = vpop.permute.xlu1 %1347 }
0x1175   :  { %v1640_v30 = vpop.eup %1639  ;;  %v1350_v58 = vadd.f32 %v1348_v57, %v1340_v55 }
0x1176   :  { %1294 = vrot.lane.b32.xlu2 %v1640_v30, %s1645_s29 }
0x1177   :  { %1641 = vtanh.f32 %v1350_v58 }
0x117c   :  { %v358_v40 = vpop.permute.xlu1 %357 }
0x117d   :  { %v1642_v62 = vpop.eup %1641  ;;  %361 = vst.msk [vmem:[%s2103_s4] sm:$0x1] %vm360_vm10, %v358_v40 }
0x117e   :  { %1353 = vrot.lane.b32.xlu0 %v1642_v62, %s1645_s29  ;;  %645 = vrot.lane.b32.xlu2 %v643_v4, %s1644_s2 }
0x1184   :  { %v514_v2 = vpop.permute.xlu1 %513 }
0x1185   :  { %1471 = vst.msk [vmem:[%s2104_s5 + $0x6] sm:$0x1] %vm360_vm10, %v514_v2 }
0x1186   :  { %501 = vrot.lane.b32.xlu0 %v499_v7, %s1644_s2  ;;  %801 = vrot.lane.b32.xlu2 %v799_v16, %s1644_s2 }
0x118c   :  { %v790_v13 = vpop.permute.xlu1 %789 }
0x118d   :  { %1482 = vst.msk [vmem:[%s2103_s4 + $0x3] sm:$0x1] %vm360_vm10, %v790_v13 }
0x118e   :  { %657 = vrot.lane.b32.xlu0 %v655_v9, %s1644_s2  ;;  %1077 = vrot.lane.b32.xlu2 %v1075_v24, %s1644_s2 }
0x1194   :  { %v946_v18 = vpop.permute.xlu1 %945 }
0x1195   :  { %1489 = vst.msk [vmem:[%s2104_s5 + $0x3] sm:$0x1] %vm360_vm10, %v946_v18 }
0x1196   :  { %933 = vrot.lane.b32.xlu0 %v931_v6, %s1644_s2  ;;  %1233 = vrot.lane.b32.xlu2 %v1231_v32, %s1644_s2 }
0x119c   :  { %v1222_v21 = vpop.permute.xlu1 %1221 }
0x119d   :  { %1500 = vst.msk [vmem:[%s2103_s4 + $0x6] sm:$0x1] %vm360_vm10, %v1222_v21 }
0x119e   :  { %1089 = vrot.lane.b32.xlu0 %v1087_v22, %s1644_s2 }
0x11d0   :  { %v1295_v26 = vpop.permute.xlu2 %1294 }
0x11d1   :  { %v1297_v44 = vmul.f32 %v1295_v26, %v1957_v33 }
0x11d3   :  { %v1357_v61 = vpack.c.bf16 %v1297_v44, %v1297_v44  ;;  %1381 = vrot.lane.b32.xlu2 %v1297_v44, %s1644_s2 }
0x11d5   :  { %v1359_v25 = vrot.slane %v1357_v61, 3 }
0x11d7   :  { %v1362_v12 = vsel %vm352_vm1, %v1357_v61, %v1359_v25 }
0x11d8   :  { %1364 = vrot.lane.b32.xlu0 %v1362_v12, %s1644_s2  ;;  %v646_v28 = vpop.permute.xlu2 %645 }
0x11d9   :  { %1476 = vst.msk [vmem:[%s2103_s4 + $0x2] sm:$0x1] %vm360_vm10, %v646_v28 }
0x11db   :  { %1397 = vrot.lane.b32.xlu2 %v1350_v58, %s1646_s19 }
0x11e0   :  { %1387 = vrot.lane.b32.xlu0 %v1291_v54, %s1646_s19  ;;  %v802_v23 = vpop.permute.xlu2 %801 }
0x11e1   :  { %1483 = vst.msk [vmem:[%s2104_s5 + $0x4] sm:$0x1] %vm360_vm10, %v802_v23 }
0x11e8   :  { %v1078_v10 = vpop.permute.xlu2 %1077 }
0x11e9   :  { %1494 = vst.msk [vmem:[%s2103_s4 + $0x5] sm:$0x1] %vm360_vm10, %v1078_v10 }
0x11f0   :  { %v1234_v17 = vpop.permute.xlu2 %1233  ;;  %v1354_v29 = vpop.permute.xlu0 %1353 }
0x11f1   :  { %1501 = vst.msk [vmem:[%s2104_s5 + $0x1] sm:$0x1] %vm360_vm10, %v1234_v17  ;;  %v1356_v31 = vmul.f32 %v1354_v29, %v1961_v42 }
0x11f3   :  { %v1369_v3 = vpack.c.bf16 %v1356_v31, %v1356_v31 }
0x11f5   :  { %v1371_v19 = vrot.slane %v1369_v3, 3 }
0x11f7   :  { %v1374_v1 = vsel %vm352_vm1, %v1369_v3, %v1371_v19 }
0x11f8   :  { %1376 = vrot.lane.b32.xlu1 %v1374_v1, %s1644_s2  ;;  %v502_v33 = vpop.permute.xlu0 %501 }
0x11f9   :  { %1470 = vst.msk [vmem:[%s2103_s4 + $0x1] sm:$0x1] %vm360_vm10, %v502_v33 }
0x1200   :  { %1392 = vrot.lane.b32.xlu1 %v1356_v31, %s1644_s2  ;;  %v658_v34 = vpop.permute.xlu0 %657 }
0x1201   :  { %1477 = vst.msk [vmem:[%s2104_s5 + $0x5] sm:$0x1] %vm360_vm10, %v658_v34 }
0x1208   :  { %v934_v35 = vpop.permute.xlu0 %933 }
0x1209   :  { %1488 = vst.msk [vmem:[%s2103_s4 + $0x4] sm:$0x1] %vm360_vm10, %v934_v35 }
0x1210   :  { %v1090_v36 = vpop.permute.xlu0 %1089 }
0x1211   :  { %1495 = vst.msk [vmem:[%s2104_s5 + $0x2] sm:$0x1] %vm360_vm10, %v1090_v36 }
0x122d   :  { %v1382_v38 = vpop.permute.xlu2 %1381 }
0x122e   :  { %1385 = vst.msk [vmem:[#allocation2] sm:$0x3] %vm186_vm0, %v1382_v38 }
0x1235   :  { %v1398_v39 = vpop.permute.xlu2 %1397 }
0x1236   :  { %1400 = vst.msk [vmem:[#allocation5] sm:$0x3] %vm186_vm0, %v1398_v39 }
0x124a   :  { %v1365_v27 = vpop.permute.xlu0 %1364 }
0x124b   :  { %1506 = vst.msk [vmem:[%s2103_s4 + $0x7] sm:$0x1] %vm360_vm10, %v1365_v27 }
0x1252   :  { %v1388_v41 = vpop.permute.xlu0 %1387 }
0x1253   :  { %1390 = vst.msk [vmem:[#allocation3] sm:$0x3] %vm186_vm0, %v1388_v41 }
0x126a   :  { %v1377_v42 = vpop.permute.xlu1 %1376 }
0x126b   :  { %1379 = vst.msk [vmem:[%s2104_s5] sm:$0x1] %vm360_vm10, %v1377_v42 }
0x1272   :  { %v1393_v43 = vpop.permute.xlu1 %1392 }
0x1273   :  { %1395 = vst.msk [vmem:[#allocation4] sm:$0x3] %vm186_vm0, %v1393_v43 }

</bundles_post_ra>
